<compile_context>
chip_gen: v7x
topology: tpu7x:2x2x1
jax: 0.10.0
libtpu: 0.0.40
codegen_flags: <defaults>
</compile_context>

<pallas_src>
import jax
import jax.numpy as jnp
from jax.experimental import pallas as pl
from jax.experimental.pallas import tpu as pltpu

C_OUT = 10
KSIZE = 3
SIZE = 64                      # fc = nn.Linear(10 * 64 * 64, 3) forces spatial = 64
FLAT = SIZE * SIZE             # 4096
FC_IN = C_OUT * FLAT           # 40960
FC_OUT = 3
N_ROWS = FC_OUT * C_OUT        # 30 fc-weight rows, row j = 10*o + c (torch layout)
N_TAPS = KSIZE * KSIZE + 1     # 9 conv taps + 1 conv-bias ("ones") tap

# conv tap offsets (si, sj), same order as w_conv[c, 0, di, dj].reshape(9)
_TAPS = [(di - 1, dj - 1) for di in range(KSIZE) for dj in range(KSIZE)]


def _fused_kernel(x_ref, wf_ref, wtap_ref, bfc_ref, o_ref):
    # x_ref   : VMEM (B, FLAT)        input plane, flat index k = 64*h + w
    # wf_ref  : VMEM (N_ROWS, FLAT)   fc weights, row j = 10*o + c
    # wtap_ref: VMEM (N_TAPS, N_ROWS) wtap[t, 10*o+c] = w_conv[c, t] (t<9) / b_conv[c] (t=9)
    # bfc_ref : VMEM (1, FC_OUT)      fc bias
    # o_ref   : VMEM (B, FC_OUT)      final output
    B = x_ref.shape[0]
    x = x_ref[...]
    wf = wf_ref[...]
    wt = wtap_ref[...]

    # Boundary masks for the shifted windows, in flat coordinates (hoisted, reused).
    kidx = jax.lax.broadcasted_iota(jnp.int32, (B, FLAT), 1)
    col = jnp.bitwise_and(kidx, SIZE - 1)            # w = k % 64
    row_ge_1 = kidx >= SIZE                          # h >= 1   (needed when si == -1)
    row_le_62 = kidx < (FLAT - SIZE)                 # h <= 62  (needed when si == +1)
    col_ge_1 = col >= 1                              # w >= 1   (needed when sj == -1)
    col_le_62 = col <= (SIZE - 2)                    # w <= 62  (needed when sj == +1)

    def dot_nt(a, b):                                # (B,K) x (N,K) -> (B,N) on the MXU
        return jax.lax.dot_general(
            a, b, (((1,), (1,)), ((), ())), preferred_element_type=jnp.float32)

    acc = jnp.zeros((B, N_ROWS), jnp.float32)        # acc[b, 10*o + c]
    for t, (si, sj) in enumerate(_TAPS):
        shift = SIZE * si + sj                       # window[k] = x[k + shift] (masked)
        win = x if shift == 0 else pltpu.roll(x, shift=(-shift) % FLAT, axis=1)
        conds = []
        if si == -1:
            conds.append(row_ge_1)
        if si == +1:
            conds.append(row_le_62)
        if sj == -1:
            conds.append(col_ge_1)
        if sj == +1:
            conds.append(col_le_62)
        if conds:
            m = conds[0]
            for c in conds[1:]:
                m = jnp.logical_and(m, c)
            win = jnp.where(m, win, 0.0)
        # Contract this shifted plane against ALL fc rows at once (MXU), then apply
        # the per-(channel, tap) conv weight to the tiny (B, 30) result (VPU).
        acc = acc + wt[t:t + 1, :] * dot_nt(win, wf)

    # conv-bias tap: a window of ones -> per-row sums of the fc weights.
    ones = jnp.ones((B, FLAT), jnp.float32)
    acc = acc + wt[N_TAPS - 1:N_TAPS, :] * dot_nt(ones, wf)

    # Sum the 10 channel rows of each output unit: acc @ G with G[j, o] = (j // 10 == o).
    rj = jax.lax.broadcasted_iota(jnp.int32, (N_ROWS, FC_OUT), 0)
    ro = jax.lax.broadcasted_iota(jnp.int32, (N_ROWS, FC_OUT), 1)
    G = jnp.where(jnp.logical_and(rj >= ro * C_OUT, rj < (ro + 1) * C_OUT), 1.0, 0.0)
    out = jax.lax.dot_general(acc, G, (((1,), (0,)), ((), ())),
                              preferred_element_type=jnp.float32)
    o_ref[...] = out + bfc_ref[...]


def fakenet2d_forward(x, w_conv, b_conv, w_fc, b_fc):
    """Forward pass of _FakeNet2D.

    x:      (B, 1, 64, 64) f32, NCHW (same as the PyTorch module)
    w_conv: (10, 1, 3, 3)   conv weight (LayerChoice candidate 0)
    b_conv: (10,)
    w_fc:   (3, 40960)      torch nn.Linear (out, in) layout -- already lane-dense
    b_fc:   (3,)
    """
    B = x.shape[0]
    x_flat = x.reshape(B, FLAT)                    # free contiguous view (no pad, no copy)
    wf = w_fc.reshape(N_ROWS, FLAT)                # free view: row j = 10*o + c

    # (10, 30) tap table: rows 0..8 = conv taps, row 9 = conv bias; tiled over 3 outputs.
    taps = jnp.concatenate(
        [w_conv.reshape(C_OUT, KSIZE * KSIZE).T, b_conv[None, :]], axis=0)  # (10, 10)
    wtap = jnp.tile(taps, (1, FC_OUT))             # (10, 30): column j -> channel j % 10
    bfc = b_fc.reshape(1, FC_OUT)

    return pl.pallas_call(
        _fused_kernel,
        out_shape=jax.ShapeDtypeStruct((B, FC_OUT), jnp.float32),
        grid=(1,),
        in_specs=[
            pl.BlockSpec((B, FLAT), lambda i: (0, 0)),
            pl.BlockSpec((N_ROWS, FLAT), lambda i: (0, 0)),
            pl.BlockSpec((N_TAPS, N_ROWS), lambda i: (0, 0)),
            pl.BlockSpec((1, FC_OUT), lambda i: (0, 0)),
        ],
        out_specs=pl.BlockSpec((B, FC_OUT), lambda i: (0, 0)),
        compiler_params=pltpu.CompilerParams(dimension_semantics=("arbitrary",)),
    )(x_flat, wf, wtap, bfc)


def reference_forward(x, w_conv, b_conv, w_fc, b_fc):
    conv = jax.lax.conv_general_dilated(
        x, w_conv, window_strides=(1, 1), padding="SAME",
        dimension_numbers=("NCHW", "OIHW", "NCHW"))
    conv = conv + b_conv.reshape(1, C_OUT, 1, 1)
    flat = conv.reshape(x.shape[0], -1)
    return jnp.dot(flat, w_fc.T, precision=jax.lax.Precision.HIGHEST) + b_fc


if __name__ == "__main__":
    key = jax.random.PRNGKey(0)
    kx, kw, kb, kfw, kfb = jax.random.split(key, 5)

    B = 2
    # deterministic synthetic parameters (shapes from the module's __init__)
    x = jax.random.normal(kx, (B, 1, SIZE, SIZE), jnp.float32)
    w_conv = jax.random.normal(kw, (C_OUT, 1, KSIZE, KSIZE), jnp.float32) * 0.1
    b_conv = jax.random.normal(kb, (C_OUT,), jnp.float32) * 0.1
    w_fc = jax.random.normal(kfw, (FC_OUT, FC_IN), jnp.float32) * (FC_IN ** -0.5)
    b_fc = jax.random.normal(kfb, (FC_OUT,), jnp.float32) * 0.1

    out = jax.jit(fakenet2d_forward)(x, w_conv, b_conv, w_fc, b_fc)
    out = jax.block_until_ready(out)

    ref = reference_forward(x, w_conv, b_conv, w_fc, b_fc)
    assert out.shape == (B, FC_OUT), out.shape
    # The kernel now contracts on the MXU at default precision, while the reference
    # dot uses Precision.HIGHEST over a 40960-long contraction -> slightly looser
    # tolerance than pure-f32 VPU math (expected error ~1e-3, any real bug is >>1e-2).
    assert jnp.allclose(out, ref, atol=5e-3, rtol=5e-3), (out, ref)
    print("KERNEL_OK")
</pallas_src>

<mosaic_0001>
module attributes {stable_mosaic.version = 11 : i64} {
  func.func @_fused_kernel(%arg0: i32, %arg1: memref<2x4096xf32, #tpu.memory_space<vmem>>, %arg2: memref<30x4096xf32, #tpu.memory_space<vmem>>, %arg3: memref<10x30xf32, #tpu.memory_space<vmem>>, %arg4: memref<1x3xf32, #tpu.memory_space<vmem>>, %arg5: memref<2x3xf32, #tpu.memory_space<vmem>>) attributes {dimension_semantics = [#tpu.dimension_semantics<arbitrary>], iteration_bounds = array<i64: 1>, scalar_prefetch = 0 : i64, scratch_operands = 0 : i64, tpu.core_type = #tpu.core_type<tc>, window_params = [{pipeline_mode = #tpu.pipeline_mode<synchronous>, transform_indices = @transform_0, window_bounds = array<i64: 2, 4096>}, {pipeline_mode = #tpu.pipeline_mode<synchronous>, transform_indices = @transform_1, window_bounds = array<i64: 30, 4096>}, {pipeline_mode = #tpu.pipeline_mode<synchronous>, transform_indices = @transform_2, window_bounds = array<i64: 10, 30>}, {pipeline_mode = #tpu.pipeline_mode<synchronous>, transform_indices = @transform_3, window_bounds = array<i64: 1, 3>}, {pipeline_mode = #tpu.pipeline_mode<synchronous>, transform_indices = @transform_4, window_bounds = array<i64: 2, 3>}]} {
    %c0 = arith.constant 0 : index
    %c0_0 = arith.constant 0 : index
    %0 = vector.load %arg1[%c0, %c0_0] : memref<2x4096xf32, #tpu.memory_space<vmem>>, vector<2x4096xf32>
    %c0_1 = arith.constant 0 : index
    %c0_2 = arith.constant 0 : index
    %1 = vector.load %arg2[%c0_1, %c0_2] : memref<30x4096xf32, #tpu.memory_space<vmem>>, vector<30x4096xf32>
    %c0_3 = arith.constant 0 : index
    %c0_4 = arith.constant 0 : index
    %2 = vector.load %arg3[%c0_3, %c0_4] : memref<10x30xf32, #tpu.memory_space<vmem>>, vector<10x30xf32>
    %3 = tpu.iota {dimensions = array<i32: 1>} : vector<2x4096xi32>
    %c63_i32 = arith.constant 63 : i32
    %4 = vector.broadcast %c63_i32 : i32 to vector<2x4096xi32>
    %5 = arith.andi %3, %4 : vector<2x4096xi32>
    %c64_i32 = arith.constant 64 : i32
    %6 = vector.broadcast %c64_i32 : i32 to vector<2x4096xi32>
    %7 = arith.cmpi sge, %3, %6 : vector<2x4096xi32>
    %c4032_i32 = arith.constant 4032 : i32
    %8 = vector.broadcast %c4032_i32 : i32 to vector<2x4096xi32>
    %9 = arith.cmpi slt, %3, %8 : vector<2x4096xi32>
    %c1_i32 = arith.constant 1 : i32
    %10 = vector.broadcast %c1_i32 : i32 to vector<2x4096xi32>
    %11 = arith.cmpi sge, %5, %10 : vector<2x4096xi32>
    %c62_i32 = arith.constant 62 : i32
    %12 = vector.broadcast %c62_i32 : i32 to vector<2x4096xi32>
    %13 = arith.cmpi sle, %5, %12 : vector<2x4096xi32>
    %cst = arith.constant 0.000000e+00 : f32
    %14 = vector.broadcast %cst : f32 to vector<2x30xf32>
    %c65_i32 = arith.constant 65 : i32
    %15 = tpu.dynamic_rotate %0 by %c65_i32 dim 1 : vector<2x4096xf32>, i32 -> vector<2x4096xf32>
    %16 = arith.andi %7, %11 : vector<2x4096xi1>
    %cst_5 = arith.constant 0.000000e+00 : f32
    %17 = vector.broadcast %cst_5 : f32 to vector<2x4096xf32>
    %18 = arith.select %16, %15, %17 : vector<2x4096xi1>, vector<2x4096xf32>
    %19 = vector.extract_strided_slice %2 {offsets = [0, 0], sizes = [1, 30], strides = [1, 1]} : vector<10x30xf32> to vector<1x30xf32>
    %cst_6 = arith.constant dense<0.000000e+00> : vector<2x30xf32>
    %20 = tpu.matmul %18, %1, %cst_6 {dimension_numbers = #tpu.dot_dimension_numbers<[1], [1], [0], [0], [0, 0, 1, 0], [], []>} : vector<2x4096xf32>, vector<30x4096xf32>, vector<2x30xf32> -> vector<2x30xf32>
    %21 = vector.broadcast %19 : vector<1x30xf32> to vector<2x30xf32>
    %22 = arith.mulf %21, %20 : vector<2x30xf32>
    %23 = arith.addf %14, %22 : vector<2x30xf32>
    %c64_i32_7 = arith.constant 64 : i32
    %24 = tpu.dynamic_rotate %0 by %c64_i32_7 dim 1 : vector<2x4096xf32>, i32 -> vector<2x4096xf32>
    %cst_8 = arith.constant 0.000000e+00 : f32
    %25 = vector.broadcast %cst_8 : f32 to vector<2x4096xf32>
    %26 = arith.select %7, %24, %25 : vector<2x4096xi1>, vector<2x4096xf32>
    %27 = vector.extract_strided_slice %2 {offsets = [1, 0], sizes = [1, 30], strides = [1, 1]} : vector<10x30xf32> to vector<1x30xf32>
    %cst_9 = arith.constant dense<0.000000e+00> : vector<2x30xf32>
    %28 = tpu.matmul %26, %1, %cst_9 {dimension_numbers = #tpu.dot_dimension_numbers<[1], [1], [0], [0], [0, 0, 1, 0], [], []>} : vector<2x4096xf32>, vector<30x4096xf32>, vector<2x30xf32> -> vector<2x30xf32>
    %29 = vector.broadcast %27 : vector<1x30xf32> to vector<2x30xf32>
    %30 = arith.mulf %29, %28 : vector<2x30xf32>
    %31 = arith.addf %23, %30 : vector<2x30xf32>
    %c63_i32_10 = arith.constant 63 : i32
    %32 = tpu.dynamic_rotate %0 by %c63_i32_10 dim 1 : vector<2x4096xf32>, i32 -> vector<2x4096xf32>
    %33 = arith.andi %7, %13 : vector<2x4096xi1>
    %cst_11 = arith.constant 0.000000e+00 : f32
    %34 = vector.broadcast %cst_11 : f32 to vector<2x4096xf32>
    %35 = arith.select %33, %32, %34 : vector<2x4096xi1>, vector<2x4096xf32>
    %36 = vector.extract_strided_slice %2 {offsets = [2, 0], sizes = [1, 30], strides = [1, 1]} : vector<10x30xf32> to vector<1x30xf32>
    %cst_12 = arith.constant dense<0.000000e+00> : vector<2x30xf32>
    %37 = tpu.matmul %35, %1, %cst_12 {dimension_numbers = #tpu.dot_dimension_numbers<[1], [1], [0], [0], [0, 0, 1, 0], [], []>} : vector<2x4096xf32>, vector<30x4096xf32>, vector<2x30xf32> -> vector<2x30xf32>
    %38 = vector.broadcast %36 : vector<1x30xf32> to vector<2x30xf32>
    %39 = arith.mulf %38, %37 : vector<2x30xf32>
    %40 = arith.addf %31, %39 : vector<2x30xf32>
    %c1_i32_13 = arith.constant 1 : i32
    %41 = tpu.dynamic_rotate %0 by %c1_i32_13 dim 1 : vector<2x4096xf32>, i32 -> vector<2x4096xf32>
    %cst_14 = arith.constant 0.000000e+00 : f32
    %42 = vector.broadcast %cst_14 : f32 to vector<2x4096xf32>
    %43 = arith.select %11, %41, %42 : vector<2x4096xi1>, vector<2x4096xf32>
    %44 = vector.extract_strided_slice %2 {offsets = [3, 0], sizes = [1, 30], strides = [1, 1]} : vector<10x30xf32> to vector<1x30xf32>
    %cst_15 = arith.constant dense<0.000000e+00> : vector<2x30xf32>
    %45 = tpu.matmul %43, %1, %cst_15 {dimension_numbers = #tpu.dot_dimension_numbers<[1], [1], [0], [0], [0, 0, 1, 0], [], []>} : vector<2x4096xf32>, vector<30x4096xf32>, vector<2x30xf32> -> vector<2x30xf32>
    %46 = vector.broadcast %44 : vector<1x30xf32> to vector<2x30xf32>
    %47 = arith.mulf %46, %45 : vector<2x30xf32>
    %48 = arith.addf %40, %47 : vector<2x30xf32>
    %49 = vector.extract_strided_slice %2 {offsets = [4, 0], sizes = [1, 30], strides = [1, 1]} : vector<10x30xf32> to vector<1x30xf32>
    %cst_16 = arith.constant dense<0.000000e+00> : vector<2x30xf32>
    %50 = tpu.matmul %0, %1, %cst_16 {dimension_numbers = #tpu.dot_dimension_numbers<[1], [1], [0], [0], [0, 0, 1, 0], [], []>} : vector<2x4096xf32>, vector<30x4096xf32>, vector<2x30xf32> -> vector<2x30xf32>
    %51 = vector.broadcast %49 : vector<1x30xf32> to vector<2x30xf32>
    %52 = arith.mulf %51, %50 : vector<2x30xf32>
    %53 = arith.addf %48, %52 : vector<2x30xf32>
    %c4095_i32 = arith.constant 4095 : i32
    %54 = tpu.dynamic_rotate %0 by %c4095_i32 dim 1 : vector<2x4096xf32>, i32 -> vector<2x4096xf32>
    %cst_17 = arith.constant 0.000000e+00 : f32
    %55 = vector.broadcast %cst_17 : f32 to vector<2x4096xf32>
    %56 = arith.select %13, %54, %55 : vector<2x4096xi1>, vector<2x4096xf32>
    %57 = vector.extract_strided_slice %2 {offsets = [5, 0], sizes = [1, 30], strides = [1, 1]} : vector<10x30xf32> to vector<1x30xf32>
    %cst_18 = arith.constant dense<0.000000e+00> : vector<2x30xf32>
    %58 = tpu.matmul %56, %1, %cst_18 {dimension_numbers = #tpu.dot_dimension_numbers<[1], [1], [0], [0], [0, 0, 1, 0], [], []>} : vector<2x4096xf32>, vector<30x4096xf32>, vector<2x30xf32> -> vector<2x30xf32>
    %59 = vector.broadcast %57 : vector<1x30xf32> to vector<2x30xf32>
    %60 = arith.mulf %59, %58 : vector<2x30xf32>
    %61 = arith.addf %53, %60 : vector<2x30xf32>
    %c4033_i32 = arith.constant 4033 : i32
    %62 = tpu.dynamic_rotate %0 by %c4033_i32 dim 1 : vector<2x4096xf32>, i32 -> vector<2x4096xf32>
    %63 = arith.andi %9, %11 : vector<2x4096xi1>
    %cst_19 = arith.constant 0.000000e+00 : f32
    %64 = vector.broadcast %cst_19 : f32 to vector<2x4096xf32>
    %65 = arith.select %63, %62, %64 : vector<2x4096xi1>, vector<2x4096xf32>
    %66 = vector.extract_strided_slice %2 {offsets = [6, 0], sizes = [1, 30], strides = [1, 1]} : vector<10x30xf32> to vector<1x30xf32>
    %cst_20 = arith.constant dense<0.000000e+00> : vector<2x30xf32>
    %67 = tpu.matmul %65, %1, %cst_20 {dimension_numbers = #tpu.dot_dimension_numbers<[1], [1], [0], [0], [0, 0, 1, 0], [], []>} : vector<2x4096xf32>, vector<30x4096xf32>, vector<2x30xf32> -> vector<2x30xf32>
    %68 = vector.broadcast %66 : vector<1x30xf32> to vector<2x30xf32>
    %69 = arith.mulf %68, %67 : vector<2x30xf32>
    %70 = arith.addf %61, %69 : vector<2x30xf32>
    %c4032_i32_21 = arith.constant 4032 : i32
    %71 = tpu.dynamic_rotate %0 by %c4032_i32_21 dim 1 : vector<2x4096xf32>, i32 -> vector<2x4096xf32>
    %cst_22 = arith.constant 0.000000e+00 : f32
    %72 = vector.broadcast %cst_22 : f32 to vector<2x4096xf32>
    %73 = arith.select %9, %71, %72 : vector<2x4096xi1>, vector<2x4096xf32>
    %74 = vector.extract_strided_slice %2 {offsets = [7, 0], sizes = [1, 30], strides = [1, 1]} : vector<10x30xf32> to vector<1x30xf32>
    %cst_23 = arith.constant dense<0.000000e+00> : vector<2x30xf32>
    %75 = tpu.matmul %73, %1, %cst_23 {dimension_numbers = #tpu.dot_dimension_numbers<[1], [1], [0], [0], [0, 0, 1, 0], [], []>} : vector<2x4096xf32>, vector<30x4096xf32>, vector<2x30xf32> -> vector<2x30xf32>
    %76 = vector.broadcast %74 : vector<1x30xf32> to vector<2x30xf32>
    %77 = arith.mulf %76, %75 : vector<2x30xf32>
    %78 = arith.addf %70, %77 : vector<2x30xf32>
    %c4031_i32 = arith.constant 4031 : i32
    %79 = tpu.dynamic_rotate %0 by %c4031_i32 dim 1 : vector<2x4096xf32>, i32 -> vector<2x4096xf32>
    %80 = arith.andi %9, %13 : vector<2x4096xi1>
    %cst_24 = arith.constant 0.000000e+00 : f32
    %81 = vector.broadcast %cst_24 : f32 to vector<2x4096xf32>
    %82 = arith.select %80, %79, %81 : vector<2x4096xi1>, vector<2x4096xf32>
    %83 = vector.extract_strided_slice %2 {offsets = [8, 0], sizes = [1, 30], strides = [1, 1]} : vector<10x30xf32> to vector<1x30xf32>
    %cst_25 = arith.constant dense<0.000000e+00> : vector<2x30xf32>
    %84 = tpu.matmul %82, %1, %cst_25 {dimension_numbers = #tpu.dot_dimension_numbers<[1], [1], [0], [0], [0, 0, 1, 0], [], []>} : vector<2x4096xf32>, vector<30x4096xf32>, vector<2x30xf32> -> vector<2x30xf32>
    %85 = vector.broadcast %83 : vector<1x30xf32> to vector<2x30xf32>
    %86 = arith.mulf %85, %84 : vector<2x30xf32>
    %87 = arith.addf %78, %86 : vector<2x30xf32>
    %cst_26 = arith.constant 1.000000e+00 : f32
    %88 = vector.broadcast %cst_26 : f32 to vector<2x4096xf32>
    %89 = vector.extract_strided_slice %2 {offsets = [9, 0], sizes = [1, 30], strides = [1, 1]} : vector<10x30xf32> to vector<1x30xf32>
    %cst_27 = arith.constant dense<0.000000e+00> : vector<2x30xf32>
    %90 = tpu.matmul %88, %1, %cst_27 {dimension_numbers = #tpu.dot_dimension_numbers<[1], [1], [0], [0], [0, 0, 1, 0], [], []>} : vector<2x4096xf32>, vector<30x4096xf32>, vector<2x30xf32> -> vector<2x30xf32>
    %91 = vector.broadcast %89 : vector<1x30xf32> to vector<2x30xf32>
    %92 = arith.mulf %91, %90 : vector<2x30xf32>
    %93 = arith.addf %87, %92 : vector<2x30xf32>
    %94 = tpu.iota {dimensions = array<i32: 0>} : vector<30x3xi32>
    %95 = tpu.iota {dimensions = array<i32: 1>} : vector<30x3xi32>
    %c10_i32 = arith.constant 10 : i32
    %96 = vector.broadcast %c10_i32 : i32 to vector<30x3xi32>
    %97 = arith.muli %95, %96 : vector<30x3xi32>
    %98 = arith.cmpi sge, %94, %97 : vector<30x3xi32>
    %c1_i32_28 = arith.constant 1 : i32
    %99 = vector.broadcast %c1_i32_28 : i32 to vector<30x3xi32>
    %100 = arith.addi %95, %99 : vector<30x3xi32>
    %c10_i32_29 = arith.constant 10 : i32
    %101 = vector.broadcast %c10_i32_29 : i32 to vector<30x3xi32>
    %102 = arith.muli %100, %101 : vector<30x3xi32>
    %103 = arith.cmpi slt, %94, %102 : vector<30x3xi32>
    %104 = arith.andi %98, %103 : vector<30x3xi1>
    %cst_30 = arith.constant 1.000000e+00 : f32
    %cst_31 = arith.constant 0.000000e+00 : f32
    %105 = vector.broadcast %cst_30 : f32 to vector<30x3xf32>
    %106 = vector.broadcast %cst_31 : f32 to vector<30x3xf32>
    %107 = arith.select %104, %105, %106 : vector<30x3xi1>, vector<30x3xf32>
    %cst_32 = arith.constant dense<0.000000e+00> : vector<2x3xf32>
    %108 = tpu.matmul %93, %107, %cst_32 {dimension_numbers = #tpu.dot_dimension_numbers<[1], [0], [0], [1], [0, 0, 1, 1], [], []>} : vector<2x30xf32>, vector<30x3xf32>, vector<2x3xf32> -> vector<2x3xf32>
    %c0_33 = arith.constant 0 : index
    %c0_34 = arith.constant 0 : index
    %109 = vector.load %arg4[%c0_33, %c0_34] : memref<1x3xf32, #tpu.memory_space<vmem>>, vector<1x3xf32>
    %110 = vector.broadcast %109 : vector<1x3xf32> to vector<2x3xf32>
    %111 = arith.addf %108, %110 : vector<2x3xf32>
    %c0_35 = arith.constant 0 : index
    %c0_36 = arith.constant 0 : index
    %112 = vector.load %arg5[%c0_35, %c0_36] : memref<2x3xf32, #tpu.memory_space<vmem>>, vector<2x3xf32>
    tpu.vector_store %arg5[%c0_35, %c0_36], %111 {strides = array<i32>} : memref<2x3xf32, #tpu.memory_space<vmem>>, vector<2x3xf32>,
    return
  }
  func.func @transform_0(%arg0: i32) -> (i32, i32) {
    %c0_i32 = arith.constant 0 : i32
    %c0_i32_0 = arith.constant 0 : i32
    %c0_i32_1 = arith.constant 0 : i32
    return %c0_i32, %c0_i32_0 : i32, i32
  }
  func.func @transform_1(%arg0: i32) -> (i32, i32) {
    %c0_i32 = arith.constant 0 : i32
    %c0_i32_0 = arith.constant 0 : i32
    %c0_i32_1 = arith.constant 0 : i32
    return %c0_i32, %c0_i32_0 : i32, i32
  }
  func.func @transform_2(%arg0: i32) -> (i32, i32) {
    %c0_i32 = arith.constant 0 : i32
    %c0_i32_0 = arith.constant 0 : i32
    %c0_i32_1 = arith.constant 0 : i32
    return %c0_i32, %c0_i32_0 : i32, i32
  }
  func.func @transform_3(%arg0: i32) -> (i32, i32) {
    %c0_i32 = arith.constant 0 : i32
    %c0_i32_0 = arith.constant 0 : i32
    %c0_i32_1 = arith.constant 0 : i32
    return %c0_i32, %c0_i32_0 : i32, i32
  }
  func.func @transform_4(%arg0: i32) -> (i32, i32) {
    %c0_i32 = arith.constant 0 : i32
    %c0_i32_0 = arith.constant 0 : i32
    %c0_i32_1 = arith.constant 0 : i32
    return %c0_i32, %c0_i32_0 : i32, i32
  }
}

</mosaic_0001>

<bundles_post_ra>
// kernel: tile.9
= control target key start
LH: loop header
LB: loop body
LE: loop exit
PB: predicated region body
PF: predicated region fallthrough
CT: control target
= control target key end

     0   :  { %vm52_vm0 = vcmask 1047556   ;;  %s91_s26 = smov 3  ;;  %vm54_vm1 = vcmask 80896   ;;  %s57_s27 = smov 3  ;;  %vm70_vm2 = vcmask 244896   ;;  %vm88_vm3 = vcmask 162896   ;;  %s182_s0 = inlined_call_operand.vmem [shape: f32[10,3,10], index: 0, kind: input, shape index: {}]   ;;  %s183_s1 = inlined_call_operand.vmem [shape: f32[10,30], index: 1, kind: output, shape index: {}]  }
   0x1   :  { %v108_v0 = vld [vmem:[%s182_s0 + $0x1c] sm:$0xf]  ;;  %v109_v1 = vld [vmem:[%s182_s0 + $0x18] sm:$0xf]  ;;  %v110_v2 = vld [vmem:[%s182_s0 + $0x14] sm:$0xf] }
   0x2   :  { %18 = vst [vmem:[#allocation0 + $0x38] sm:$0xf] %v108_v0  ;;  %23 = vst [vmem:[#allocation0 + $0x30] sm:$0xf] %v109_v1  ;;  %v111_v3 = vld [vmem:[%s182_s0 + $0x10] sm:$0xf] }
   0x3   :  { %28 = vst [vmem:[#allocation0 + $0x28] sm:$0xf] %v110_v2  ;;  %v112_v4 = vld [vmem:[%s182_s0 + $0xc] sm:$0xf]  ;;  %v113_v5 = vld [vmem:[%s182_s0 + $0x8] sm:$0xf] }
   0x4   :  { %33 = vst [vmem:[#allocation0 + $0x20] sm:$0xf] %v111_v3  ;;  %38 = vst [vmem:[#allocation0 + $0x18] sm:$0xf] %v112_v4  ;;  %v114_v6 = vld [vmem:[%s182_s0 + $0x4] sm:$0xf] }
   0x5   :  { %43 = vst [vmem:[#allocation0 + $0x10] sm:$0xf] %v113_v5  ;;  %v48_v7 = vld [vmem:[%s182_s0] sm:$0xf]  ;;  %47 = vst [vmem:[#allocation0 + $0x8] sm:$0xf] %v114_v6 }
   0x6   :  { %49 = vst [vmem:[#allocation0] sm:$0xf] %v48_v7  ;;  %v106_v8 = vld [vmem:[%s182_s0 + $0x24] sm:$0xf]  ;;  %v107_v9 = vld [vmem:[%s182_s0 + $0x20] sm:$0xf] }
   0x7   :  { %8 = vst [vmem:[#allocation0 + $0x48] sm:$0xf] %v106_v8  ;;  %13 = vst [vmem:[#allocation0 + $0x40] sm:$0xf] %v107_v9  ;;  %s73_s0 = smov 3  ;;  %s120_s28 = smov 20  }
   0x8   :  { %s121_s29 = smov 10  }
   0xb   :  { %v65_v10 = vld [vmem:[#allocation0 + $0x2] ss:$8 sm:$0xf0]   ;;  %v83_v11 = vld [vmem:[#allocation0 + $0x1] ss:$8 sm:$0xf0]  }
   0xc   :  { %v51_v16 = vld [vmem:[#allocation0] ss:$8 sm:$0xf0]  }
   0xd   :  { %v63_v12 = vld [vmem:[#allocation0 + $0x2] ss:$8 sm:$0xf]   ;;  %v50_v13 = vld [vmem:[#allocation0] ss:$8 sm:$0xf]  }
   0xe   :  { %v67_v14 = vsel %vm52_vm0, %v65_v10, %v63_v12  ;;  %v81_v15 = vld [vmem:[#allocation0 + $0x1] ss:$8 sm:$0xf]   ;;  %v53_v18 = vsel %vm52_vm0, %v51_v16, %v50_v13  ;;  %v58_v19 = vld [vmem:[#allocation0 + $0x40] ss:$8 sm:%s57_s27]  }
   0xf   :  { %68 = vrot.lane.b32.xlu0 %v67_v14, %s120_s28  ;;  %v85_v17 = vsel %vm52_vm0, %v83_v11, %v81_v15  ;;  %v74_v20 = vld [vmem:[#allocation0 + $0x42] ss:$8 sm:%s73_s0]   ;;  %55 = vst.msk [vmem:[%s183_s1] sm:$0xff] %vm54_vm1, %v53_v18   ;;  %115 = vst.msk [vmem:[%s183_s1 + $0x8] sm:$0x3] %vm54_vm1, %v58_v19  }
  0x10   :  { %86 = vrot.lane.b32.xlu1 %v85_v17, %s121_s29  ;;  %v92_v21 = vld [vmem:[#allocation0 + $0x41] ss:$8 sm:%s91_s26]  }
  0x13   :  { %75 = vrot.lane.b32.xlu0 %v74_v20, %s120_s28 }
  0x14   :  { %93 = vrot.lane.b32.xlu1 %v92_v21, %s121_s29 }
  0x81   :  { %v69_v22 = vpop.permute.xlu0 %68  }
  0x82   :  { %71 = vst.msk [vmem:[%s183_s1] sm:$0xff] %vm70_vm2, %v69_v22   ;;  %v87_v23 = vpop.permute.xlu1 %86  }
  0x83   :  { %89 = vst.msk [vmem:[%s183_s1] sm:$0xff] %vm88_vm3, %v87_v23  }
  0x85   :  { %v76_v24 = vpop.permute.xlu0 %75  }
  0x86   :  { %116 = vst.msk [vmem:[%s183_s1 + $0x8] sm:$0x3] %vm70_vm2, %v76_v24   ;;  %v94_v25 = vpop.permute.xlu1 %93  }
  0x87   :  { %117 = vst.msk [vmem:[%s183_s1 + $0x8] sm:$0x3] %vm88_vm3, %v94_v25  }

// kernel: fakenet2d_forward.1
= control target key start
LH: loop header
LB: loop body
LE: loop exit
PB: predicated region body
PF: predicated region fallthrough
CT: control target
= control target key end

     0   :  { %v156_v0 = vlaneseq  ;;  %v14697_v2 = vmov 1983009808   ;;  %s18321_s0 = inlined_call_operand.vmem [shape: f32[2,4096], index: 0, kind: input, shape index: {}]   ;;  %s18322_s1 = inlined_call_operand.vmem [shape: f32[30,4096], index: 1, kind: input, shape index: {}]   ;;  %s18323_s2 = inlined_call_operand.vmem [shape: f32[10,30], index: 2, kind: input, shape index: {}]   ;;  %s18324_s3 = inlined_call_operand.vmem [shape: f32[1,3], index: 3, kind: input, shape index: {}]   ;;  %s18325_s4 = inlined_call_operand.hbm [shape: f32[2,3], index: 4, kind: output, shape index: {}]  }
   0x1   :  { %v25_v1 = vld [vmem:[%s18321_s0 + $0x38] sm:$0xff]  ;;  %v359_v3 = vunpack.c.l.s4 %v14697_v2  ;;  %v18_v4 = vld [vmem:[%s18321_s0] sm:$0xff]  ;;  %v27_v8 = vld [vmem:[%s18322_s1 + $0x8] sm:$0xff] }
   0x2   :  { %v14741_v5 = vshrl.u32 %v156_v0, 7  ;;  %v476_v7 = vcombine.high %v25_v1, %v25_v1  ;;  %v59_v9 = vld [vmem:[%s18322_s1 + $0x108] sm:$0xff]  ;;  %v26_v10 = vld [vmem:[%s18322_s1] sm:$0xff] }
   0x3   :  { %v360_v6 = vunpack.c.0.s8 %v359_v3  ;;  %v14752_v11 = vpack.c.bf16 %v59_v9, %v27_v8  ;;  %v58_v12 = vld [vmem:[%s18322_s1 + $0x100] sm:$0xff]  ;;  %v91_v13 = vld [vmem:[%s18322_s1 + $0x208] sm:$0xff] }
   0x4   :  { %18903 = vst [vmem:[#allocation5_spill] sm:$0xff] %v14741_v5  ;;  %v123_v14 = vld [vmem:[%s18322_s1 + $0x308] sm:$0x3f]  ;;  %v14766_v16 = vpack.c.bf16 %v58_v12, %v26_v10 }
   0x5   :  { %v14764_v15 = vsub.s32 %v360_v6, %v14741_v5  ;;  %12996 = vmatprep.subr.bf16.mxu0 %v14752_v11  ;;  %13124 = vmatprep.subr.bf16.mxu1 %v14752_v11  ;;  %v14770_v17 = vpack.c.bf16 %v123_v14, %v91_v13 }
   0x6   :  { %12998 = vmatpush1.bf16.xpose.msra.mxu0 %v14766_v16 }
   0x7   :  { %v14773_v18 = vrot.slane %v18_v4, %v14764_v15  ;;  %v14776_v19 = vrot.slane %v476_v7, %v14764_v15 }
   0x9   :  { %18904 = vst [vmem:[#allocation6_spill] sm:$0xff] %v14773_v18  ;;  %18905 = vst [vmem:[#allocation7_spill] sm:$0xff] %v14776_v19 }
   0xa   :  { %9 = vsyncpa [#allocation3], 0  ;;  %13126 = vmatpush1.bf16.xpose.msra.mxu1 %v14766_v16  ;;  %v90_v20 = vld [vmem:[%s18322_s1 + $0x200] sm:$0xff]  ;;  %s14698_s9 = smov 64   ;;  %s14699_s10 = smov 65   ;;  %v14792_v22 = vcombine.high %v14776_v19, %v14776_v19  ;;  %v14796_v23 = vcombine.high %v14773_v18, %v14773_v18  ;;  %v357_v24 = vcombine.high %v18_v4, %v18_v4  ;;  %13000 = vmatprep.subr.bf16.mxu0 %v14770_v17  ;;  %v19_v27 = vld [vmem:[%s18321_s0 + $0x8] sm:$0xff] }
   0xb   :  { %v122_v21 = vld [vmem:[%s18322_s1 + $0x300] sm:$0x3f]  ;;  %1812 = vrot.lane.b32.xlu1 %v14773_v18, %s14698_s9  ;;  %525 = vrot.lane.b32.xlu0 %v14773_v18, %s14699_s10  ;;  %v29_v28 = vld [vmem:[%s18322_s1 + $0x18] sm:$0xff]  ;;  %v14819_v30 = vrot.slane %v25_v1, %v14764_v15  ;;  %v14832_v32 = vrot.slane %v19_v27, %v14764_v15  ;;  %v374_v36 = vcombine.high %v19_v27, %v19_v27  ;;  %s14701_s27 = smov 1  }
   0xc   :  { %18906 = vst [vmem:[#allocation8_spill] sm:$0xff] %v14792_v22  ;;  %18907 = vst [vmem:[#allocation9_spill] sm:$0xff] %v14796_v23  ;;  %v14799_v25 = vpack.c.bf16 %v122_v21, %v90_v20  ;;  %13128 = vmatprep.subr.bf16.mxu1 %v14770_v17  ;;  %v14807_v26 = vrot.slane %v357_v24, %v14764_v15  ;;  %v61_v29 = vld [vmem:[%s18322_s1 + $0x118] sm:$0xff]  ;;  %v20_v39 = vld [vmem:[%s18321_s0 + $0x10] sm:$0xff] }
   0xd   :  { %18909 = vst [vmem:[#allocation11_spill] sm:$0xff] %v14819_v30  ;;  %18911 = vst [vmem:[#allocation13_spill] sm:$0xff] %v14832_v32  ;;  %v14834_v33 = vpack.c.bf16 %v61_v29, %v29_v28  ;;  %v14846_v35 = vcombine.high %v14832_v32, %v14832_v32  ;;  %v14854_v38 = vrot.slane %v374_v36, %v14764_v15  ;;  %v21_v47 = vld [vmem:[%s18321_s0 + $0x18] sm:$0xff]  ;;  %v22_v55 = vld [vmem:[%s18321_s0 + $0x20] sm:$0xff] }
   0xe   :  { %18908 = vst [vmem:[#allocation10_spill] sm:$0xff] %v14807_v26  ;;  %13002 = vmatpush1.bf16.xpose.msra.mxu0 %v14799_v25  ;;  %v14829_v31 = vcombine.high %v14807_v26, %v14807_v26  ;;  %v14867_v41 = vrot.slane %v20_v39, %v14764_v15  ;;  %v391_v44 = vcombine.high %v20_v39, %v20_v39  ;;  %v23_v63 = vld [vmem:[%s18321_s0 + $0x28] sm:$0xff]  ;;  %v24_v9 = vld [vmem:[%s18321_s0 + $0x30] sm:$0xff]  ;;  %s14700_s0 = smov 63  }
   0xf   :  { %587 = vrot.lane.b32.xlu1 %v14792_v22, %s14699_s10  ;;  %527 = vrot.lane.b32.xlu0 %v14796_v23, %s14699_s10  ;;  %18912 = vst [vmem:[#allocation14_spill] sm:$0xff] %v14834_v33  ;;  %v14599_v37 = vpack.i.bf16 %v14846_v35, %v14832_v32  ;;  %18913 = vst [vmem:[#allocation15_spill] sm:$0xff] %v14854_v38  ;;  %v14864_v40 = vcombine.high %v14854_v38, %v14854_v38 }
  0x10   :  { %18910 = vst [vmem:[#allocation12_spill] sm:$0xff] %v14829_v31  ;;  %13004 = vmatprep.subr.bf16.mxu0 %v14834_v33  ;;  %v14594_v34 = vpack.i.bf16 %v14829_v31, %v14807_v26  ;;  %18915 = vst [vmem:[#allocation17_spill] sm:$0xff] %v14867_v41  ;;  %v14877_v43 = vcombine.high %v14867_v41, %v14867_v41  ;;  %v14885_v46 = vrot.slane %v391_v44, %v14764_v15  ;;  %v18937_v44 = vmov 0 }
  0x11   :  { %18914 = vst [vmem:[#allocation16_spill] sm:$0xff] %v14864_v40  ;;  %v14604_v42 = vpack.i.bf16 %v14864_v40, %v14854_v38  ;;  %v14898_v49 = vrot.slane %v21_v47, %v14764_v15  ;;  %v408_v52 = vcombine.high %v21_v47, %v21_v47  ;;  %v14929_v57 = vrot.slane %v22_v55, %v14764_v15  ;;  %v60_v47 = vld [vmem:[%s18322_s1 + $0x110] sm:$0xff] }
  0x12   :  { %13130 = vmatpush1.bf16.xpose.msra.mxu1 %v14799_v25  ;;  %18916 = vst [vmem:[#allocation18_spill] sm:$0xff] %v14877_v43  ;;  %v14609_v45 = vpack.i.bf16 %v14877_v43, %v14867_v41  ;;  %18917 = vst [vmem:[#allocation19_spill] sm:$0xff] %v14885_v46  ;;  %v14895_v48 = vcombine.high %v14885_v46, %v14885_v46  ;;  %v425_v60 = vcombine.high %v22_v55, %v22_v55 }
  0x13   :  { %1874 = vrot.lane.b32.xlu1 %v14792_v22, %s14698_s9  ;;  %1814 = vrot.lane.b32.xlu0 %v14796_v23, %s14698_s9  ;;  %18919 = vst [vmem:[#allocation21_spill] sm:$0xff] %v14898_v49  ;;  %v14908_v51 = vcombine.high %v14898_v49, %v14898_v49  ;;  %v14916_v54 = vrot.slane %v408_v52, %v14764_v15  ;;  %18923 = vst [vmem:[#allocation25_spill] sm:$0xff] %v14929_v57  ;;  %v125_v52 = vld [vmem:[%s18322_s1 + $0x318] sm:$0x3f] }
  0x14   :  { %13132 = vmatprep.subr.bf16.mxu1 %v14834_v33  ;;  %18918 = vst [vmem:[#allocation20_spill] sm:$0xff] %v14895_v48  ;;  %v14614_v50 = vpack.i.bf16 %v14895_v48, %v14885_v46  ;;  %v14939_v59 = vcombine.high %v14929_v57, %v14929_v57  ;;  %v14947_v62 = vrot.slane %v425_v60, %v14764_v15  ;;  %v18967_v33 = vmov 0 }
  0x15   :  { %18920 = vst [vmem:[#allocation22_spill] sm:$0xff] %v14908_v51  ;;  %v14619_v53 = vpack.i.bf16 %v14908_v51, %v14898_v49  ;;  %18921 = vst [vmem:[#allocation23_spill] sm:$0xff] %v14916_v54  ;;  %v14926_v56 = vcombine.high %v14916_v54, %v14916_v54  ;;  %v14960_v2 = vrot.slane %v23_v63, %v14764_v15 }
  0x16   :  { %18924 = vst [vmem:[#allocation26_spill] sm:$0xff] %v14939_v59  ;;  %v14629_v61 = vpack.i.bf16 %v14939_v59, %v14929_v57  ;;  %18925 = vst [vmem:[#allocation27_spill] sm:$0xff] %v14947_v62  ;;  %v14957_v1 = vcombine.high %v14947_v62, %v14947_v62  ;;  %v442_v6 = vcombine.high %v23_v63, %v23_v63 }
  0x17   :  { %529 = vrot.lane.b32.xlu0 %v14807_v26, %s14699_s10  ;;  %531 = vrot.lane.b32.xlu1 %v14829_v31, %s14699_s10  ;;  %18922 = vst [vmem:[#allocation24_spill] sm:$0xff] %v14926_v56  ;;  %v14624_v58 = vpack.i.bf16 %v14926_v56, %v14916_v54  ;;  %18927 = vst [vmem:[#allocation29_spill] sm:$0xff] %v14960_v2  ;;  %v14970_v4 = vcombine.high %v14960_v2, %v14960_v2 }
  0x18   :  { %18926 = vst [vmem:[#allocation28_spill] sm:$0xff] %v14957_v1  ;;  %v14634_v3 = vpack.i.bf16 %v14957_v1, %v14947_v62  ;;  %v14978_v8 = vrot.slane %v442_v6, %v14764_v15  ;;  %v14991_v12 = vrot.slane %v24_v9, %v14764_v15  ;;  %v459_v20 = vcombine.high %v24_v9, %v24_v9 }
  0x19   :  { %18928 = vst [vmem:[#allocation30_spill] sm:$0xff] %v14970_v4  ;;  %v14639_v7 = vpack.i.bf16 %v14970_v4, %v14960_v2 }
  0x1a   :  { %18929 = vst [vmem:[#allocation31_spill] sm:$0xff] %v14978_v8  ;;  %v14988_v10 = vcombine.high %v14978_v8, %v14978_v8  ;;  %18931 = vst [vmem:[#allocation33_spill] sm:$0xff] %v14991_v12  ;;  %v15001_v14 = vcombine.high %v14991_v12, %v14991_v12  ;;  %v15009_v24 = vrot.slane %v459_v20, %v14764_v15 }
  0x1b   :  { %14595 = vrot.lane.b32.xlu0 %v14594_v34, %s14698_s9  ;;  %533 = vrot.lane.b32.xlu1 %v14832_v32, %s14699_s10  ;;  %v15026_v15 = vcombine.high %v14819_v30, %v14819_v30  ;;  %v15049_v34 = vand.u32 127, %v156_v0 }
  0x1c   :  { %18930 = vst [vmem:[#allocation32_spill] sm:$0xff] %v14988_v10  ;;  %v14644_v13 = vpack.i.bf16 %v14988_v10, %v14978_v8  ;;  %18932 = vst [vmem:[#allocation34_spill] sm:$0xff] %v15001_v14  ;;  %v14649_v21 = vpack.i.bf16 %v15001_v14, %v14991_v12  ;;  %v15016_v27 = vcombine.high %v15009_v24, %v15009_v24 }
  0x1d   :  { %18933 = vst [vmem:[#allocation35_spill] sm:$0xff] %v15009_v24  ;;  %18935 = vst [vmem:[#allocation37_spill] sm:$0xff] %v15026_v15  ;;  %v14659_v29 = vpack.i.bf16 %v15026_v15, %v14819_v30  ;;  %v15056_v36 = vadd.s32 128, %v15049_v34  ;;  %vm18435_vm0 = vcmp.ge.s32.totalorder %v15049_v34, 64  ;;  %vm18447_vm2 = vcmp.lt.s32.totalorder %v15049_v34, 65 }
  0x1e   :  { %18934 = vst [vmem:[#allocation36_spill] sm:$0xff] %v15016_v27  ;;  %v14654_v28 = vpack.i.bf16 %v15016_v27, %v15009_v24  ;;  %18936 = vst [vmem:[#allocation38_spill] sm:$0xff] %v15049_v34  ;;  %v15095_v55 = vadd.s32 384, %v15049_v34  ;;  %vm18444_vm5 = vcmp.lt.s32.totalorder %v15049_v34, 64 }
  0x1f   :  { %535 = vrot.lane.b32.xlu0 %v14846_v35, %s14699_s10  ;;  %14600 = vrot.lane.b32.xlu1 %v14599_v37, %s14698_s9  ;;  %v18326_v37 = vand.u32 63, %v15049_v34  ;;  %v18328_v0 = vand.u32 63, %v15056_v36 }
  0x20   :  { %18943 = vst [vmem:[#allocation41_spill] sm:$0xff] %v15095_v55 }
  0x21   :  { %vm15067_vm1 = vcmp.ge.s32.totalorder %v18326_v37, 1  ;;  %vm15090_vm3 = vcmp.ge.s32.totalorder %v18328_v0, 1  ;;  %v15177_v37 = vadd.s32 256, %v15049_v34 }
  0x22   :  { %v18938_v44 = vsel %vm15067_vm1, 4294967295, %v18937_v44  ;;  %vm622_vm4 = vmand %vm18435_vm0, %vm15067_vm1 }
  0x23   :  { %537 = vrot.lane.b32.xlu0 %v14854_v38, %s14699_s10  ;;  %539 = vrot.lane.b32.xlu1 %v14864_v40, %s14699_s10  ;;  %18939 = vst [vmem:[#allocation39_spill] sm:$0xff] %v18938_v44  ;;  %18954 = vst [vmem:[#allocation50_spill] sm:$0xff] %v15177_v37  ;;  %v18960_v44 = vand.u32 63, %v15177_v37 }
  0x25   :  { %vm15236_vm7 = vcmp.ge.s32.totalorder %v18960_v44, 1 }
  0x27   :  { %14605 = vrot.lane.b32.xlu0 %v14604_v42, %s14698_s9  ;;  %541 = vrot.lane.b32.xlu1 %v14867_v41, %s14699_s10 }
  0x2b   :  { %543 = vrot.lane.b32.xlu0 %v14877_v43, %s14699_s10  ;;  %14610 = vrot.lane.b32.xlu1 %v14609_v45, %s14698_s9  ;;  %v28_v45 = vld [vmem:[%s18322_s1 + $0x10] sm:$0xff] }
  0x2f   :  { %545 = vrot.lane.b32.xlu0 %v14885_v46, %s14699_s10  ;;  %547 = vrot.lane.b32.xlu1 %v14895_v48, %s14699_s10 }
  0x33   :  { %14615 = vrot.lane.b32.xlu0 %v14614_v50, %s14698_s9  ;;  %549 = vrot.lane.b32.xlu1 %v14898_v49, %s14699_s10  ;;  %v93_v50 = vld [vmem:[%s18322_s1 + $0x218] sm:$0xff] }
  0x34   :  { %v15117_v6 = vpack.c.bf16 %v125_v52, %v93_v50 }
  0x36   :  { %18947 = vst [vmem:[#allocation45_spill] sm:$0xff] %v15117_v6 }
  0x37   :  { %551 = vrot.lane.b32.xlu0 %v14908_v51, %s14699_s10  ;;  %14620 = vrot.lane.b32.xlu1 %v14619_v53, %s14698_s9  ;;  %v18940_v53 = vmov 0 }
  0x38   :  { %v18941_v53 = vsel %vm15090_vm3, 4294967295, %v18940_v53 }
  0x39   :  { %18942 = vst [vmem:[#allocation40_spill] sm:$0xff] %v18941_v53 }
  0x3b   :  { %553 = vrot.lane.b32.xlu0 %v14916_v54, %s14699_s10  ;;  %555 = vrot.lane.b32.xlu1 %v14926_v56, %s14699_s10 }
  0x3f   :  { %14625 = vrot.lane.b32.xlu0 %v14624_v58, %s14698_s9  ;;  %557 = vrot.lane.b32.xlu1 %v14929_v57, %s14699_s10 }
  0x43   :  { %559 = vrot.lane.b32.xlu0 %v14939_v59, %s14699_s10  ;;  %14630 = vrot.lane.b32.xlu1 %v14629_v61, %s14698_s9  ;;  %v15105_v61 = vpack.c.bf16 %v60_v47, %v28_v45  ;;  %v18950_v45 = vmov 0 }
  0x45   :  { %18944 = vst [vmem:[#allocation42_spill] sm:$0xff] %v15105_v61 }
  0x47   :  { %561 = vrot.lane.b32.xlu0 %v14947_v62, %s14699_s10  ;;  %563 = vrot.lane.b32.xlu1 %v14957_v1, %s14699_s10 }
  0x4b   :  { %14635 = vrot.lane.b32.xlu0 %v14634_v3, %s14698_s9  ;;  %565 = vrot.lane.b32.xlu1 %v14960_v2, %s14699_s10 }
  0x4f   :  { %567 = vrot.lane.b32.xlu0 %v14970_v4, %s14699_s10  ;;  %14640 = vrot.lane.b32.xlu1 %v14639_v7, %s14698_s9  ;;  %v18327_v7 = vand.u32 63, %v15095_v55 }
  0x51   :  { %vm15165_vm6 = vcmp.ge.s32.totalorder %v18327_v7, 1 }
  0x52   :  { %v18951_v45 = vsel %vm15165_vm6, 4294967295, %v18950_v45 }
  0x53   :  { %569 = vrot.lane.b32.xlu0 %v14978_v8, %s14699_s10  ;;  %571 = vrot.lane.b32.xlu1 %v14988_v10, %s14699_s10  ;;  %18952 = vst [vmem:[#allocation48_spill] sm:$0xff] %v18951_v45 }
  0x57   :  { %14645 = vrot.lane.b32.xlu0 %v14644_v13, %s14698_s9  ;;  %573 = vrot.lane.b32.xlu1 %v14991_v12, %s14699_s10 }
  0x5b   :  { %575 = vrot.lane.b32.xlu0 %v15001_v14, %s14699_s10  ;;  %14650 = vrot.lane.b32.xlu1 %v14649_v21, %s14698_s9 }
  0x5f   :  { %577 = vrot.lane.b32.xlu0 %v15009_v24, %s14699_s10  ;;  %579 = vrot.lane.b32.xlu1 %v15016_v27, %s14699_s10 }
  0x63   :  { %14655 = vrot.lane.b32.xlu0 %v14654_v28, %s14698_s9  ;;  %581 = vrot.lane.b32.xlu1 %v14819_v30, %s14699_s10  ;;  %v92_v28 = vld [vmem:[%s18322_s1 + $0x210] sm:$0xff] }
  0x67   :  { %583 = vrot.lane.b32.xlu0 %v15026_v15, %s14699_s10  ;;  %14660 = vrot.lane.b32.xlu1 %v14659_v29, %s14698_s9  ;;  %v124_v29 = vld [vmem:[%s18322_s1 + $0x310] sm:$0x3f] }
  0x68   :  { %v15174_v52 = vpack.c.bf16 %v124_v29, %v92_v28 }
  0x6a   :  { %18953 = vst [vmem:[#allocation49_spill] sm:$0xff] %v15174_v52 }
  0x6b   :  { %585 = vrot.lane.b32.xlu0 %v14776_v19, %s14699_s10  ;;  %1872 = vrot.lane.b32.xlu1 %v14776_v19, %s14698_s9 }
  0x6f   :  { %3067 = vrot.lane.b32.xlu0 %v14773_v18, %s14700_s0  ;;  %3069 = vrot.lane.b32.xlu1 %v14796_v23, %s14700_s0 }
  0x73   :  { %3129 = vrot.lane.b32.xlu0 %v14792_v22, %s14700_s0  ;;  %4354 = vrot.lane.b32.xlu1 %v14773_v18, %s14701_s27 }
  0x77   :  { %4356 = vrot.lane.b32.xlu0 %v14796_v23, %s14701_s27  ;;  %4416 = vrot.lane.b32.xlu1 %v14792_v22, %s14701_s27 }
  0x7b   :  { %3071 = vrot.lane.b32.xlu0 %v14807_v26, %s14700_s0  ;;  %3073 = vrot.lane.b32.xlu1 %v14829_v31, %s14700_s0 }
  0x7d   :  { %v1813_v39 = vpop.permute.xlu1 %1812  ;;  %v526_v42 = vpop.permute.xlu0 %525 }
  0x7f   :  { %4358 = vrot.lane.b32.xlu0 %v14807_v26, %s14701_s27  ;;  %4360 = vrot.lane.b32.xlu1 %v14829_v31, %s14701_s27 }
  0x81   :  { %v15097_v58 = vpop.permute.xlu1 %587  ;;  %v15099_v60 = vpop.permute.xlu0 %527 }
  0x82   :  { %v15110_v63 = vsel %vm18447_vm2, %v526_v42, %v15099_v60  ;;  %v15115_v3 = vsel %vm18447_vm2, %v15097_v58, %v526_v42  ;;  %v31_v42 = vld [vmem:[%s18322_s1 + $0x28] sm:$0xff] }
  0x83   :  { %18945 = vst [vmem:[#allocation43_spill] sm:$0xff] %v15110_v63  ;;  %18946 = vst [vmem:[#allocation44_spill] sm:$0xff] %v15115_v3  ;;  %12779 = vmatprep.mubr.msk.f32.mxu0 %vm15090_vm3, %v15110_v63  ;;  %3075 = vrot.lane.b32.xlu0 %v14832_v32, %s14700_s0 }
  0x84   :  { %12780 = vmatmul.mubr.msk.f32.vlgmr.msra.gmra.mrb[0].mxu0 %vm622_vm4, %v15115_v3  ;;  %3077 = vrot.lane.b32.xlu1 %v14846_v35, %s14700_s0 }
  0x85   :  { %13006 = vmatpush1.bf16.xpose.msra.mxu0 %v15105_v61  ;;  %v15130_v9 = vpop.permute.xlu1 %1874  ;;  %v15132_v13 = vpop.permute.xlu0 %1814 }
  0x86   :  { %v15137_v20 = vsel %vm18444_vm5, %v1813_v39, %v15132_v13  ;;  %v15142_v21 = vsel %vm18444_vm5, %v15130_v9, %v1813_v39  ;;  %13008 = vmatprep.subr.bf16.mxu0 %v15117_v6  ;;  %v63_v39 = vld [vmem:[%s18322_s1 + $0x128] sm:$0xff] }
  0x87   :  { %18948 = vst [vmem:[#allocation46_spill] sm:$0xff] %v15137_v20  ;;  %18949 = vst [vmem:[#allocation47_spill] sm:$0xff] %v15142_v21  ;;  %2005 = vmatprep.mubr.f32.mxu1 %v15137_v20  ;;  %4362 = vrot.lane.b32.xlu0 %v14832_v32, %s14701_s27  ;;  %v15185_v0 = vpack.c.bf16 %v63_v39, %v31_v42  ;;  %v62_v20 = vld [vmem:[%s18322_s1 + $0x120] sm:$0xff]  ;;  %v95_v42 = vld [vmem:[%s18322_s1 + $0x228] sm:$0xff] }
  0x88   :  { %12811 = vmatmul.mubr.msk.f32.vlgmr.msra.gmra.mrb[0].mxu1 %vm18435_vm0, %v15142_v21  ;;  %4364 = vrot.lane.b32.xlu1 %v14846_v35, %s14701_s27  ;;  %v15188_v21 = vadd.s32 640, %v15049_v34  ;;  %v127_v39 = vld [vmem:[%s18322_s1 + $0x328] sm:$0x3f] }
  0x89   :  { %13134 = vmatpush1.bf16.xpose.msra.mxu1 %v15105_v61  ;;  %v530_v47 = vpop.permute.xlu0 %529  ;;  %v15172_v50 = vpop.permute.xlu1 %531  ;;  %18956 = vst [vmem:[#allocation52_spill] sm:$0xff] %v15185_v0  ;;  %v15245_v55 = vpack.c.bf16 %v127_v39, %v95_v42  ;;  %v33_v39 = vld [vmem:[%s18322_s1 + $0x38] sm:$0xff] }
  0x8a   :  { %13136 = vmatprep.subr.bf16.mxu1 %v15117_v6  ;;  %v15183_v7 = vsel %vm18447_vm2, %v530_v47, %v15172_v50  ;;  %18957 = vst [vmem:[#allocation53_spill] sm:$0xff] %v15188_v21  ;;  %v18961_v6 = vmov 0 }
  0x8b   :  { %18955 = vst [vmem:[#allocation51_spill] sm:$0xff] %v15183_v7  ;;  %12781 = vmatprep.mubr.msk.f32.mxu0 %vm15165_vm6, %v15183_v7  ;;  %3079 = vrot.lane.b32.xlu0 %v14854_v38, %s14700_s0  ;;  %v30_v7 = vld [vmem:[%s18322_s1 + $0x20] sm:$0xff]  ;;  %v18962_v6 = vsel %vm15236_vm7, 4294967295, %v18961_v6  ;;  %18965 = vst [vmem:[#allocation57_spill] sm:$0xff] %v15245_v55 }
  0x8c   :  { %3081 = vrot.lane.b32.xlu1 %v14864_v40, %s14700_s0  ;;  %18963 = vst [vmem:[#allocation55_spill] sm:$0xff] %v18962_v6  ;;  %v15240_v61 = vpack.c.bf16 %v62_v20, %v30_v7  ;;  %v15262_v7 = vsel %vm18447_vm2, %v15099_v60, %v530_v47  ;;  %v94_v60 = vld [vmem:[%s18322_s1 + $0x220] sm:$0xff]  ;;  %v18979_v6 = vmov 0 }
  0x8d   :  { %13010 = vmatpush1.bf16.xpose.msra.mxu0 %v15174_v52  ;;  %v15198_v28 = vpop.permute.xlu0 %14595  ;;  %v15200_v29 = vpop.permute.xlu1 %533  ;;  %18971 = vst [vmem:[#allocation60_spill] sm:$0xff] %v15262_v7  ;;  %v126_v47 = vld [vmem:[%s18322_s1 + $0x320] sm:$0x3f] }
  0x8e   :  { %v14597_v3 = vunpack.i.l.bf16 %v15198_v28  ;;  %13012 = vmatprep.subr.bf16.mxu0 %v15185_v0  ;;  %v18958_v5 = vunpack.i.h.bf16 %v15198_v28  ;;  %18964 = vst [vmem:[#allocation56_spill] sm:$0xff] %v15240_v61 }
  0x8f   :  { %4366 = vrot.lane.b32.xlu0 %v14854_v38, %s14701_s27 }
  0x90   :  { %v15225_v22 = vsel %vm18444_vm5, %v14597_v3, %v18958_v5  ;;  %4368 = vrot.lane.b32.xlu1 %v14864_v40, %s14701_s27  ;;  %v15292_v42 = vsel %vm18444_vm5, %v15132_v13, %v14597_v3  ;;  %v15306_v3 = vpack.c.bf16 %v126_v47, %v94_v60  ;;  %v15309_v13 = vadd.s32 512, %v15049_v34  ;;  %v64_v47 = vld [vmem:[%s18322_s1 + $0x130] sm:$0xff]  ;;  %v129_v60 = vld [vmem:[%s18322_s1 + $0x338] sm:$0x3f] }
  0x91   :  { %18959 = vst [vmem:[#allocation54_spill] sm:$0xff] %v15225_v22  ;;  %13138 = vmatpush1.bf16.xpose.msra.mxu1 %v15174_v52  ;;  %v15230_v63 = vpop.permute.xlu0 %535  ;;  %v15232_v45 = vpop.permute.xlu1 %14600  ;;  %2075 = vmatprep.mubr.f32.mxu1 %v15225_v22  ;;  %v18966_v52 = vand.u32 63, %v15188_v21  ;;  %18973 = vst [vmem:[#allocation62_spill] sm:$0xff] %v15292_v42  ;;  %v15316_v22 = vadd.s32 896, %v15049_v34 }
  0x92   :  { %v18352_v5 = vunpack.i.h.bf16 %v15232_v45  ;;  %13140 = vmatprep.subr.bf16.mxu1 %v15185_v0  ;;  %v15257_v44 = vsel %vm18447_vm2, %v15200_v29, %v15230_v63  ;;  %v14602_v20 = vunpack.i.l.bf16 %v15232_v45  ;;  %18974 = vst [vmem:[#allocation63_spill] sm:$0xff] %v15306_v3  ;;  %18975 = vst [vmem:[#allocation64_spill] sm:$0xff] %v15309_v13  ;;  %v18985_v0 = vmov 0 }
  0x93   :  { %vm15249_vm8 = vcmp.ge.s32.totalorder %v18966_v52, 1  ;;  %18970 = vst [vmem:[#allocation59_spill] sm:$0xff] %v15257_v44  ;;  %3083 = vrot.lane.b32.xlu0 %v14867_v41, %s14700_s0  ;;  %18977 = vst [vmem:[#allocation66_spill] sm:$0xff] %v15316_v22  ;;  %v18984_v37 = vand.u32 63, %v15316_v22 }
  0x94   :  { %v18968_v33 = vsel %vm15249_vm8, 4294967295, %v18967_v33  ;;  %12782 = vmatmul.mubr.msk.f32.vlgmr.msra.gmra.mrb[0].mxu0 %vm15236_vm7, %v15262_v7  ;;  %3085 = vrot.lane.b32.xlu1 %v14877_v43, %s14700_s0  ;;  %v15287_v52 = vsel %vm18444_vm5, %v14602_v20, %v18352_v5 }
  0x95   :  { %18969 = vst [vmem:[#allocation58_spill] sm:$0xff] %v18968_v33  ;;  %13014 = vmatpush1.bf16.xpose.msra.mxu0 %v15240_v61  ;;  %12783 = vmatprep.mubr.msk.f32.mxu0 %vm15249_vm8, %v15257_v44  ;;  %18972 = vst [vmem:[#allocation61_spill] sm:$0xff] %v15287_v52  ;;  %v65_v44 = vld [vmem:[%s18322_s1 + $0x138] sm:$0xff]  ;;  %v15344_v7 = vpop.permute.xlu1 %539  ;;  %vm15363_vm10 = vcmp.ge.s32.totalorder %v18984_v37, 1 }
  0x96   :  { %13016 = vmatprep.subr.bf16.mxu0 %v15245_v55  ;;  %v15313_v5 = vpack.c.bf16 %v65_v44, %v33_v39  ;;  %v32_v44 = vld [vmem:[%s18322_s1 + $0x30] sm:$0xff]  ;;  %v18978_v39 = vand.u32 63, %v15309_v13  ;;  %v18986_v0 = vsel %vm15363_vm10, 4294967295, %v18985_v0 }
  0x97   :  { %4370 = vrot.lane.b32.xlu0 %v14867_v41, %s14701_s27  ;;  %18987 = vst [vmem:[#allocation70_spill] sm:$0xff] %v18986_v0 }
  0x98   :  { %2076 = vmatmul.mubr.f32.vlgmr.msra.gmra.mrb[0].mxu1 %v15292_v42  ;;  %4372 = vrot.lane.b32.xlu1 %v14877_v43, %s14701_s27  ;;  %18976 = vst [vmem:[#allocation65_spill] sm:$0xff] %v15313_v5  ;;  %v15318_v42 = vpop.permute.xlu0 %537  ;;  %vm15351_vm9 = vcmp.ge.s32.totalorder %v18978_v39, 1 }
  0x99   :  { %13142 = vmatpush1.bf16.xpose.msra.mxu1 %v15240_v61  ;;  %2145 = vmatprep.mubr.f32.mxu1 %v15287_v52  ;;  %v97_v52 = vld [vmem:[%s18322_s1 + $0x238] sm:$0xff]  ;;  %v18980_v6 = vsel %vm15351_vm9, 4294967295, %v18979_v6  ;;  %v15371_v39 = vsel %vm18447_vm2, %v15318_v42, %v15344_v7 }
  0x9a   :  { %13144 = vmatprep.subr.bf16.mxu1 %v15245_v55  ;;  %18981 = vst [vmem:[#allocation67_spill] sm:$0xff] %v18980_v6  ;;  %v15355_v55 = vpack.c.bf16 %v64_v47, %v32_v44  ;;  %v15359_v21 = vpack.c.bf16 %v129_v60, %v97_v52  ;;  %18988 = vst [vmem:[#allocation71_spill] sm:$0xff] %v15371_v39  ;;  %v15377_v44 = vsel %vm18447_vm2, %v15172_v50, %v15200_v29  ;;  %v96_v50 = vld [vmem:[%s18322_s1 + $0x230] sm:$0xff] }
  0x9b   :  { %3087 = vrot.lane.b32.xlu0 %v14885_v46, %s14700_s0  ;;  %18989 = vst [vmem:[#allocation72_spill] sm:$0xff] %v15377_v44  ;;  %v128_v29 = vld [vmem:[%s18322_s1 + $0x330] sm:$0x3f]  ;;  %v18991_v60 = vunpack.i.h.bf16 %v15198_v28 }
  0x9c   :  { %3089 = vrot.lane.b32.xlu1 %v14895_v48, %s14700_s0  ;;  %v15346_v33 = vpop.permute.xlu0 %14605  ;;  %18982 = vst [vmem:[#allocation68_spill] sm:$0xff] %v15355_v55  ;;  %18983 = vst [vmem:[#allocation69_spill] sm:$0xff] %v15359_v21  ;;  %v15422_v28 = vpack.c.bf16 %v128_v29, %v96_v50  ;;  %v131_v50 = vld [vmem:[%s18322_s1 + $0x348] sm:$0x3f] }
  0x9d   :  { %13018 = vmatpush1.bf16.xpose.msra.mxu0 %v15306_v3  ;;  %v18371_v61 = vunpack.i.h.bf16 %v15346_v33  ;;  %v14607_v37 = vunpack.i.l.bf16 %v15346_v33  ;;  %v15408_v47 = vsel %vm18444_vm5, %v18991_v60, %v14602_v20  ;;  %v15425_v20 = vadd.s32 768, %v15049_v34 }
  0x9e   :  { %13020 = vmatprep.subr.bf16.mxu0 %v15313_v5  ;;  %18992 = vst [vmem:[#allocation74_spill] sm:$0xff] %v15408_v47  ;;  %18993 = vst [vmem:[#allocation75_spill] sm:$0xff] %v15422_v28 }
  0x9f   :  { %4374 = vrot.lane.b32.xlu0 %v14885_v46, %s14701_s27  ;;  %v15402_v52 = vsel %vm18444_vm5, %v14607_v37, %v18371_v61  ;;  %18994 = vst [vmem:[#allocation76_spill] sm:$0xff] %v15425_v20  ;;  %v15432_v61 = vadd.s32 1152, %v15049_v34  ;;  %v18997_v29 = vand.u32 63, %v15425_v20 }
  0xa0   :  { %4376 = vrot.lane.b32.xlu1 %v14895_v48, %s14701_s27  ;;  %18990 = vst [vmem:[#allocation73_spill] sm:$0xff] %v15402_v52  ;;  %v15460_v0 = vpop.permute.xlu0 %543 }
  0xa1   :  { %13146 = vmatpush1.bf16.xpose.msra.mxu1 %v15306_v3  ;;  %18996 = vst [vmem:[#allocation78_spill] sm:$0xff] %v15432_v61  ;;  %vm15467_vm11 = vcmp.ge.s32.totalorder %v18997_v29, 1  ;;  %v19004_v3 = vmov 0 }
  0xa2   :  { %13148 = vmatprep.subr.bf16.mxu1 %v15313_v5  ;;  %v19003_v5 = vand.u32 63, %v15432_v61 }
  0xa3   :  { %3091 = vrot.lane.b32.xlu0 %v14898_v49, %s14700_s0 }
  0xa4   :  { %12784 = vmatmul.mubr.msk.f32.vlgmr.msra.gmra.mrb[0].mxu0 %vm15351_vm9, %v15377_v44  ;;  %3093 = vrot.lane.b32.xlu1 %v14908_v51, %s14700_s0  ;;  %v67_v44 = vld [vmem:[%s18322_s1 + $0x148] sm:$0xff]  ;;  %vm15479_vm12 = vcmp.ge.s32.totalorder %v19003_v5, 1 }
  0xa5   :  { %13022 = vmatpush1.bf16.xpose.msra.mxu0 %v15355_v55  ;;  %12785 = vmatprep.mubr.msk.f32.mxu0 %vm15363_vm10, %v15371_v39  ;;  %v35_v39 = vld [vmem:[%s18322_s1 + $0x48] sm:$0xff]  ;;  %v19005_v3 = vsel %vm15479_vm12, 4294967295, %v19004_v3 }
  0xa6   :  { %13024 = vmatprep.subr.bf16.mxu0 %v15359_v21  ;;  %v15429_v60 = vpack.c.bf16 %v67_v44, %v35_v39  ;;  %v34_v39 = vld [vmem:[%s18322_s1 + $0x40] sm:$0xff]  ;;  %19006 = vst [vmem:[#allocation82_spill] sm:$0xff] %v19005_v3 }
  0xa7   :  { %4378 = vrot.lane.b32.xlu0 %v14898_v49, %s14701_s27  ;;  %v66_v44 = vld [vmem:[%s18322_s1 + $0x140] sm:$0xff] }
  0xa8   :  { %2146 = vmatmul.mubr.f32.vlgmr.msra.gmra.mrb[0].mxu1 %v15408_v47  ;;  %4380 = vrot.lane.b32.xlu1 %v14908_v51, %s14701_s27  ;;  %18995 = vst [vmem:[#allocation77_spill] sm:$0xff] %v15429_v60  ;;  %v15434_v47 = vpop.permute.xlu1 %541 }
  0xa9   :  { %13150 = vmatpush1.bf16.xpose.msra.mxu1 %v15355_v55  ;;  %2215 = vmatprep.mubr.f32.mxu1 %v15402_v52  ;;  %v99_v52 = vld [vmem:[%s18322_s1 + $0x248] sm:$0xff]  ;;  %v15471_v55 = vpack.c.bf16 %v66_v44, %v34_v39  ;;  %v15487_v29 = vsel %vm18447_vm2, %v15434_v47, %v15460_v0  ;;  %v15493_v39 = vsel %vm18447_vm2, %v15230_v63, %v15318_v42  ;;  %v98_v63 = vld [vmem:[%s18322_s1 + $0x240] sm:$0xff] }
  0xaa   :  { %13152 = vmatprep.subr.bf16.mxu1 %v15359_v21  ;;  %v18998_v21 = vmov 0  ;;  %v15475_v13 = vpack.c.bf16 %v131_v50, %v99_v52  ;;  %19007 = vst [vmem:[#allocation83_spill] sm:$0xff] %v15487_v29  ;;  %19008 = vst [vmem:[#allocation84_spill] sm:$0xff] %v15493_v39  ;;  %v130_v42 = vld [vmem:[%s18322_s1 + $0x340] sm:$0x3f]  ;;  %v19010_v50 = vunpack.i.h.bf16 %v15232_v45 }
  0xab   :  { %3095 = vrot.lane.b32.xlu0 %v14916_v54, %s14700_s0  ;;  %v18999_v21 = vsel %vm15467_vm11, 4294967295, %v18998_v21  ;;  %19001 = vst [vmem:[#allocation80_spill] sm:$0xff] %v15471_v55  ;;  %v15538_v45 = vpack.c.bf16 %v130_v42, %v98_v63  ;;  %v133_v63 = vld [vmem:[%s18322_s1 + $0x358] sm:$0x3f] }
  0xac   :  { %3097 = vrot.lane.b32.xlu1 %v14926_v56, %s14700_s0  ;;  %v15462_v6 = vpop.permute.xlu1 %14610  ;;  %19000 = vst [vmem:[#allocation79_spill] sm:$0xff] %v18999_v21  ;;  %19002 = vst [vmem:[#allocation81_spill] sm:$0xff] %v15475_v13  ;;  %v15524_v44 = vsel %vm18444_vm5, %v19010_v50, %v14607_v37  ;;  %v15541_v37 = vadd.s32 1024, %v15049_v34 }
  0xad   :  { %13026 = vmatpush1.bf16.xpose.msra.mxu0 %v15422_v28  ;;  %v18390_v22 = vunpack.i.h.bf16 %v15462_v6  ;;  %v14612_v5 = vunpack.i.l.bf16 %v15462_v6  ;;  %19011 = vst [vmem:[#allocation86_spill] sm:$0xff] %v15524_v44  ;;  %19012 = vst [vmem:[#allocation87_spill] sm:$0xff] %v15538_v45 }
  0xae   :  { %13028 = vmatprep.subr.bf16.mxu0 %v15429_v60  ;;  %19013 = vst [vmem:[#allocation88_spill] sm:$0xff] %v15541_v37  ;;  %v19016_v42 = vand.u32 63, %v15541_v37 }
  0xaf   :  { %4382 = vrot.lane.b32.xlu0 %v14916_v54, %s14701_s27  ;;  %v15518_v52 = vsel %vm18444_vm5, %v14612_v5, %v18390_v22  ;;  %v15548_v22 = vadd.s32 1408, %v15049_v34 }
  0xb0   :  { %4384 = vrot.lane.b32.xlu1 %v14926_v56, %s14701_s27  ;;  %19009 = vst [vmem:[#allocation85_spill] sm:$0xff] %v15518_v52  ;;  %v15576_v3 = vpop.permute.xlu1 %547  ;;  %vm15583_vm13 = vcmp.ge.s32.totalorder %v19016_v42, 1 }
  0xb1   :  { %13154 = vmatpush1.bf16.xpose.msra.mxu1 %v15422_v28  ;;  %19015 = vst [vmem:[#allocation90_spill] sm:$0xff] %v15548_v22  ;;  %v19023_v28 = vmov 0 }
  0xb2   :  { %13156 = vmatprep.subr.bf16.mxu1 %v15429_v60  ;;  %v19022_v60 = vand.u32 63, %v15548_v22 }
  0xb3   :  { %3099 = vrot.lane.b32.xlu0 %v14929_v57, %s14700_s0 }
  0xb4   :  { %12786 = vmatmul.mubr.msk.f32.vlgmr.msra.gmra.mrb[0].mxu0 %vm15467_vm11, %v15493_v39  ;;  %3101 = vrot.lane.b32.xlu1 %v14939_v59, %s14700_s0  ;;  %v69_v39 = vld [vmem:[%s18322_s1 + $0x158] sm:$0xff]  ;;  %vm15595_vm14 = vcmp.ge.s32.totalorder %v19022_v60, 1 }
  0xb5   :  { %13030 = vmatpush1.bf16.xpose.msra.mxu0 %v15471_v55  ;;  %12787 = vmatprep.mubr.msk.f32.mxu0 %vm15479_vm12, %v15487_v29  ;;  %v37_v29 = vld [vmem:[%s18322_s1 + $0x58] sm:$0xff]  ;;  %v19024_v28 = vsel %vm15595_vm14, 4294967295, %v19023_v28 }
  0xb6   :  { %13032 = vmatprep.subr.bf16.mxu0 %v15475_v13  ;;  %v15545_v50 = vpack.c.bf16 %v69_v39, %v37_v29  ;;  %v36_v29 = vld [vmem:[%s18322_s1 + $0x50] sm:$0xff]  ;;  %19025 = vst [vmem:[#allocation94_spill] sm:$0xff] %v19024_v28 }
  0xb7   :  { %4386 = vrot.lane.b32.xlu0 %v14929_v57, %s14701_s27  ;;  %v68_v39 = vld [vmem:[%s18322_s1 + $0x150] sm:$0xff] }
  0xb8   :  { %2216 = vmatmul.mubr.f32.vlgmr.msra.gmra.mrb[0].mxu1 %v15524_v44  ;;  %4388 = vrot.lane.b32.xlu1 %v14939_v59, %s14701_s27  ;;  %19014 = vst [vmem:[#allocation89_spill] sm:$0xff] %v15545_v50  ;;  %v15550_v44 = vpop.permute.xlu0 %545 }
  0xb9   :  { %13158 = vmatpush1.bf16.xpose.msra.mxu1 %v15471_v55  ;;  %2285 = vmatprep.mubr.f32.mxu1 %v15518_v52  ;;  %v101_v52 = vld [vmem:[%s18322_s1 + $0x258] sm:$0xff]  ;;  %v15587_v55 = vpack.c.bf16 %v68_v39, %v36_v29  ;;  %v15603_v42 = vsel %vm18447_vm2, %v15550_v44, %v15576_v3  ;;  %v15609_v29 = vsel %vm18447_vm2, %v15344_v7, %v15434_v47  ;;  %v100_v7 = vld [vmem:[%s18322_s1 + $0x250] sm:$0xff] }
  0xba   :  { %13160 = vmatprep.subr.bf16.mxu1 %v15475_v13  ;;  %v19017_v13 = vmov 0  ;;  %v15591_v20 = vpack.c.bf16 %v133_v63, %v101_v52  ;;  %19026 = vst [vmem:[#allocation95_spill] sm:$0xff] %v15603_v42  ;;  %19027 = vst [vmem:[#allocation96_spill] sm:$0xff] %v15609_v29  ;;  %v132_v47 = vld [vmem:[%s18322_s1 + $0x350] sm:$0x3f]  ;;  %v19029_v63 = vunpack.i.h.bf16 %v15346_v33 }
  0xbb   :  { %3103 = vrot.lane.b32.xlu0 %v14947_v62, %s14700_s0  ;;  %v19018_v13 = vsel %vm15583_vm13, 4294967295, %v19017_v13  ;;  %19020 = vst [vmem:[#allocation92_spill] sm:$0xff] %v15587_v55  ;;  %v15654_v33 = vpack.c.bf16 %v132_v47, %v100_v7  ;;  %v135_v7 = vld [vmem:[%s18322_s1 + $0x368] sm:$0x3f] }
  0xbc   :  { %3105 = vrot.lane.b32.xlu1 %v14957_v1, %s14700_s0  ;;  %v15578_v21 = vpop.permute.xlu0 %14615  ;;  %19019 = vst [vmem:[#allocation91_spill] sm:$0xff] %v19018_v13  ;;  %19021 = vst [vmem:[#allocation93_spill] sm:$0xff] %v15591_v20  ;;  %v15640_v39 = vsel %vm18444_vm5, %v19029_v63, %v14612_v5  ;;  %v15657_v5 = vadd.s32 1280, %v15049_v34 }
  0xbd   :  { %13034 = vmatpush1.bf16.xpose.msra.mxu0 %v15538_v45  ;;  %v18409_v61 = vunpack.i.h.bf16 %v15578_v21  ;;  %v14617_v60 = vunpack.i.l.bf16 %v15578_v21  ;;  %19030 = vst [vmem:[#allocation98_spill] sm:$0xff] %v15640_v39  ;;  %19031 = vst [vmem:[#allocation99_spill] sm:$0xff] %v15654_v33 }
  0xbe   :  { %13036 = vmatprep.subr.bf16.mxu0 %v15545_v50  ;;  %19032 = vst [vmem:[#allocation100_spill] sm:$0xff] %v15657_v5  ;;  %v19035_v47 = vand.u32 63, %v15657_v5 }
  0xbf   :  { %4390 = vrot.lane.b32.xlu0 %v14947_v62, %s14701_s27  ;;  %v15634_v52 = vsel %vm18444_vm5, %v14617_v60, %v18409_v61  ;;  %v15664_v61 = vadd.s32 1664, %v15049_v34 }
  0xc0   :  { %4392 = vrot.lane.b32.xlu1 %v14957_v1, %s14701_s27  ;;  %19028 = vst [vmem:[#allocation97_spill] sm:$0xff] %v15634_v52  ;;  %v15692_v28 = vpop.permute.xlu0 %551  ;;  %vm15699_vm15 = vcmp.ge.s32.totalorder %v19035_v47, 1 }
  0xc1   :  { %13162 = vmatpush1.bf16.xpose.msra.mxu1 %v15538_v45  ;;  %19034 = vst [vmem:[#allocation102_spill] sm:$0xff] %v15664_v61  ;;  %v19042_v45 = vmov 0 }
  0xc2   :  { %13164 = vmatprep.subr.bf16.mxu1 %v15545_v50  ;;  %v19041_v50 = vand.u32 63, %v15664_v61 }
  0xc3   :  { %3107 = vrot.lane.b32.xlu0 %v14960_v2, %s14700_s0 }
  0xc4   :  { %12788 = vmatmul.mubr.msk.f32.vlgmr.msra.gmra.mrb[0].mxu0 %vm15583_vm13, %v15609_v29  ;;  %3109 = vrot.lane.b32.xlu1 %v14970_v4, %s14700_s0  ;;  %v71_v29 = vld [vmem:[%s18322_s1 + $0x168] sm:$0xff]  ;;  %vm15711_vm4 = vcmp.ge.s32.totalorder %v19041_v50, 1 }
  0xc5   :  { %13038 = vmatpush1.bf16.xpose.msra.mxu0 %v15587_v55  ;;  %12789 = vmatprep.mubr.msk.f32.mxu0 %vm15595_vm14, %v15603_v42  ;;  %v39_v42 = vld [vmem:[%s18322_s1 + $0x68] sm:$0xff]  ;;  %v19043_v45 = vsel %vm15711_vm4, 4294967295, %v19042_v45 }
  0xc6   :  { %13040 = vmatprep.subr.bf16.mxu0 %v15591_v20  ;;  %v15661_v63 = vpack.c.bf16 %v71_v29, %v39_v42  ;;  %v38_v42 = vld [vmem:[%s18322_s1 + $0x60] sm:$0xff]  ;;  %19044 = vst [vmem:[#allocation106_spill] sm:$0xff] %v19043_v45 }
  0xc7   :  { %4394 = vrot.lane.b32.xlu0 %v14960_v2, %s14701_s27  ;;  %v70_v29 = vld [vmem:[%s18322_s1 + $0x160] sm:$0xff] }
  0xc8   :  { %2286 = vmatmul.mubr.f32.vlgmr.msra.gmra.mrb[0].mxu1 %v15640_v39  ;;  %4396 = vrot.lane.b32.xlu1 %v14970_v4, %s14701_s27  ;;  %19033 = vst [vmem:[#allocation101_spill] sm:$0xff] %v15661_v63  ;;  %v15666_v39 = vpop.permute.xlu1 %549 }
  0xc9   :  { %13166 = vmatpush1.bf16.xpose.msra.mxu1 %v15587_v55  ;;  %2355 = vmatprep.mubr.f32.mxu1 %v15634_v52  ;;  %v103_v52 = vld [vmem:[%s18322_s1 + $0x268] sm:$0xff]  ;;  %v15703_v55 = vpack.c.bf16 %v70_v29, %v38_v42  ;;  %v15719_v47 = vsel %vm18447_vm2, %v15666_v39, %v15692_v28  ;;  %v15725_v42 = vsel %vm18447_vm2, %v15460_v0, %v15550_v44  ;;  %v102_v0 = vld [vmem:[%s18322_s1 + $0x260] sm:$0xff] }
  0xca   :  { %13168 = vmatprep.subr.bf16.mxu1 %v15591_v20  ;;  %v19036_v20 = vmov 0  ;;  %v15707_v37 = vpack.c.bf16 %v135_v7, %v103_v52  ;;  %19045 = vst [vmem:[#allocation107_spill] sm:$0xff] %v15719_v47  ;;  %19046 = vst [vmem:[#allocation108_spill] sm:$0xff] %v15725_v42  ;;  %v134_v44 = vld [vmem:[%s18322_s1 + $0x360] sm:$0x3f]  ;;  %v19048_v7 = vunpack.i.h.bf16 %v15462_v6 }
  0xcb   :  { %3111 = vrot.lane.b32.xlu0 %v14978_v8, %s14700_s0  ;;  %v19037_v20 = vsel %vm15699_vm15, 4294967295, %v19036_v20  ;;  %19039 = vst [vmem:[#allocation104_spill] sm:$0xff] %v15703_v55  ;;  %v15770_v6 = vpack.c.bf16 %v134_v44, %v102_v0  ;;  %v137_v0 = vld [vmem:[%s18322_s1 + $0x378] sm:$0x3f] }
  0xcc   :  { %3113 = vrot.lane.b32.xlu1 %v14988_v10, %s14700_s0  ;;  %v15694_v13 = vpop.permute.xlu1 %14620  ;;  %19038 = vst [vmem:[#allocation103_spill] sm:$0xff] %v19037_v20  ;;  %19040 = vst [vmem:[#allocation105_spill] sm:$0xff] %v15707_v37  ;;  %v15756_v29 = vsel %vm18444_vm5, %v19048_v7, %v14617_v60  ;;  %v15773_v60 = vadd.s32 1536, %v15049_v34 }
  0xcd   :  { %13042 = vmatpush1.bf16.xpose.msra.mxu0 %v15654_v33  ;;  %v18428_v22 = vunpack.i.h.bf16 %v15694_v13  ;;  %v14622_v50 = vunpack.i.l.bf16 %v15694_v13  ;;  %19049 = vst [vmem:[#allocation110_spill] sm:$0xff] %v15756_v29  ;;  %19050 = vst [vmem:[#allocation111_spill] sm:$0xff] %v15770_v6 }
  0xce   :  { %13044 = vmatprep.subr.bf16.mxu0 %v15661_v63  ;;  %19051 = vst [vmem:[#allocation112_spill] sm:$0xff] %v15773_v60  ;;  %v19054_v44 = vand.u32 63, %v15773_v60 }
  0xcf   :  { %4398 = vrot.lane.b32.xlu0 %v14978_v8, %s14701_s27  ;;  %v15750_v52 = vsel %vm18444_vm5, %v14622_v50, %v18428_v22  ;;  %v15780_v22 = vadd.s32 1920, %v15049_v34 }
  0xd0   :  { %4400 = vrot.lane.b32.xlu1 %v14988_v10, %s14701_s27  ;;  %19047 = vst [vmem:[#allocation109_spill] sm:$0xff] %v15750_v52  ;;  %v15808_v45 = vpop.permute.xlu1 %555  ;;  %vm15815_vm0 = vcmp.ge.s32.totalorder %v19054_v44, 1 }
  0xd1   :  { %13170 = vmatpush1.bf16.xpose.msra.mxu1 %v15654_v33  ;;  %19053 = vst [vmem:[#allocation114_spill] sm:$0xff] %v15780_v22  ;;  %v19061_v33 = vmov 0 }
  0xd2   :  { %13172 = vmatprep.subr.bf16.mxu1 %v15661_v63  ;;  %v19060_v63 = vand.u32 63, %v15780_v22 }
  0xd3   :  { %3115 = vrot.lane.b32.xlu0 %v14991_v12, %s14700_s0 }
  0xd4   :  { %12790 = vmatmul.mubr.msk.f32.vlgmr.msra.gmra.mrb[0].mxu0 %vm15699_vm15, %v15725_v42  ;;  %3117 = vrot.lane.b32.xlu1 %v15001_v14, %s14700_s0  ;;  %v73_v42 = vld [vmem:[%s18322_s1 + $0x178] sm:$0xff]  ;;  %vm15827_vm5 = vcmp.ge.s32.totalorder %v19060_v63, 1  ;;  %vm18639_vm15 = vcmp.lt.s32.totalorder %v15049_v34, 1 }
  0xd5   :  { %13046 = vmatpush1.bf16.xpose.msra.mxu0 %v15703_v55  ;;  %12791 = vmatprep.mubr.msk.f32.mxu0 %vm15711_vm4, %v15719_v47  ;;  %v41_v47 = vld [vmem:[%s18322_s1 + $0x78] sm:$0xff]  ;;  %v19062_v33 = vsel %vm15827_vm5, 4294967295, %v19061_v33 }
  0xd6   :  { %13048 = vmatprep.subr.bf16.mxu0 %v15707_v37  ;;  %v15777_v7 = vpack.c.bf16 %v73_v42, %v41_v47  ;;  %v40_v47 = vld [vmem:[%s18322_s1 + $0x70] sm:$0xff]  ;;  %19063 = vst [vmem:[#allocation118_spill] sm:$0xff] %v19062_v33 }
  0xd7   :  { %4402 = vrot.lane.b32.xlu0 %v14991_v12, %s14701_s27  ;;  %v72_v42 = vld [vmem:[%s18322_s1 + $0x170] sm:$0xff] }
  0xd8   :  { %2356 = vmatmul.mubr.f32.vlgmr.msra.gmra.mrb[0].mxu1 %v15756_v29  ;;  %4404 = vrot.lane.b32.xlu1 %v15001_v14, %s14701_s27  ;;  %19052 = vst [vmem:[#allocation113_spill] sm:$0xff] %v15777_v7  ;;  %v15782_v29 = vpop.permute.xlu0 %553 }
  0xd9   :  { %13174 = vmatpush1.bf16.xpose.msra.mxu1 %v15703_v55  ;;  %2425 = vmatprep.mubr.f32.mxu1 %v15750_v52  ;;  %v105_v52 = vld [vmem:[%s18322_s1 + $0x278] sm:$0xff]  ;;  %v15819_v55 = vpack.c.bf16 %v72_v42, %v40_v47  ;;  %v15835_v44 = vsel %vm18447_vm2, %v15782_v29, %v15808_v45  ;;  %v15841_v47 = vsel %vm18447_vm2, %v15576_v3, %v15666_v39  ;;  %v104_v3 = vld [vmem:[%s18322_s1 + $0x270] sm:$0xff]  ;;  %vm19066_vm2 = vcmp.lt.s32.totalorder %v15049_v34, 64 }
  0xda   :  { %13176 = vmatprep.subr.bf16.mxu1 %v15707_v37  ;;  %v19055_v37 = vmov 0  ;;  %v15823_v5 = vpack.c.bf16 %v137_v0, %v105_v52  ;;  %19064 = vst [vmem:[#allocation119_spill] sm:$0xff] %v15835_v44  ;;  %19065 = vst [vmem:[#allocation120_spill] sm:$0xff] %v15841_v47  ;;  %v136_v39 = vld [vmem:[%s18322_s1 + $0x370] sm:$0x3f]  ;;  %v19068_v0 = vunpack.i.h.bf16 %v15578_v21 }
  0xdb   :  { %3119 = vrot.lane.b32.xlu0 %v15009_v24, %s14700_s0  ;;  %v19056_v37 = vsel %vm15815_vm0, 4294967295, %v19055_v37  ;;  %19058 = vst [vmem:[#allocation116_spill] sm:$0xff] %v15819_v55  ;;  %v15886_v21 = vpack.c.bf16 %v136_v39, %v104_v3  ;;  %v139_v3 = vld [vmem:[%s18322_s1 + $0x388] sm:$0x3f] }
  0xdc   :  { %3121 = vrot.lane.b32.xlu1 %v15016_v27, %s14700_s0  ;;  %v15810_v20 = vpop.permute.xlu0 %14625  ;;  %19057 = vst [vmem:[#allocation115_spill] sm:$0xff] %v19056_v37  ;;  %19059 = vst [vmem:[#allocation117_spill] sm:$0xff] %v15823_v5 }
  0xdd   :  { %13050 = vmatpush1.bf16.xpose.msra.mxu0 %v15770_v6  ;;  %v18452_v61 = vunpack.i.h.bf16 %v15810_v20  ;;  %v14627_v63 = vunpack.i.l.bf16 %v15810_v20  ;;  %19071 = vst [vmem:[#allocation123_spill] sm:$0xff] %v15886_v21 }
  0xde   :  { %13052 = vmatprep.subr.bf16.mxu0 %v15777_v7 }
  0xdf   :  { %4406 = vrot.lane.b32.xlu0 %v15009_v24, %s14701_s27  ;;  %v15866_v52 = vsel %vm19066_vm2, %v14627_v63, %v18452_v61  ;;  %v15896_v61 = vadd.s32 2176, %v15049_v34 }
  0xe0   :  { %4408 = vrot.lane.b32.xlu1 %v15016_v27, %s14701_s27  ;;  %19067 = vst [vmem:[#allocation121_spill] sm:$0xff] %v15866_v52  ;;  %v15918_v33 = vpop.permute.xlu0 %559 }
  0xe1   :  { %13178 = vmatpush1.bf16.xpose.msra.mxu1 %v15770_v6  ;;  %19074 = vst [vmem:[#allocation126_spill] sm:$0xff] %v15896_v61  ;;  %v19082_v6 = vmov 0 }
  0xe2   :  { %13180 = vmatprep.subr.bf16.mxu1 %v15777_v7  ;;  %v19081_v7 = vand.u32 63, %v15896_v61 }
  0xe3   :  { %3123 = vrot.lane.b32.xlu0 %v14819_v30, %s14700_s0 }
  0xe4   :  { %12792 = vmatmul.mubr.msk.f32.vlgmr.msra.gmra.mrb[0].mxu0 %vm15815_vm0, %v15841_v47  ;;  %3125 = vrot.lane.b32.xlu1 %v15026_v15, %s14700_s0  ;;  %v75_v47 = vld [vmem:[%s18322_s1 + $0x188] sm:$0xff]  ;;  %vm19085_vm0 = vcmp.lt.s32.totalorder %v15049_v34, 65 }
  0xe5   :  { %13054 = vmatpush1.bf16.xpose.msra.mxu0 %v15819_v55  ;;  %12793 = vmatprep.mubr.msk.f32.mxu0 %vm15827_vm5, %v15835_v44  ;;  %vm19069_vm5 = vmmov %vm19066_vm2  ;;  %v43_v44 = vld [vmem:[%s18322_s1 + $0x88] sm:$0xff] }
  0xe6   :  { %13056 = vmatprep.subr.bf16.mxu0 %v15823_v5  ;;  %v15872_v42 = vsel %vm19069_vm5, %v19068_v0, %v14622_v50  ;;  %v15889_v50 = vadd.s32 1792, %v15049_v34  ;;  %v15893_v0 = vpack.c.bf16 %v75_v47, %v43_v44  ;;  %v42_v44 = vld [vmem:[%s18322_s1 + $0x80] sm:$0xff]  ;;  %vm15937_vm5 = vcmp.ge.s32.totalorder %v19081_v7, 1  ;;  %vm19087_vm4 = vmmov %vm19085_vm0 }
  0xe7   :  { %19070 = vst [vmem:[#allocation122_spill] sm:$0xff] %v15872_v42  ;;  %4410 = vrot.lane.b32.xlu0 %v14819_v30, %s14701_s27  ;;  %v74_v47 = vld [vmem:[%s18322_s1 + $0x180] sm:$0xff]  ;;  %v19083_v6 = vsel %vm15937_vm5, 4294967295, %v19082_v6 }
  0xe8   :  { %2426 = vmatmul.mubr.f32.vlgmr.msra.gmra.mrb[0].mxu1 %v15872_v42  ;;  %4412 = vrot.lane.b32.xlu1 %v15026_v15, %s14701_s27  ;;  %19072 = vst [vmem:[#allocation124_spill] sm:$0xff] %v15889_v50  ;;  %19073 = vst [vmem:[#allocation125_spill] sm:$0xff] %v15893_v0  ;;  %v558_v42 = vpop.permute.xlu1 %557  ;;  %v15929_v39 = vpack.c.bf16 %v74_v47, %v42_v44  ;;  %v15950_v44 = vsel %vm19087_vm4, %v15692_v28, %v15782_v29  ;;  %v106_v7 = vld [vmem:[%s18322_s1 + $0x280] sm:$0xff] }
  0xe9   :  { %13182 = vmatpush1.bf16.xpose.msra.mxu1 %v15819_v55  ;;  %2495 = vmatprep.mubr.f32.mxu1 %v15866_v52  ;;  %v107_v52 = vld [vmem:[%s18322_s1 + $0x288] sm:$0xff]  ;;  %v19076_v55 = vmov 0  ;;  %19084 = vst [vmem:[#allocation130_spill] sm:$0xff] %v19083_v6  ;;  %19088 = vst [vmem:[#allocation132_spill] sm:$0xff] %v15950_v44  ;;  %v138_v28 = vld [vmem:[%s18322_s1 + $0x380] sm:$0x3f]  ;;  %v562_v6 = vpop.permute.xlu0 %561 }
  0xea   :  { %13184 = vmatprep.subr.bf16.mxu1 %v15823_v5  ;;  %v19075_v5 = vand.u32 63, %v15889_v50  ;;  %19079 = vst [vmem:[#allocation128_spill] sm:$0xff] %v15929_v39  ;;  %v15933_v60 = vpack.c.bf16 %v139_v3, %v107_v52  ;;  %v19091_v3 = vunpack.i.h.bf16 %v15694_v13  ;;  %v15990_v13 = vadd.s32 2048, %v15049_v34 }
  0xeb   :  { %3127 = vrot.lane.b32.xlu0 %v14776_v19, %s14700_s0  ;;  %s14702_s0 = smov 127  }
  0xec   :  { %4414 = vrot.lane.b32.xlu1 %v14776_v19, %s14701_s27  ;;  %v15920_v37 = vpop.permute.xlu1 %14630  ;;  %vm15925_vm2 = vcmp.ge.s32.totalorder %v19075_v5, 1  ;;  %19080 = vst [vmem:[#allocation129_spill] sm:$0xff] %v15933_v60  ;;  %v15944_v5 = vsel %vm19085_vm0, %v558_v42, %v15918_v33  ;;  %vm19089_vm0 = vcmp.lt.s32.totalorder %v15049_v34, 64  ;;  %19095 = vst [vmem:[#allocation136_spill] sm:$0xff] %v15990_v13 }
  0xed   :  { %13058 = vmatpush1.bf16.xpose.msra.mxu0 %v15886_v21  ;;  %v19077_v55 = vsel %vm15925_vm2, 4294967295, %v19076_v55  ;;  %v18475_v22 = vunpack.i.h.bf16 %v15920_v37  ;;  %19086 = vst [vmem:[#allocation131_spill] sm:$0xff] %v15944_v5  ;;  %v14632_v52 = vunpack.i.l.bf16 %v15920_v37  ;;  %vm19092_vm4 = vmmov %vm19089_vm0 }
  0xee   :  { %13060 = vmatprep.subr.bf16.mxu0 %v15893_v0  ;;  %19078 = vst [vmem:[#allocation127_spill] sm:$0xff] %v19077_v55  ;;  %v15977_v47 = vsel %vm19092_vm4, %v19091_v3, %v14627_v63  ;;  %v15997_v3 = vadd.s32 2432, %v15049_v34  ;;  %v16017_v55 = vpop.permute.xlu0 %14635 }
  0xef   :  { %v15971_v29 = vsel %vm19089_vm0, %v14632_v52, %v18475_v22  ;;  %19093 = vst [vmem:[#allocation134_spill] sm:$0xff] %v15977_v47  ;;  %v15987_v22 = vpack.c.bf16 %v138_v28, %v106_v7  ;;  %v44_v7 = vld [vmem:[%s18322_s1 + $0x90] sm:$0xff]  ;;  %v18498_v61 = vunpack.i.h.bf16 %v16017_v55  ;;  %6737 = vrot.lane.b32.xlu0 %v14796_v23, %s14702_s0 }
  0xf0   :  { %19090 = vst [vmem:[#allocation133_spill] sm:$0xff] %v15971_v29  ;;  %19097 = vst [vmem:[#allocation138_spill] sm:$0xff] %v15997_v3  ;;  %v76_v28 = vld [vmem:[%s18322_s1 + $0x190] sm:$0xff]  ;;  %6739 = vrot.lane.b32.xlu1 %v14807_v26, %s14702_s0 }
  0xf1   :  { %13186 = vmatpush1.bf16.xpose.msra.mxu1 %v15886_v21  ;;  %19094 = vst [vmem:[#allocation135_spill] sm:$0xff] %v15987_v22  ;;  %v19105_v21 = vmov 0 }
  0xf2   :  { %13188 = vmatprep.subr.bf16.mxu1 %v15893_v0  ;;  %v19104_v0 = vand.u32 63, %v15997_v3 }
  0xf3   :  { %6735 = vrot.lane.b32.xlu0 %v14773_v18, %s14702_s0 }
  0xf4   :  { %12794 = vmatmul.mubr.msk.f32.vlgmr.msra.gmra.mrb[0].mxu0 %vm15925_vm2, %v15950_v44  ;;  %v77_v44 = vld [vmem:[%s18322_s1 + $0x198] sm:$0xff]  ;;  %vm16034_vm4 = vcmp.ge.s32.totalorder %v19104_v0, 1  ;;  %v108_v0 = vld [vmem:[%s18322_s1 + $0x290] sm:$0xff]  ;;  %6741 = vrot.lane.b32.xlu1 %v14829_v31, %s14702_s0 }
  0xf5   :  { %13062 = vmatpush1.bf16.xpose.msra.mxu0 %v15929_v39  ;;  %12795 = vmatprep.mubr.msk.f32.mxu0 %vm15937_vm5, %v15944_v5  ;;  %v45_v5 = vld [vmem:[%s18322_s1 + $0x98] sm:$0xff]  ;;  %v19106_v21 = vsel %vm16034_vm4, 4294967295, %v19105_v21  ;;  %vm19108_vm5 = vcmp.lt.s32.totalorder %v15049_v34, 65 }
  0xf6   :  { %13064 = vmatprep.subr.bf16.mxu0 %v15933_v60  ;;  %v15994_v63 = vpack.c.bf16 %v77_v44, %v45_v5  ;;  %v109_v44 = vld [vmem:[%s18322_s1 + $0x298] sm:$0xff]  ;;  %v16026_v5 = vpack.c.bf16 %v76_v28, %v44_v7  ;;  %19107 = vst [vmem:[#allocation142_spill] sm:$0xff] %v19106_v21  ;;  %vm19110_vm2 = vmmov %vm19108_vm5  ;;  %v14637_v28 = vunpack.i.l.bf16 %v16017_v55 }
  0xf7   :  { %v16046_v7 = vsel %vm19110_vm2, %v15808_v45, %v558_v42  ;;  %v140_v45 = vld [vmem:[%s18322_s1 + $0x390] sm:$0x3f]  ;;  %vm19112_vm2 = vcmp.lt.s32.totalorder %v15049_v34, 64  ;;  %6743 = vrot.lane.b32.xlu0 %v14832_v32, %s14702_s0 }
  0xf8   :  { %2496 = vmatmul.mubr.f32.vlgmr.msra.gmra.mrb[0].mxu1 %v15977_v47  ;;  %19096 = vst [vmem:[#allocation137_spill] sm:$0xff] %v15994_v63  ;;  %v141_v47 = vld [vmem:[%s18322_s1 + $0x398] sm:$0x3f]  ;;  %19102 = vst [vmem:[#allocation140_spill] sm:$0xff] %v16026_v5  ;;  %v16067_v42 = vsel %vm19112_vm2, %v14637_v28, %v18498_v61  ;;  %v16083_v61 = vpack.c.bf16 %v140_v45, %v108_v0  ;;  %v46_v0 = vld [vmem:[%s18322_s1 + $0xa0] sm:$0xff]  ;;  %6745 = vrot.lane.b32.xlu1 %v14846_v35, %s14702_s0 }
  0xf9   :  { %13190 = vmatpush1.bf16.xpose.msra.mxu1 %v15929_v39  ;;  %2565 = vmatprep.mubr.f32.mxu1 %v15971_v29  ;;  %v16015_v29 = vpop.permute.xlu1 %563  ;;  %v19099_v39 = vmov 0  ;;  %v16030_v50 = vpack.c.bf16 %v141_v47, %v109_v44  ;;  %19111 = vst [vmem:[#allocation144_spill] sm:$0xff] %v16046_v7  ;;  %19113 = vst [vmem:[#allocation145_spill] sm:$0xff] %v16067_v42  ;;  %v19114_v47 = vunpack.i.h.bf16 %v15810_v20  ;;  %v16086_v20 = vadd.s32 2304, %v15049_v34  ;;  %v78_v45 = vld [vmem:[%s18322_s1 + $0x1a0] sm:$0xff] }
  0xfa   :  { %13192 = vmatprep.subr.bf16.mxu1 %v15933_v60  ;;  %v19098_v60 = vand.u32 63, %v15990_v13  ;;  %19117 = vst [vmem:[#allocation147_spill] sm:$0xff] %v16083_v61 }
  0xfb   :  { %19103 = vst [vmem:[#allocation141_spill] sm:$0xff] %v16030_v50  ;;  %19118 = vst [vmem:[#allocation148_spill] sm:$0xff] %v16086_v20  ;;  %6747 = vrot.lane.b32.xlu0 %v14854_v38, %s14702_s0 }
  0xfc   :  { %vm16022_vm0 = vcmp.ge.s32.totalorder %v19098_v60, 1  ;;  %v16041_v60 = vsel %vm19108_vm5, %v562_v6, %v16015_v29  ;;  %vm19115_vm5 = vmmov %vm19112_vm2  ;;  %6749 = vrot.lane.b32.xlu1 %v14864_v40, %s14702_s0 }
  0xfd   :  { %13066 = vmatpush1.bf16.xpose.msra.mxu0 %v15987_v22  ;;  %v19100_v39 = vsel %vm16022_vm0, 4294967295, %v19099_v39  ;;  %19109 = vst [vmem:[#allocation143_spill] sm:$0xff] %v16041_v60  ;;  %v16073_v44 = vsel %vm19115_vm5, %v19114_v47, %v14632_v52  ;;  %v16093_v47 = vadd.s32 2688, %v15049_v34  ;;  %v566_v21 = vpop.permute.xlu1 %565 }
  0xfe   :  { %13068 = vmatprep.subr.bf16.mxu0 %v15994_v63  ;;  %19101 = vst [vmem:[#allocation139_spill] sm:$0xff] %v19100_v39  ;;  %19116 = vst [vmem:[#allocation146_spill] sm:$0xff] %v16073_v44 }
  0xff   :  { %19120 = vst [vmem:[#allocation150_spill] sm:$0xff] %v16093_v47  ;;  %6751 = vrot.lane.b32.xlu0 %v14867_v41, %s14702_s0 }
 0x100   :  { %6753 = vrot.lane.b32.xlu1 %v14877_v43, %s14702_s0  ;;  %v19324_v43 = vld [vmem:[#allocation76_spill] sm:$0xff] }
 0x101   :  { %13194 = vmatpush1.bf16.xpose.msra.mxu1 %v15987_v22  ;;  %v16113_v39 = vpop.permute.xlu1 %14640  ;;  %v19128_v22 = vmov 0 }
 0x102   :  { %13196 = vmatprep.subr.bf16.mxu1 %v15994_v63  ;;  %v18521_v3 = vunpack.i.h.bf16 %v16113_v39  ;;  %v19127_v63 = vand.u32 63, %v16093_v47 }
 0x103   :  { %6755 = vrot.lane.b32.xlu0 %v14885_v46, %s14702_s0  ;;  %v19322_v46 = vld [vmem:[#allocation75_spill] sm:$0xff] }
 0x104   :  { %12796 = vmatmul.mubr.msk.f32.vlgmr.msra.gmra.mrb[0].mxu0 %vm16022_vm0, %v16046_v7  ;;  %v79_v7 = vld [vmem:[%s18322_s1 + $0x1a8] sm:$0xff]  ;;  %vm16130_vm5 = vcmp.ge.s32.totalorder %v19127_v63, 1  ;;  %v110_v63 = vld [vmem:[%s18322_s1 + $0x2a0] sm:$0xff]  ;;  %6757 = vrot.lane.b32.xlu1 %v14895_v48, %s14702_s0 }
 0x105   :  { %13070 = vmatpush1.bf16.xpose.msra.mxu0 %v16026_v5  ;;  %12797 = vmatprep.mubr.msk.f32.mxu0 %vm16034_vm4, %v16041_v60  ;;  %v47_v60 = vld [vmem:[%s18322_s1 + $0xa8] sm:$0xff]  ;;  %v19129_v22 = vsel %vm16130_vm5, 4294967295, %v19128_v22  ;;  %vm19131_vm4 = vcmp.lt.s32.totalorder %v15049_v34, 65 }
 0x106   :  { %13072 = vmatprep.subr.bf16.mxu0 %v16030_v50  ;;  %v16090_v52 = vpack.c.bf16 %v79_v7, %v47_v60  ;;  %v111_v7 = vld [vmem:[%s18322_s1 + $0x2a8] sm:$0xff]  ;;  %v16122_v60 = vpack.c.bf16 %v78_v45, %v46_v0  ;;  %19130 = vst [vmem:[#allocation154_spill] sm:$0xff] %v19129_v22  ;;  %vm19133_vm0 = vmmov %vm19131_vm4  ;;  %v14642_v45 = vunpack.i.l.bf16 %v16113_v39 }
 0x107   :  { %v16142_v0 = vsel %vm19133_vm0, %v15918_v33, %v562_v6  ;;  %v142_v33 = vld [vmem:[%s18322_s1 + $0x3a0] sm:$0x3f]  ;;  %vm19135_vm0 = vcmp.lt.s32.totalorder %v15049_v34, 64  ;;  %6759 = vrot.lane.b32.xlu0 %v14898_v49, %s14702_s0 }
 0x108   :  { %2566 = vmatmul.mubr.f32.vlgmr.msra.gmra.mrb[0].mxu1 %v16073_v44  ;;  %19119 = vst [vmem:[#allocation149_spill] sm:$0xff] %v16090_v52  ;;  %v143_v44 = vld [vmem:[%s18322_s1 + $0x3a8] sm:$0x3f]  ;;  %19125 = vst [vmem:[#allocation152_spill] sm:$0xff] %v16122_v60  ;;  %v16163_v6 = vsel %vm19135_vm0, %v14642_v45, %v18521_v3  ;;  %v16179_v3 = vpack.c.bf16 %v142_v33, %v110_v63  ;;  %v48_v63 = vld [vmem:[%s18322_s1 + $0xb0] sm:$0xff]  ;;  %6761 = vrot.lane.b32.xlu1 %v14908_v51, %s14702_s0 }
 0x109   :  { %13198 = vmatpush1.bf16.xpose.msra.mxu1 %v16026_v5  ;;  %2635 = vmatprep.mubr.f32.mxu1 %v16067_v42  ;;  %v16111_v42 = vpop.permute.xlu0 %567  ;;  %v19122_v5 = vmov 0  ;;  %v16126_v13 = vpack.c.bf16 %v143_v44, %v111_v7  ;;  %19134 = vst [vmem:[#allocation156_spill] sm:$0xff] %v16142_v0  ;;  %19136 = vst [vmem:[#allocation157_spill] sm:$0xff] %v16163_v6  ;;  %v19137_v44 = vunpack.i.h.bf16 %v15920_v37  ;;  %v16182_v37 = vadd.s32 2560, %v15049_v34  ;;  %v80_v33 = vld [vmem:[%s18322_s1 + $0x1b0] sm:$0xff]  ;;  %v19316_v51 = vld [vmem:[#allocation68_spill] sm:$0xff] }
 0x10a   :  { %13200 = vmatprep.subr.bf16.mxu1 %v16030_v50  ;;  %v19121_v50 = vand.u32 63, %v16086_v20  ;;  %19140 = vst [vmem:[#allocation159_spill] sm:$0xff] %v16179_v3 }
 0x10b   :  { %19126 = vst [vmem:[#allocation153_spill] sm:$0xff] %v16126_v13  ;;  %19141 = vst [vmem:[#allocation160_spill] sm:$0xff] %v16182_v37  ;;  %6763 = vrot.lane.b32.xlu0 %v14916_v54, %s14702_s0 }
 0x10c   :  { %vm16118_vm2 = vcmp.ge.s32.totalorder %v19121_v50, 1  ;;  %v16137_v50 = vsel %vm19131_vm4, %v566_v21, %v16111_v42  ;;  %vm19138_vm4 = vmmov %vm19135_vm0  ;;  %6765 = vrot.lane.b32.xlu1 %v14926_v56, %s14702_s0 }
 0x10d   :  { %13074 = vmatpush1.bf16.xpose.msra.mxu0 %v16083_v61  ;;  %v19123_v5 = vsel %vm16118_vm2, 4294967295, %v19122_v5  ;;  %19132 = vst [vmem:[#allocation155_spill] sm:$0xff] %v16137_v50  ;;  %v16169_v7 = vsel %vm19138_vm4, %v19137_v44, %v14637_v28  ;;  %v16189_v44 = vadd.s32 2944, %v15049_v34  ;;  %v570_v22 = vpop.permute.xlu0 %569 }
 0x10e   :  { %13076 = vmatprep.subr.bf16.mxu0 %v16090_v52  ;;  %19124 = vst [vmem:[#allocation151_spill] sm:$0xff] %v19123_v5  ;;  %19139 = vst [vmem:[#allocation158_spill] sm:$0xff] %v16169_v7 }
 0x10f   :  { %19143 = vst [vmem:[#allocation162_spill] sm:$0xff] %v16189_v44  ;;  %6767 = vrot.lane.b32.xlu0 %v14929_v57, %s14702_s0 }
 0x110   :  { %6769 = vrot.lane.b32.xlu1 %v14939_v59, %s14702_s0 }
 0x111   :  { %13202 = vmatpush1.bf16.xpose.msra.mxu1 %v16083_v61  ;;  %v16209_v5 = vpop.permute.xlu0 %14645  ;;  %v19151_v61 = vmov 0 }
 0x112   :  { %13204 = vmatprep.subr.bf16.mxu1 %v16090_v52  ;;  %v18544_v47 = vunpack.i.h.bf16 %v16209_v5  ;;  %v19150_v52 = vand.u32 63, %v16189_v44 }
 0x113   :  { %6771 = vrot.lane.b32.xlu0 %v14947_v62, %s14702_s0 }
 0x114   :  { %12798 = vmatmul.mubr.msk.f32.vlgmr.msra.gmra.mrb[0].mxu0 %vm16118_vm2, %v16142_v0  ;;  %v81_v0 = vld [vmem:[%s18322_s1 + $0x1b8] sm:$0xff]  ;;  %vm16226_vm4 = vcmp.ge.s32.totalorder %v19150_v52, 1  ;;  %v112_v52 = vld [vmem:[%s18322_s1 + $0x2b0] sm:$0xff]  ;;  %6773 = vrot.lane.b32.xlu1 %v14957_v1, %s14702_s0  ;;  %v19267_v1 = vmov 0 }
 0x115   :  { %13078 = vmatpush1.bf16.xpose.msra.mxu0 %v16122_v60  ;;  %12799 = vmatprep.mubr.msk.f32.mxu0 %vm16130_vm5, %v16137_v50  ;;  %v49_v50 = vld [vmem:[%s18322_s1 + $0xb8] sm:$0xff]  ;;  %v19152_v61 = vsel %vm16226_vm4, 4294967295, %v19151_v61  ;;  %vm19154_vm5 = vcmp.lt.s32.totalorder %v15049_v34, 65 }
 0x116   :  { %13080 = vmatprep.subr.bf16.mxu0 %v16126_v13  ;;  %v16186_v28 = vpack.c.bf16 %v81_v0, %v49_v50  ;;  %v113_v0 = vld [vmem:[%s18322_s1 + $0x2b8] sm:$0xff]  ;;  %v16218_v50 = vpack.c.bf16 %v80_v33, %v48_v63  ;;  %19153 = vst [vmem:[#allocation166_spill] sm:$0xff] %v19152_v61  ;;  %vm19156_vm2 = vmmov %vm19154_vm5  ;;  %v14647_v33 = vunpack.i.l.bf16 %v16209_v5 }
 0x117   :  { %v16238_v63 = vsel %vm19156_vm2, %v16015_v29, %v566_v21  ;;  %v144_v21 = vld [vmem:[%s18322_s1 + $0x3b0] sm:$0x3f]  ;;  %vm19158_vm2 = vcmp.lt.s32.totalorder %v15049_v34, 64  ;;  %6775 = vrot.lane.b32.xlu0 %v14960_v2, %s14702_s0  ;;  %v19288_v2 = vmov 0 }
 0x118   :  { %2636 = vmatmul.mubr.f32.vlgmr.msra.gmra.mrb[0].mxu1 %v16169_v7  ;;  %19142 = vst [vmem:[#allocation161_spill] sm:$0xff] %v16186_v28  ;;  %v145_v7 = vld [vmem:[%s18322_s1 + $0x3b8] sm:$0x3f]  ;;  %19148 = vst [vmem:[#allocation164_spill] sm:$0xff] %v16218_v50  ;;  %v16259_v29 = vsel %vm19158_vm2, %v14647_v33, %v18544_v47  ;;  %v16275_v47 = vpack.c.bf16 %v144_v21, %v112_v52  ;;  %v50_v52 = vld [vmem:[%s18322_s1 + $0xc0] sm:$0xff] }
 0x119   :  { %13206 = vmatpush1.bf16.xpose.msra.mxu1 %v16122_v60  ;;  %2705 = vmatprep.mubr.f32.mxu1 %v16163_v6  ;;  %v16207_v6 = vpop.permute.xlu1 %571  ;;  %v19145_v60 = vmov 0  ;;  %v16222_v20 = vpack.c.bf16 %v145_v7, %v113_v0  ;;  %19157 = vst [vmem:[#allocation168_spill] sm:$0xff] %v16238_v63  ;;  %19159 = vst [vmem:[#allocation169_spill] sm:$0xff] %v16259_v29  ;;  %v19160_v7 = vunpack.i.h.bf16 %v16017_v55  ;;  %v16278_v55 = vadd.s32 2816, %v15049_v34  ;;  %v82_v21 = vld [vmem:[%s18322_s1 + $0x1c0] sm:$0xff] }
 0x11a   :  { %13208 = vmatprep.subr.bf16.mxu1 %v16126_v13  ;;  %v19144_v13 = vand.u32 63, %v16182_v37  ;;  %19163 = vst [vmem:[#allocation171_spill] sm:$0xff] %v16275_v47  ;;  %6777 = vrot.lane.b32.xlu1 %v14970_v4, %s14702_s0  ;;  %v19274_v4 = vld [vmem:[#allocation45_spill] sm:$0xff] }
 0x11b   :  { %19149 = vst [vmem:[#allocation165_spill] sm:$0xff] %v16222_v20  ;;  %19164 = vst [vmem:[#allocation172_spill] sm:$0xff] %v16278_v55  ;;  %6779 = vrot.lane.b32.xlu0 %v14978_v8, %s14702_s0 }
 0x11c   :  { %vm16214_vm0 = vcmp.ge.s32.totalorder %v19144_v13, 1  ;;  %v16233_v13 = vsel %vm19154_vm5, %v570_v22, %v16207_v6  ;;  %vm19161_vm5 = vmmov %vm19158_vm2 }
 0x11d   :  { %13082 = vmatpush1.bf16.xpose.msra.mxu0 %v16179_v3  ;;  %v19146_v60 = vsel %vm16214_vm0, 4294967295, %v19145_v60  ;;  %19155 = vst [vmem:[#allocation167_spill] sm:$0xff] %v16233_v13  ;;  %v16265_v0 = vsel %vm19161_vm5, %v19160_v7, %v14642_v45  ;;  %v16285_v7 = vadd.s32 3200, %v15049_v34  ;;  %v574_v61 = vpop.permute.xlu1 %573 }
 0x11e   :  { %13084 = vmatprep.subr.bf16.mxu0 %v16186_v28  ;;  %19147 = vst [vmem:[#allocation163_spill] sm:$0xff] %v19146_v60  ;;  %19162 = vst [vmem:[#allocation170_spill] sm:$0xff] %v16265_v0  ;;  %6781 = vrot.lane.b32.xlu1 %v14988_v10, %s14702_s0  ;;  %v19279_v10 = vld [vmem:[#allocation52_spill] sm:$0xff] }
 0x11f   :  { %19166 = vst [vmem:[#allocation174_spill] sm:$0xff] %v16285_v7 }
 0x121   :  { %13210 = vmatpush1.bf16.xpose.msra.mxu1 %v16179_v3  ;;  %v16305_v60 = vpop.permute.xlu1 %14650  ;;  %v19174_v3 = vmov 0 }
 0x122   :  { %13212 = vmatprep.subr.bf16.mxu1 %v16186_v28  ;;  %v18567_v44 = vunpack.i.h.bf16 %v16305_v60  ;;  %v19173_v28 = vand.u32 63, %v16285_v7  ;;  %6785 = vrot.lane.b32.xlu1 %v15001_v14, %s14702_s0  ;;  %v19282_v14 = vmov 0 }
 0x124   :  { %12800 = vmatmul.mubr.msk.f32.vlgmr.msra.gmra.mrb[0].mxu0 %vm16214_vm0, %v16238_v63  ;;  %v83_v63 = vld [vmem:[%s18322_s1 + $0x1c8] sm:$0xff]  ;;  %vm16322_vm5 = vcmp.ge.s32.totalorder %v19173_v28, 1  ;;  %v114_v28 = vld [vmem:[%s18322_s1 + $0x2c0] sm:$0xff] }
 0x125   :  { %13086 = vmatpush1.bf16.xpose.msra.mxu0 %v16218_v50  ;;  %12801 = vmatprep.mubr.msk.f32.mxu0 %vm16226_vm4, %v16233_v13  ;;  %v51_v13 = vld [vmem:[%s18322_s1 + $0xc8] sm:$0xff]  ;;  %v19175_v3 = vsel %vm16322_vm5, 4294967295, %v19174_v3  ;;  %vm19177_vm4 = vcmp.lt.s32.totalorder %v15049_v34, 65 }
 0x126   :  { %13088 = vmatprep.subr.bf16.mxu0 %v16222_v20  ;;  %v16282_v45 = vpack.c.bf16 %v83_v63, %v51_v13  ;;  %v115_v63 = vld [vmem:[%s18322_s1 + $0x2c8] sm:$0xff]  ;;  %v16314_v13 = vpack.c.bf16 %v82_v21, %v50_v52  ;;  %19176 = vst [vmem:[#allocation178_spill] sm:$0xff] %v19175_v3  ;;  %vm19179_vm0 = vmmov %vm19177_vm4  ;;  %v14652_v21 = vunpack.i.l.bf16 %v16305_v60 }
 0x127   :  { %v16334_v52 = vsel %vm19179_vm0, %v16111_v42, %v570_v22  ;;  %v146_v22 = vld [vmem:[%s18322_s1 + $0x3c0] sm:$0x3f]  ;;  %vm19181_vm0 = vcmp.lt.s32.totalorder %v15049_v34, 64 }
 0x128   :  { %2706 = vmatmul.mubr.f32.vlgmr.msra.gmra.mrb[0].mxu1 %v16265_v0  ;;  %19165 = vst [vmem:[#allocation173_spill] sm:$0xff] %v16282_v45  ;;  %v147_v0 = vld [vmem:[%s18322_s1 + $0x3c8] sm:$0x3f]  ;;  %19171 = vst [vmem:[#allocation176_spill] sm:$0xff] %v16314_v13  ;;  %v16355_v42 = vsel %vm19181_vm0, %v14652_v21, %v18567_v44  ;;  %v16371_v44 = vpack.c.bf16 %v146_v22, %v114_v28  ;;  %v52_v28 = vld [vmem:[%s18322_s1 + $0xd0] sm:$0xff] }
 0x129   :  { %13214 = vmatpush1.bf16.xpose.msra.mxu1 %v16218_v50  ;;  %2775 = vmatprep.mubr.f32.mxu1 %v16259_v29  ;;  %v16303_v29 = vpop.permute.xlu0 %575  ;;  %v19168_v50 = vmov 0  ;;  %v16318_v37 = vpack.c.bf16 %v147_v0, %v115_v63  ;;  %19180 = vst [vmem:[#allocation180_spill] sm:$0xff] %v16334_v52  ;;  %19182 = vst [vmem:[#allocation181_spill] sm:$0xff] %v16355_v42  ;;  %v19183_v0 = vunpack.i.h.bf16 %v16113_v39  ;;  %v16374_v39 = vadd.s32 3072, %v15049_v34  ;;  %v84_v22 = vld [vmem:[%s18322_s1 + $0x1d0] sm:$0xff] }
 0x12a   :  { %13216 = vmatprep.subr.bf16.mxu1 %v16222_v20  ;;  %v19167_v20 = vand.u32 63, %v16278_v55  ;;  %19186 = vst [vmem:[#allocation183_spill] sm:$0xff] %v16371_v44  ;;  %6783 = vrot.lane.b32.xlu0 %v14991_v12, %s14702_s0 }
 0x12b   :  { %19172 = vst [vmem:[#allocation177_spill] sm:$0xff] %v16318_v37  ;;  %19187 = vst [vmem:[#allocation184_spill] sm:$0xff] %v16374_v39 }
 0x12c   :  { %vm16310_vm2 = vcmp.ge.s32.totalorder %v19167_v20, 1  ;;  %v16329_v20 = vsel %vm19177_vm4, %v574_v61, %v16303_v29  ;;  %vm19184_vm4 = vmmov %vm19181_vm0 }
 0x12d   :  { %13090 = vmatpush1.bf16.xpose.msra.mxu0 %v16275_v47  ;;  %v19169_v50 = vsel %vm16310_vm2, 4294967295, %v19168_v50  ;;  %19178 = vst [vmem:[#allocation179_spill] sm:$0xff] %v16329_v20  ;;  %v16361_v63 = vsel %vm19184_vm4, %v19183_v0, %v14647_v33  ;;  %v16381_v0 = vadd.s32 3456, %v15049_v34  ;;  %v578_v3 = vpop.permute.xlu0 %577 }
 0x12e   :  { %13092 = vmatprep.subr.bf16.mxu0 %v16282_v45  ;;  %19170 = vst [vmem:[#allocation175_spill] sm:$0xff] %v19169_v50  ;;  %19185 = vst [vmem:[#allocation182_spill] sm:$0xff] %v16361_v63  ;;  %6787 = vrot.lane.b32.xlu0 %v15009_v24, %s14702_s0  ;;  %v19300_v24 = vld [vmem:[#allocation63_spill] sm:$0xff] }
 0x12f   :  { %19189 = vst [vmem:[#allocation186_spill] sm:$0xff] %v16381_v0 }
 0x131   :  { %13218 = vmatpush1.bf16.xpose.msra.mxu1 %v16275_v47  ;;  %v16401_v50 = vpop.permute.xlu0 %14655  ;;  %v19197_v47 = vmov 0 }
 0x132   :  { %13220 = vmatprep.subr.bf16.mxu1 %v16282_v45  ;;  %v18590_v7 = vunpack.i.h.bf16 %v16401_v50  ;;  %v19196_v45 = vand.u32 63, %v16381_v0  ;;  %6791 = vrot.lane.b32.xlu0 %v14819_v30, %s14702_s0  ;;  %v19304_v30 = vmov 0 }
 0x134   :  { %12802 = vmatmul.mubr.msk.f32.vlgmr.msra.gmra.mrb[0].mxu0 %vm16310_vm2, %v16334_v52  ;;  %v85_v52 = vld [vmem:[%s18322_s1 + $0x1d8] sm:$0xff]  ;;  %vm16418_vm4 = vcmp.ge.s32.totalorder %v19196_v45, 1  ;;  %v116_v45 = vld [vmem:[%s18322_s1 + $0x2d0] sm:$0xff] }
 0x135   :  { %13094 = vmatpush1.bf16.xpose.msra.mxu0 %v16314_v13  ;;  %12803 = vmatprep.mubr.msk.f32.mxu0 %vm16322_vm5, %v16329_v20  ;;  %v53_v20 = vld [vmem:[%s18322_s1 + $0xd8] sm:$0xff]  ;;  %v19198_v47 = vsel %vm16418_vm4, 4294967295, %v19197_v47  ;;  %vm19200_vm5 = vcmp.lt.s32.totalorder %v15049_v34, 65 }
 0x136   :  { %13096 = vmatprep.subr.bf16.mxu0 %v16318_v37  ;;  %v16378_v33 = vpack.c.bf16 %v85_v52, %v53_v20  ;;  %v117_v52 = vld [vmem:[%s18322_s1 + $0x2d8] sm:$0xff]  ;;  %v16410_v20 = vpack.c.bf16 %v84_v22, %v52_v28  ;;  %19199 = vst [vmem:[#allocation190_spill] sm:$0xff] %v19198_v47  ;;  %vm19202_vm2 = vmmov %vm19200_vm5  ;;  %v14657_v22 = vunpack.i.l.bf16 %v16401_v50 }
 0x137   :  { %v16430_v28 = vsel %vm19202_vm2, %v16207_v6, %v574_v61  ;;  %v148_v61 = vld [vmem:[%s18322_s1 + $0x3d0] sm:$0x3f]  ;;  %vm19204_vm2 = vcmp.lt.s32.totalorder %v15049_v34, 64 }
 0x138   :  { %2776 = vmatmul.mubr.f32.vlgmr.msra.gmra.mrb[0].mxu1 %v16361_v63  ;;  %19188 = vst [vmem:[#allocation185_spill] sm:$0xff] %v16378_v33  ;;  %v149_v63 = vld [vmem:[%s18322_s1 + $0x3d8] sm:$0x3f]  ;;  %19194 = vst [vmem:[#allocation188_spill] sm:$0xff] %v16410_v20  ;;  %v16451_v6 = vsel %vm19204_vm2, %v14657_v22, %v18590_v7  ;;  %v16467_v7 = vpack.c.bf16 %v148_v61, %v116_v45  ;;  %v54_v45 = vld [vmem:[%s18322_s1 + $0xe0] sm:$0xff] }
 0x139   :  { %13222 = vmatpush1.bf16.xpose.msra.mxu1 %v16314_v13  ;;  %2845 = vmatprep.mubr.f32.mxu1 %v16355_v42  ;;  %v16399_v42 = vpop.permute.xlu1 %579  ;;  %v19191_v13 = vmov 0  ;;  %v16414_v55 = vpack.c.bf16 %v149_v63, %v117_v52  ;;  %19203 = vst [vmem:[#allocation192_spill] sm:$0xff] %v16430_v28  ;;  %19205 = vst [vmem:[#allocation193_spill] sm:$0xff] %v16451_v6  ;;  %v19206_v63 = vunpack.i.h.bf16 %v16209_v5  ;;  %v16470_v5 = vadd.s32 3328, %v15049_v34  ;;  %v86_v61 = vld [vmem:[%s18322_s1 + $0x1e0] sm:$0xff] }
 0x13a   :  { %13224 = vmatprep.subr.bf16.mxu1 %v16318_v37  ;;  %v19190_v37 = vand.u32 63, %v16374_v39  ;;  %6789 = vrot.lane.b32.xlu1 %v15016_v27, %s14702_s0  ;;  %v19286_v27 = vld [vmem:[#allocation53_spill] sm:$0xff] }
 0x13b   :  { %19195 = vst [vmem:[#allocation189_spill] sm:$0xff] %v16414_v55  ;;  %v19287_v8 = vand.u32 63, %v19286_v27 }
 0x13c   :  { %vm16406_vm0 = vcmp.ge.s32.totalorder %v19190_v37, 1  ;;  %v16425_v37 = vsel %vm19200_vm5, %v578_v3, %v16399_v42  ;;  %vm19207_vm5 = vmmov %vm19204_vm2 }
 0x13d   :  { %13098 = vmatpush1.bf16.xpose.msra.mxu0 %v16371_v44  ;;  %v19192_v13 = vsel %vm16406_vm0, 4294967295, %v19191_v13  ;;  %19201 = vst [vmem:[#allocation191_spill] sm:$0xff] %v16425_v37  ;;  %v16457_v52 = vsel %vm19207_vm5, %v19206_v63, %v14652_v21  ;;  %v16477_v63 = vadd.s32 3712, %v15049_v34  ;;  %v582_v47 = vpop.permute.xlu1 %581  ;;  %v19558_v40 = vld [vmem:[#allocation190_spill] sm:$0xff] }
 0x13e   :  { %13100 = vmatprep.subr.bf16.mxu0 %v16378_v33  ;;  %19193 = vst [vmem:[#allocation187_spill] sm:$0xff] %v19192_v13  ;;  %19208 = vst [vmem:[#allocation194_spill] sm:$0xff] %v16457_v52  ;;  %6793 = vrot.lane.b32.xlu1 %v15026_v15, %s14702_s0 }
 0x141   :  { %13226 = vmatpush1.bf16.xpose.msra.mxu1 %v16371_v44  ;;  %v16497_v13 = vpop.permute.xlu1 %14660  ;;  %v19214_v44 = vmov 0 }
 0x142   :  { %13228 = vmatprep.subr.bf16.mxu1 %v16378_v33  ;;  %v18613_v0 = vunpack.i.h.bf16 %v16497_v13  ;;  %v19213_v33 = vand.u32 63, %v16477_v63 }
 0x144   :  { %12804 = vmatmul.mubr.msk.f32.vlgmr.msra.gmra.mrb[0].mxu0 %vm16406_vm0, %v16430_v28  ;;  %v87_v28 = vld [vmem:[%s18322_s1 + $0x1e8] sm:$0xff]  ;;  %vm16514_vm5 = vcmp.ge.s32.totalorder %v19213_v33, 1  ;;  %v118_v33 = vld [vmem:[%s18322_s1 + $0x2e0] sm:$0xff] }
 0x145   :  { %13102 = vmatpush1.bf16.xpose.msra.mxu0 %v16410_v20  ;;  %12805 = vmatprep.mubr.msk.f32.mxu0 %vm16418_vm4, %v16425_v37  ;;  %v55_v37 = vld [vmem:[%s18322_s1 + $0xe8] sm:$0xff]  ;;  %v19215_v44 = vsel %vm16514_vm5, 4294967295, %v19214_v44  ;;  %vm19217_vm4 = vcmp.lt.s32.totalorder %v15049_v34, 65 }
 0x146   :  { %13104 = vmatprep.subr.bf16.mxu0 %v16414_v55  ;;  %v16474_v21 = vpack.c.bf16 %v87_v28, %v55_v37  ;;  %v119_v28 = vld [vmem:[%s18322_s1 + $0x2e8] sm:$0xff]  ;;  %v16506_v37 = vpack.c.bf16 %v86_v61, %v54_v45  ;;  %19216 = vst [vmem:[#allocation196_spill] sm:$0xff] %v19215_v44  ;;  %vm19219_vm0 = vmmov %vm19217_vm4  ;;  %v14662_v61 = vunpack.i.l.bf16 %v16497_v13  ;;  %v19232_v44 = vmov 0 }
 0x147   :  { %v16526_v45 = vsel %vm19219_vm0, %v16303_v29, %v578_v3  ;;  %v150_v3 = vld [vmem:[%s18322_s1 + $0x3e0] sm:$0x3f]  ;;  %vm19221_vm0 = vcmp.lt.s32.totalorder %v15049_v34, 64 }
 0x148   :  { %2846 = vmatmul.mubr.f32.vlgmr.msra.gmra.mrb[0].mxu1 %v16457_v52  ;;  %v151_v52 = vld [vmem:[%s18322_s1 + $0x3e8] sm:$0x3f]  ;;  %19220 = vst [vmem:[#allocation198_spill] sm:$0xff] %v16526_v45  ;;  %v16547_v29 = vsel %vm19221_vm0, %v14662_v61, %v18613_v0  ;;  %v16563_v0 = vpack.c.bf16 %v150_v3, %v118_v33  ;;  %v153_v33 = vld [vmem:[%s18322_s1 + $0x3f8] sm:$0x3f]  ;;  %v19228_v3 = vmov 0 }
 0x149   :  { %13230 = vmatpush1.bf16.xpose.msra.mxu1 %v16410_v20  ;;  %2915 = vmatprep.mubr.f32.mxu1 %v16451_v6  ;;  %v16495_v6 = vpop.permute.xlu0 %583  ;;  %v19210_v20 = vmov 0  ;;  %v16510_v39 = vpack.c.bf16 %v151_v52, %v119_v28  ;;  %19222 = vst [vmem:[#allocation199_spill] sm:$0xff] %v16547_v29  ;;  %v19223_v52 = vunpack.i.h.bf16 %v16305_v60  ;;  %v16566_v60 = vadd.s32 3584, %v15049_v34 }
 0x14a   :  { %13232 = vmatprep.subr.bf16.mxu1 %v16414_v55  ;;  %v19209_v55 = vand.u32 63, %v16470_v5  ;;  %6795 = vrot.lane.b32.xlu0 %v14776_v19, %s14702_s0  ;;  %v19311_v19 = vmov 0 }
 0x14b   :  { %v19227_v26 = vand.u32 63, %v16566_v60 }
 0x14c   :  { %vm16502_vm2 = vcmp.ge.s32.totalorder %v19209_v55, 1  ;;  %v16521_v55 = vsel %vm19217_vm4, %v582_v47, %v16495_v6  ;;  %vm19224_vm4 = vmmov %vm19221_vm0 }
 0x14d   :  { %13106 = vmatpush1.bf16.xpose.msra.mxu0 %v16467_v7  ;;  %v19211_v20 = vsel %vm16502_vm2, 4294967295, %v19210_v20  ;;  %19218 = vst [vmem:[#allocation197_spill] sm:$0xff] %v16521_v55  ;;  %v16553_v28 = vsel %vm19224_vm4, %v19223_v52, %v14657_v22  ;;  %v16573_v52 = vadd.s32 3968, %v15049_v34  ;;  %vm16602_vm0 = vcmp.ge.s32.totalorder %v19227_v26, 1 }
 0x14e   :  { %13108 = vmatprep.subr.bf16.mxu0 %v16474_v21  ;;  %19212 = vst [vmem:[#allocation195_spill] sm:$0xff] %v19211_v20  ;;  %19225 = vst [vmem:[#allocation200_spill] sm:$0xff] %v16553_v28  ;;  %v19229_v3 = vsel %vm16602_vm0, 4294967295, %v19228_v3 }
 0x14f   :  { %19226 = vst [vmem:[#allocation201_spill] sm:$0xff] %v16573_v52  ;;  %19230 = vst [vmem:[#allocation202_spill] sm:$0xff] %v19229_v3  ;;  %v19231_v23 = vand.u32 63, %v16573_v52 }
 0x151   :  { %13234 = vmatpush1.bf16.xpose.msra.mxu1 %v16467_v7  ;;  %vm16610_vm4 = vcmp.ge.s32.totalorder %v19231_v23, 1 }
 0x152   :  { %13236 = vmatprep.subr.bf16.mxu1 %v16474_v21  ;;  %v19233_v44 = vsel %vm16610_vm4, 4294967295, %v19232_v44 }
 0x153   :  { %19234 = vst [vmem:[#allocation203_spill] sm:$0xff] %v19233_v44 }
 0x154   :  { %12806 = vmatmul.mubr.msk.f32.vlgmr.msra.gmra.mrb[0].mxu0 %vm16502_vm2, %v16526_v45  ;;  %v89_v45 = vld [vmem:[%s18322_s1 + $0x1f8] sm:$0xff] }
 0x155   :  { %13110 = vmatpush1.bf16.xpose.msra.mxu0 %v16506_v37  ;;  %12807 = vmatprep.mubr.msk.f32.mxu0 %vm16514_vm5, %v16521_v55  ;;  %v57_v55 = vld [vmem:[%s18322_s1 + $0xf8] sm:$0xff]  ;;  %vm19235_vm5 = vcmp.lt.s32.totalorder %v15049_v34, 65 }
 0x156   :  { %13112 = vmatprep.subr.bf16.mxu0 %v16510_v39  ;;  %v16570_v22 = vpack.c.bf16 %v89_v45, %v57_v55  ;;  %v56_v55 = vld [vmem:[%s18322_s1 + $0xf0] sm:$0xff]  ;;  %v16622_v26 = vsel %vm19235_vm5, %v16399_v42, %v582_v47  ;;  %vm19237_vm2 = vmmov %vm19235_vm5  ;;  %v19239_v42 = vunpack.i.h.bf16 %v16401_v50 }
 0x157   :  { %v88_v45 = vld [vmem:[%s18322_s1 + $0x1f0] sm:$0xff]  ;;  %19236 = vst [vmem:[#allocation204_spill] sm:$0xff] %v16622_v26 }
 0x158   :  { %2916 = vmatmul.mubr.f32.vlgmr.msra.gmra.mrb[0].mxu1 %v16553_v28  ;;  %v586_v28 = vpop.permute.xlu0 %585  ;;  %v16606_v31 = vpack.c.bf16 %v88_v45, %v56_v55  ;;  %v120_v47 = vld [vmem:[%s18322_s1 + $0x2f0] sm:$0xff] }
 0x159   :  { %13238 = vmatpush1.bf16.xpose.msra.mxu1 %v16506_v37  ;;  %2985 = vmatprep.mubr.f32.mxu1 %v16547_v29  ;;  %v121_v29 = vld [vmem:[%s18322_s1 + $0x2f8] sm:$0xff]  ;;  %v16629_v23 = vsel %vm19237_vm2, %v586_v28, %v15097_v58  ;;  %v152_v58 = vld [vmem:[%s18322_s1 + $0x3f0] sm:$0x3f]  ;;  %vm19240_vm2 = vcmp.lt.s32.totalorder %v15049_v34, 64 }
 0x15a   :  { %13240 = vmatprep.subr.bf16.mxu1 %v16510_v39  ;;  %v16615_v18 = vpack.c.bf16 %v153_v33, %v121_v29  ;;  %19238 = vst [vmem:[#allocation205_spill] sm:$0xff] %v16629_v23  ;;  %v1873_v29 = vpop.permute.xlu1 %1872  ;;  %v16651_v33 = vsel %vm19240_vm2, %v19239_v42, %v14662_v61  ;;  %vm19242_vm5 = vmmov %vm19240_vm2  ;;  %v16663_v50 = vpack.c.bf16 %v152_v58, %v120_v47  ;;  %v16666_v61 = vadd.s32 3840, %v15049_v34 }
 0x15b   :  { %19241 = vst [vmem:[#allocation206_spill] sm:$0xff] %v16651_v33  ;;  %v16659_v55 = vsel %vm19242_vm5, %v1873_v29, %v15130_v9  ;;  %vm18640_vm2 = vcmp.lt.s32.totalorder %v15049_v34, 63  ;;  %v19244_v58 = vmov 0 }
 0x15c   :  { %19243 = vst [vmem:[#allocation207_spill] sm:$0xff] %v16659_v55  ;;  %v3068_v45 = vpop.permute.xlu0 %3067  ;;  %v18633_v42 = vand.u32 63, %v16666_v61 }
 0x15d   :  { %13114 = vmatpush1.bf16.xpose.msra.mxu0 %v16563_v0 }
 0x15e   :  { %13116 = vmatprep.subr.bf16.mxu0 %v16570_v22  ;;  %v16673_v9 = vpop.permute.xlu1 %3069  ;;  %vm16688_vm5 = vcmp.ge.s32.totalorder %v18633_v42, 1 }
 0x15f   :  { %v19245_v58 = vsel %vm16688_vm5, 4294967295, %v19244_v58 }
 0x160   :  { %v16681_v47 = vpop.permute.xlu0 %3129  ;;  %19246 = vst [vmem:[#allocation208_spill] sm:$0xff] %v19245_v58 }
 0x161   :  { %13242 = vmatpush1.bf16.xpose.msra.mxu1 %v16563_v0 }
 0x162   :  { %13244 = vmatprep.subr.bf16.mxu1 %v16570_v22 }
 0x164   :  { %12808 = vmatmul.mubr.msk.f32.vlgmr.msra.gmra.mrb[0].mxu0 %vm16602_vm0, %v16622_v26  ;;  %vm19252_vm0 = vcmp.lt.s32.totalorder %v15049_v34, 65  ;;  %v4355_v26 = vpop.permute.xlu1 %4354 }
 0x165   :  { %13118 = vmatpush1.bf16.xpose.msra.mxu0 %v16606_v31  ;;  %12809 = vmatprep.mubr.msk.f32.mxu0 %vm16610_vm4, %v16629_v23  ;;  %v19248_v23 = vand.u32 63, %v15056_v36  ;;  %v16709_v42 = vsel %vm19252_vm0, %v16495_v6, %v586_v28  ;;  %v16717_v36 = vpop.permute.xlu0 %4356  ;;  %v19254_v28 = vunpack.i.h.bf16 %v16497_v13  ;;  %vm19255_vm0 = vcmp.lt.s32.totalorder %v15049_v34, 64 }
 0x166   :  { %13120 = vmatprep.subr.bf16.mxu0 %v16615_v18  ;;  %19253 = vst [vmem:[#allocation211_spill] sm:$0xff] %v16709_v42  ;;  %v4449_v6 = vsel %vm18639_vm15, %v4355_v26, %v16717_v36  ;;  %v19257_v13 = vand.u32 63, %v15049_v34  ;;  %vm19262_vm15 = vcmp.ge.s32.totalorder %v15049_v34, 64 }
 0x167   :  { %vm16700_vm4 = vcmp.le.s32.totalorder %v19248_v23, 62  ;;  %v16733_v23 = vsel %vm19255_vm0, %v19254_v28, %v1873_v29  ;;  %v19258_v29 = vmov 0  ;;  %v19261_v28 = vld [vmem:[#allocation14_spill] sm:$0xff] }
 0x168   :  { %2986 = vmatmul.mubr.f32.vlgmr.msra.gmra.mrb[0].mxu1 %v16651_v33  ;;  %v19249_v33 = vmov 0  ;;  %19256 = vst [vmem:[#allocation212_spill] sm:$0xff] %v16733_v23  ;;  %vm16751_vm0 = vcmp.le.s32.totalorder %v19257_v13, 62 }
 0x169   :  { %13246 = vmatpush1.bf16.xpose.msra.mxu1 %v16606_v31  ;;  %3055 = vmatprep.mubr.f32.mxu1 %v16659_v55  ;;  %v16695_v55 = vsel %vm18640_vm2, %v3068_v45, %v16673_v9  ;;  %v19250_v33 = vsel %vm16700_vm4, 4294967295, %v19249_v33  ;;  %v19259_v29 = vsel %vm16751_vm0, 4294967295, %v19258_v29  ;;  %vm3164_vm2 = vmand %vm19262_vm15, %vm16751_vm0 }
 0x16a   :  { %13248 = vmatprep.subr.bf16.mxu1 %v16615_v18  ;;  %19247 = vst [vmem:[#allocation209_spill] sm:$0xff] %v16695_v55  ;;  %19251 = vst [vmem:[#allocation210_spill] sm:$0xff] %v19250_v33 }
 0x16b   :  { %19260 = vst [vmem:[#allocation213_spill] sm:$0xff] %v19259_v29  ;;  %v19633_v29 = vld [vmem:[#allocation105_spill] sm:$0xff] }
 0x16d   :  { %13122 = vmatpush1.bf16.xpose.msra.mxu0 %v16663_v50 }
 0x16e   :  { %13252 = vmatprep.subr.bf16.mxu0 %v14752_v11 }
 0x171   :  { %13250 = vmatpush1.bf16.xpose.msra.mxu1 %v16663_v50 }
 0x172   :  { %13380 = vmatprep.subr.bf16.mxu1 %v14752_v11 }
 0x174   :  { %12810 = vmatmul.mubr.msk.f32.vlgmr.msra.gmra.mrb[0].mxu0 %vm16688_vm5, %v16709_v42  ;;  %v19265_v42 = vld [vmem:[#allocation41_spill] sm:$0xff] }
 0x175   :  { %13254 = vmatpush1.bf16.xpose.msra.mxu0 %v14766_v16  ;;  %12812 = vmatprep.mubr.msk.f32.mxu0 %vm16700_vm4, %v16695_v55  ;;  %v16738_v55 = vpop.permute.xlu1 %4416  ;;  %v19266_v53 = vand.u32 63, %v19265_v42  ;;  %v19272_v42 = vld [vmem:[#allocation42_spill] sm:$0xff] }
 0x176   :  { %13256 = vmatprep.subr.bf16.mxu0 %v14770_v17 }
 0x177   :  { %vm16775_vm4 = vcmp.le.s32.totalorder %v19266_v53, 62 }
 0x178   :  { %3056 = vmatmul.mubr.f32.vlgmr.msra.gmra.mrb[0].mxu1 %v16733_v23  ;;  %v19268_v1 = vsel %vm16775_vm4, 4294967295, %v19267_v1 }
 0x179   :  { %13382 = vmatpush1.bf16.xpose.msra.mxu1 %v14766_v16  ;;  %12844 = vmatprep.mubr.msk.f32.mxu1 %vm15090_vm3, %v4449_v6  ;;  %v3072_v6 = vpop.permute.xlu0 %3071  ;;  %v16758_v23 = vpop.permute.xlu1 %3073  ;;  %vm19263_vm3 = vcmp.lt.s32.totalorder %v15049_v34, 63  ;;  %19269 = vst [vmem:[#allocation41_spill] sm:$0xff] %v19268_v1  ;;  %v19632_v1 = vld [vmem:[#allocation22_spill] sm:$0xff] }
 0x17a   :  { %13384 = vmatprep.subr.bf16.mxu1 %v14770_v17  ;;  %v16770_v13 = vsel %vm19263_vm3, %v3072_v6, %v16758_v23  ;;  %vm19270_vm5 = vmmov %vm19263_vm3  ;;  %vm19273_vm3 = vcmp.lt.s32.totalorder %v15049_v34, 1 }
 0x17b   :  { %19264 = vst [vmem:[#allocation14_spill] sm:$0xff] %v16770_v13  ;;  %v16784_v62 = vsel %vm19270_vm5, %v16681_v47, %v3068_v45  ;;  %vm19275_vm15 = vmmov %vm19273_vm3 }
 0x17c   :  { %19271 = vst [vmem:[#allocation214_spill] sm:$0xff] %v16784_v62  ;;  %v4450_v45 = vsel %vm19275_vm15, %v16738_v55, %v4355_v26  ;;  %v19278_v26 = vld [vmem:[#allocation49_spill] sm:$0xff]  ;;  %vm19291_vm15 = vmmov %vm19270_vm5 }
 0x17d   :  { %13258 = vmatpush1.bf16.xpose.msra.mxu0 %v14799_v25  ;;  %v4359_v57 = vpop.permute.xlu0 %4358  ;;  %v4361_v59 = vpop.permute.xlu1 %4360 }
 0x17e   :  { %13260 = vmatprep.subr.bf16.mxu0 %v19261_v28  ;;  %v4447_v53 = vsel %vm19273_vm3, %v4359_v57, %v4361_v59  ;;  %vm16833_vm3 = vcmp.le.s32.totalorder %v19287_v8, 62 }
 0x17f   :  { %v19289_v2 = vsel %vm16833_vm3, 4294967295, %v19288_v2 }
 0x180   :  { %19290 = vst [vmem:[#allocation49_spill] sm:$0xff] %v19289_v2 }
 0x181   :  { %13386 = vmatpush1.bf16.xpose.msra.mxu1 %v14799_v25 }
 0x182   :  { %13388 = vmatprep.subr.bf16.mxu1 %v19261_v28 }
 0x184   :  { %12813 = vmatmul.mubr.msk.f32.vlgmr.msra.gmra.mrb[2].mxu0 %vm3164_vm2, %v16784_v62  ;;  %v3078_v62 = vpop.permute.xlu1 %3077 }
 0x185   :  { %13262 = vmatpush1.bf16.xpose.msra.mxu0 %v19272_v42  ;;  %12814 = vmatprep.mubr.msk.f32.mxu0 %vm16775_vm4, %v16770_v13 }
 0x186   :  { %13264 = vmatprep.subr.bf16.mxu0 %v19274_v4 }
 0x188   :  { %12845 = vmatmul.mubr.msk.f32.vlgmr.msra.gmra.mrb[2].mxu1 %vm15067_vm1, %v4450_v45  ;;  %v3076_v45 = vpop.permute.xlu0 %3075  ;;  %v4365_v8 = vpop.permute.xlu1 %4364 }
 0x189   :  { %13390 = vmatpush1.bf16.xpose.msra.mxu1 %v19272_v42  ;;  %12846 = vmatprep.mubr.msk.f32.mxu1 %vm15165_vm6, %v4447_v53  ;;  %v19280_v53 = vld [vmem:[#allocation50_spill] sm:$0xff]  ;;  %v16828_v12 = vsel %vm19270_vm5, %v3076_v45, %v3078_v62  ;;  %vm19294_vm5 = vcmp.lt.s32.totalorder %v15049_v34, 1 }
 0x18a   :  { %13392 = vmatprep.subr.bf16.mxu1 %v19274_v4  ;;  %v19281_v13 = vand.u32 63, %v19280_v53  ;;  %19285 = vst [vmem:[#allocation45_spill] sm:$0xff] %v16828_v12  ;;  %v19293_v53 = vld [vmem:[#allocation56_spill] sm:$0xff] }
 0x18c   :  { %vm16822_vm2 = vcmp.le.s32.totalorder %v19281_v13, 62  ;;  %v16842_v13 = vsel %vm19291_vm15, %v16673_v9, %v3072_v6  ;;  %v4363_v27 = vpop.permute.xlu0 %4362  ;;  %v19295_v9 = vld [vmem:[#allocation57_spill] sm:$0xff]  ;;  %v19296_v6 = vld [vmem:[#allocation8_spill] sm:$0xff]  ;;  %vm19297_vm15 = vmmov %vm19294_vm5  ;;  %v3082_v56 = vpop.permute.xlu1 %3081 }
 0x18d   :  { %13266 = vmatpush1.bf16.xpose.msra.mxu0 %v19278_v26  ;;  %v19283_v14 = vsel %vm16822_vm2, 4294967295, %v19282_v14  ;;  %19292 = vst [vmem:[#allocation52_spill] sm:$0xff] %v16842_v13  ;;  %v4445_v15 = vsel %vm19294_vm5, %v4363_v27, %v4365_v8  ;;  %6797 = vrot.lane.b32.xlu1 %v19296_v6, %s14702_s0  ;;  %v19301_v6 = vld [vmem:[#allocation65_spill] sm:$0xff] }
 0x18e   :  { %13268 = vmatprep.subr.bf16.mxu0 %v19279_v10  ;;  %19284 = vst [vmem:[#allocation42_spill] sm:$0xff] %v19283_v14 }
 0x190   :  { %v3080_v54 = vpop.permute.xlu0 %3079  ;;  %v4369_v49 = vpop.permute.xlu1 %4368 }
 0x191   :  { %13394 = vmatpush1.bf16.xpose.msra.mxu1 %v19278_v26 }
 0x192   :  { %13396 = vmatprep.subr.bf16.mxu1 %v19279_v10 }
 0x194   :  { %12815 = vmatmul.mubr.msk.f32.vlgmr.msra.gmra.mrb[2].mxu0 %vm16822_vm2, %v16842_v13  ;;  %v4448_v13 = vsel %vm19297_vm15, %v16717_v36, %v4359_v57  ;;  %v19302_v57 = vld [vmem:[#allocation64_spill] sm:$0xff]  ;;  %vm19307_vm15 = vcmp.lt.s32.totalorder %v15049_v34, 63  ;;  %v3086_v41 = vpop.permute.xlu1 %3085 }
 0x195   :  { %13270 = vmatpush1.bf16.xpose.msra.mxu0 %v19293_v53  ;;  %12816 = vmatprep.mubr.msk.f32.mxu0 %vm16833_vm3, %v16828_v12  ;;  %v19303_v36 = vand.u32 63, %v19302_v57 }
 0x196   :  { %13272 = vmatprep.subr.bf16.mxu0 %v19295_v9 }
 0x197   :  { %vm16874_vm5 = vcmp.le.s32.totalorder %v19303_v36, 62  ;;  %v4367_v36 = vpop.permute.xlu0 %4366 }
 0x198   :  { %12847 = vmatmul.mubr.msk.f32.vlgmr.msra.gmra.mrb[2].mxu1 %vm15236_vm7, %v4448_v13  ;;  %v19305_v30 = vsel %vm16874_vm5, 4294967295, %v19304_v30  ;;  %v16880_v13 = vsel %vm19307_vm15, %v3080_v54, %v3082_v56  ;;  %vm19314_vm7 = vmmov %vm19307_vm15  ;;  %vm19317_vm15 = vcmp.lt.s32.totalorder %v15049_v34, 1 }
 0x199   :  { %13398 = vmatpush1.bf16.xpose.msra.mxu1 %v19293_v53  ;;  %12848 = vmatprep.mubr.msk.f32.mxu1 %vm15249_vm8, %v4445_v15  ;;  %19306 = vst [vmem:[#allocation50_spill] sm:$0xff] %v19305_v30  ;;  %19308 = vst [vmem:[#allocation53_spill] sm:$0xff] %v16880_v13  ;;  %v19309_v15 = vld [vmem:[#allocation66_spill] sm:$0xff]  ;;  %v16892_v57 = vsel %vm19314_vm7, %v16758_v23, %v3076_v45  ;;  %v19333_v45 = vmov 0  ;;  %v19551_v30 = vld [vmem:[#allocation188_spill] sm:$0xff] }
 0x19a   :  { %13400 = vmatprep.subr.bf16.mxu1 %v19295_v9  ;;  %v19310_v12 = vand.u32 63, %v19309_v15  ;;  %19315 = vst [vmem:[#allocation57_spill] sm:$0xff] %v16892_v57  ;;  %v19318_v15 = vld [vmem:[#allocation69_spill] sm:$0xff]  ;;  %vm19319_vm7 = vmmov %vm19317_vm15 }
 0x19b   :  { %v4446_v23 = vsel %vm19319_vm7, %v4361_v59, %v4363_v27  ;;  %v3084_v48 = vpop.permute.xlu0 %3083  ;;  %v19325_v59 = vand.u32 63, %v19324_v43  ;;  %v19326_v27 = vmov 0  ;;  %vm19329_vm7 = vcmp.lt.s32.totalorder %v15049_v34, 63 }
 0x19c   :  { %vm16885_vm8 = vcmp.le.s32.totalorder %v19310_v12, 62  ;;  %v4443_v12 = vsel %vm19317_vm15, %v4367_v36, %v4369_v49 }
 0x19d   :  { %13274 = vmatpush1.bf16.xpose.msra.mxu0 %v19300_v24  ;;  %v19312_v19 = vsel %vm16885_vm8, 4294967295, %v19311_v19  ;;  %vm16917_vm15 = vcmp.le.s32.totalorder %v19325_v59, 62  ;;  %v4373_v59 = vpop.permute.xlu1 %4372 }
 0x19e   :  { %13276 = vmatprep.subr.bf16.mxu0 %v19301_v6  ;;  %19313 = vst [vmem:[#allocation56_spill] sm:$0xff] %v19312_v19  ;;  %v19327_v27 = vsel %vm16917_vm15, 4294967295, %v19326_v27  ;;  %v19346_v19 = vld [vmem:[#allocation88_spill] sm:$0xff] }
 0x19f   :  { %19328 = vst [vmem:[#allocation63_spill] sm:$0xff] %v19327_v27  ;;  %v4371_v43 = vpop.permute.xlu0 %4370 }
 0x1a1   :  { %13402 = vmatpush1.bf16.xpose.msra.mxu1 %v19300_v24 }
 0x1a2   :  { %13404 = vmatprep.subr.bf16.mxu1 %v19301_v6 }
 0x1a3   :  { %v3088_v27 = vpop.permute.xlu0 %3087 }
 0x1a4   :  { %12817 = vmatmul.mubr.msk.f32.vlgmr.msra.gmra.mrb[2].mxu0 %vm16874_vm5, %v16892_v57 }
 0x1a5   :  { %13278 = vmatpush1.bf16.xpose.msra.mxu0 %v19316_v51  ;;  %12818 = vmatprep.mubr.msk.f32.mxu0 %vm16885_vm8, %v16880_v13  ;;  %v19323_v13 = vld [vmem:[#allocation77_spill] sm:$0xff] }
 0x1a6   :  { %13280 = vmatprep.subr.bf16.mxu0 %v19318_v15 }
 0x1a8   :  { %12849 = vmatmul.mubr.msk.f32.vlgmr.msra.gmra.mrb[2].mxu1 %vm15351_vm9, %v4446_v23  ;;  %v16923_v23 = vsel %vm19329_vm7, %v3084_v48, %v3086_v41  ;;  %vm19336_vm9 = vmmov %vm19329_vm7  ;;  %vm19339_vm7 = vcmp.lt.s32.totalorder %v15049_v34, 1 }
 0x1a9   :  { %13406 = vmatpush1.bf16.xpose.msra.mxu1 %v19316_v51  ;;  %12850 = vmatprep.mubr.msk.f32.mxu1 %vm15363_vm10, %v4443_v12  ;;  %19330 = vst [vmem:[#allocation65_spill] sm:$0xff] %v16923_v23  ;;  %v19331_v12 = vld [vmem:[#allocation78_spill] sm:$0xff]  ;;  %v16934_v38 = vsel %vm19336_vm9, %v3078_v62, %v3080_v54  ;;  %vm19341_vm9 = vmmov %vm19339_vm7  ;;  %v19355_v62 = vmov 0 }
 0x1aa   :  { %13408 = vmatprep.subr.bf16.mxu1 %v19318_v15  ;;  %v19332_v57 = vand.u32 63, %v19331_v12  ;;  %19337 = vst [vmem:[#allocation66_spill] sm:$0xff] %v16934_v38  ;;  %v19340_v12 = vld [vmem:[#allocation81_spill] sm:$0xff]  ;;  %v4444_v54 = vsel %vm19341_vm9, %v4365_v8, %v4367_v36  ;;  %v19347_v8 = vand.u32 63, %v19346_v19  ;;  %v19348_v36 = vmov 0  ;;  %v4375_v19 = vpop.permute.xlu0 %4374  ;;  %v19555_v15 = vld [vmem:[#allocation187_spill] sm:$0xff] }
 0x1ab   :  { %vm19351_vm9 = vcmp.lt.s32.totalorder %v15049_v34, 63 }
 0x1ac   :  { %vm16928_vm10 = vcmp.le.s32.totalorder %v19332_v57, 62  ;;  %v4441_v57 = vsel %vm19339_vm7, %v4371_v43, %v4373_v59  ;;  %vm16959_vm7 = vcmp.le.s32.totalorder %v19347_v8, 62 }
 0x1ad   :  { %13282 = vmatpush1.bf16.xpose.msra.mxu0 %v19322_v46  ;;  %v19334_v45 = vsel %vm16928_vm10, 4294967295, %v19333_v45  ;;  %v19349_v36 = vsel %vm16959_vm7, 4294967295, %v19348_v36 }
 0x1ae   :  { %13284 = vmatprep.subr.bf16.mxu0 %v19323_v13  ;;  %19335 = vst [vmem:[#allocation64_spill] sm:$0xff] %v19334_v45  ;;  %v19344_v45 = vld [vmem:[#allocation87_spill] sm:$0xff]  ;;  %19350 = vst [vmem:[#allocation76_spill] sm:$0xff] %v19349_v36  ;;  %v3092_v36 = vpop.permute.xlu0 %3091 }
 0x1b1   :  { %13410 = vmatpush1.bf16.xpose.msra.mxu1 %v19322_v46  ;;  %v19338_v46 = vld [vmem:[#allocation80_spill] sm:$0xff] }
 0x1b2   :  { %13412 = vmatprep.subr.bf16.mxu1 %v19323_v13  ;;  %v3090_v13 = vpop.permute.xlu1 %3089 }
 0x1b4   :  { %12819 = vmatmul.mubr.msk.f32.vlgmr.msra.gmra.mrb[2].mxu0 %vm16917_vm15, %v16934_v38 }
 0x1b5   :  { %13286 = vmatpush1.bf16.xpose.msra.mxu0 %v19338_v46  ;;  %12820 = vmatprep.mubr.msk.f32.mxu0 %vm16928_vm10, %v16923_v23  ;;  %v19345_v23 = vld [vmem:[#allocation89_spill] sm:$0xff] }
 0x1b6   :  { %13288 = vmatprep.subr.bf16.mxu0 %v19340_v12  ;;  %v4377_v8 = vpop.permute.xlu1 %4376 }
 0x1b8   :  { %12851 = vmatmul.mubr.msk.f32.vlgmr.msra.gmra.mrb[2].mxu1 %vm15467_vm11, %v4444_v54  ;;  %v16965_v54 = vsel %vm19351_vm9, %v3088_v27, %v3090_v13  ;;  %vm19358_vm11 = vmmov %vm19351_vm9  ;;  %vm19361_vm9 = vcmp.lt.s32.totalorder %v15049_v34, 1 }
 0x1b9   :  { %13414 = vmatpush1.bf16.xpose.msra.mxu1 %v19338_v46  ;;  %12852 = vmatprep.mubr.msk.f32.mxu1 %vm15479_vm12, %v4441_v57  ;;  %19352 = vst [vmem:[#allocation78_spill] sm:$0xff] %v16965_v54  ;;  %v19353_v57 = vld [vmem:[#allocation90_spill] sm:$0xff]  ;;  %v19368_v46 = vld [vmem:[#allocation100_spill] sm:$0xff] }
 0x1ba   :  { %13416 = vmatprep.subr.bf16.mxu1 %v19340_v12  ;;  %v19354_v38 = vand.u32 63, %v19353_v57  ;;  %v19360_v12 = vld [vmem:[#allocation92_spill] sm:$0xff]  ;;  %v19362_v57 = vld [vmem:[#allocation93_spill] sm:$0xff] }
 0x1bc   :  { %vm16970_vm12 = vcmp.le.s32.totalorder %v19354_v38, 62  ;;  %v4439_v38 = vsel %vm19361_vm9, %v4375_v19, %v4377_v8 }
 0x1bd   :  { %13290 = vmatpush1.bf16.xpose.msra.mxu0 %v19344_v45  ;;  %v19356_v62 = vsel %vm16970_vm12, 4294967295, %v19355_v62 }
 0x1be   :  { %13292 = vmatprep.subr.bf16.mxu0 %v19345_v23  ;;  %19357 = vst [vmem:[#allocation88_spill] sm:$0xff] %v19356_v62  ;;  %v19366_v62 = vld [vmem:[#allocation99_spill] sm:$0xff] }
 0x1c1   :  { %13418 = vmatpush1.bf16.xpose.msra.mxu1 %v19344_v45  ;;  %v16976_v45 = vsel %vm19358_vm11, %v3082_v56, %v3084_v48  ;;  %vm19363_vm11 = vmmov %vm19361_vm9  ;;  %v19377_v56 = vmov 0 }
 0x1c2   :  { %13420 = vmatprep.subr.bf16.mxu1 %v19345_v23  ;;  %19359 = vst [vmem:[#allocation90_spill] sm:$0xff] %v16976_v45  ;;  %v4442_v48 = vsel %vm19363_vm11, %v4369_v49, %v4371_v43  ;;  %v3094_v23 = vpop.permute.xlu1 %3093  ;;  %v19369_v49 = vand.u32 63, %v19368_v46  ;;  %v19370_v43 = vmov 0  ;;  %vm19373_vm11 = vcmp.lt.s32.totalorder %v15049_v34, 63  ;;  %v4379_v46 = vpop.permute.xlu0 %4378 }
 0x1c4   :  { %12821 = vmatmul.mubr.msk.f32.vlgmr.msra.gmra.mrb[2].mxu0 %vm16959_vm7, %v16976_v45  ;;  %vm17001_vm9 = vcmp.le.s32.totalorder %v19369_v49, 62 }
 0x1c5   :  { %13294 = vmatpush1.bf16.xpose.msra.mxu0 %v19360_v12  ;;  %12822 = vmatprep.mubr.msk.f32.mxu0 %vm16970_vm12, %v16965_v54  ;;  %v19367_v54 = vld [vmem:[#allocation101_spill] sm:$0xff]  ;;  %v19371_v43 = vsel %vm17001_vm9, 4294967295, %v19370_v43 }
 0x1c6   :  { %13296 = vmatprep.subr.bf16.mxu0 %v19362_v57  ;;  %19372 = vst [vmem:[#allocation100_spill] sm:$0xff] %v19371_v43  ;;  %v4381_v49 = vpop.permute.xlu1 %4380  ;;  %v3096_v43 = vpop.permute.xlu0 %3095 }
 0x1c8   :  { %12853 = vmatmul.mubr.msk.f32.vlgmr.msra.gmra.mrb[2].mxu1 %vm15583_vm13, %v4442_v48  ;;  %v17007_v48 = vsel %vm19373_vm11, %v3092_v36, %v3094_v23  ;;  %vm19380_vm13 = vmmov %vm19373_vm11  ;;  %vm19383_vm11 = vcmp.lt.s32.totalorder %v15049_v34, 1 }
 0x1c9   :  { %13422 = vmatpush1.bf16.xpose.msra.mxu1 %v19360_v12  ;;  %12854 = vmatprep.mubr.msk.f32.mxu1 %vm15595_vm14, %v4439_v38  ;;  %19374 = vst [vmem:[#allocation215_spill] sm:$0xff] %v17007_v48  ;;  %v19375_v38 = vld [vmem:[#allocation102_spill] sm:$0xff]  ;;  %v19392_v12 = vld [vmem:[#allocation112_spill] sm:$0xff] }
 0x1ca   :  { %13424 = vmatprep.subr.bf16.mxu1 %v19362_v57  ;;  %v19376_v45 = vand.u32 63, %v19375_v38  ;;  %v19382_v57 = vld [vmem:[#allocation104_spill] sm:$0xff]  ;;  %v19384_v38 = vld [vmem:[#allocation105_spill] sm:$0xff] }
 0x1cc   :  { %vm17012_vm14 = vcmp.le.s32.totalorder %v19376_v45, 62  ;;  %v4437_v45 = vsel %vm19383_vm11, %v4379_v46, %v4381_v49 }
 0x1cd   :  { %13298 = vmatpush1.bf16.xpose.msra.mxu0 %v19366_v62  ;;  %v19378_v56 = vsel %vm17012_vm14, 4294967295, %v19377_v56 }
 0x1ce   :  { %13300 = vmatprep.subr.bf16.mxu0 %v19367_v54  ;;  %19379 = vst [vmem:[#allocation102_spill] sm:$0xff] %v19378_v56  ;;  %v19390_v56 = vld [vmem:[#allocation111_spill] sm:$0xff] }
 0x1d1   :  { %13426 = vmatpush1.bf16.xpose.msra.mxu1 %v19366_v62  ;;  %v17018_v62 = vsel %vm19380_vm13, %v3086_v41, %v3088_v27  ;;  %vm19385_vm13 = vmmov %vm19383_vm11  ;;  %v19386_v27 = vld [vmem:[#allocation103_spill] sm:$0xff] }
 0x1d2   :  { %13428 = vmatprep.subr.bf16.mxu1 %v19367_v54  ;;  %19381 = vst [vmem:[#allocation216_spill] sm:$0xff] %v17018_v62  ;;  %v4440_v41 = vsel %vm19385_vm13, %v4373_v59, %v4375_v19  ;;  %vm19387_vm6 = vnez %v19386_v27  ;;  %v3098_v54 = vpop.permute.xlu1 %3097  ;;  %v19393_v59 = vand.u32 63, %v19392_v12  ;;  %v19394_v19 = vmov 0  ;;  %v4383_v12 = vpop.permute.xlu0 %4382 }
 0x1d3   :  { %vm19397_vm13 = vcmp.lt.s32.totalorder %v15049_v34, 63  ;;  %v19401_v27 = vmov 0 }
 0x1d4   :  { %12823 = vmatmul.mubr.msk.f32.vlgmr.msra.gmra.mrb[2].mxu0 %vm17001_vm9, %v17018_v62  ;;  %v19388_v62 = vld [vmem:[#allocation106_spill] sm:$0xff]  ;;  %vm17043_vm11 = vcmp.le.s32.totalorder %v19393_v59, 62 }
 0x1d5   :  { %13302 = vmatpush1.bf16.xpose.msra.mxu0 %v19382_v57  ;;  %12824 = vmatprep.mubr.msk.f32.mxu0 %vm17012_vm14, %v17007_v48  ;;  %vm19389_vm1 = vnez %v19388_v62  ;;  %v19391_v48 = vld [vmem:[#allocation113_spill] sm:$0xff]  ;;  %v19395_v19 = vsel %vm17043_vm11, 4294967295, %v19394_v19 }
 0x1d6   :  { %13304 = vmatprep.subr.bf16.mxu0 %v19384_v38  ;;  %19396 = vst [vmem:[#allocation112_spill] sm:$0xff] %v19395_v19  ;;  %v4385_v59 = vpop.permute.xlu1 %4384  ;;  %v3100_v19 = vpop.permute.xlu0 %3099 }
 0x1d8   :  { %12855 = vmatmul.mubr.msk.f32.vlgmr.msra.gmra.mrb[2].mxu1 %vm19387_vm6, %v4440_v41  ;;  %v17049_v41 = vsel %vm19397_vm13, %v3096_v43, %v3098_v54  ;;  %vm19404_vm6 = vmmov %vm19397_vm13  ;;  %vm19407_vm13 = vcmp.lt.s32.totalorder %v15049_v34, 1 }
 0x1d9   :  { %13430 = vmatpush1.bf16.xpose.msra.mxu1 %v19382_v57  ;;  %12856 = vmatprep.mubr.msk.f32.mxu1 %vm19389_vm1, %v4437_v45  ;;  %19398 = vst [vmem:[#allocation217_spill] sm:$0xff] %v17049_v41  ;;  %v19399_v45 = vld [vmem:[#allocation114_spill] sm:$0xff]  ;;  %v19416_v57 = vld [vmem:[#allocation124_spill] sm:$0xff] }
 0x1da   :  { %13432 = vmatprep.subr.bf16.mxu1 %v19384_v38  ;;  %v19400_v62 = vand.u32 63, %v19399_v45  ;;  %v19406_v38 = vld [vmem:[#allocation116_spill] sm:$0xff]  ;;  %v19408_v45 = vld [vmem:[#allocation117_spill] sm:$0xff] }
 0x1dc   :  { %vm17054_vm1 = vcmp.le.s32.totalorder %v19400_v62, 62  ;;  %v4435_v62 = vsel %vm19407_vm13, %v4383_v12, %v4385_v59 }
 0x1dd   :  { %13306 = vmatpush1.bf16.xpose.msra.mxu0 %v19390_v56  ;;  %v19402_v27 = vsel %vm17054_vm1, 4294967295, %v19401_v27 }
 0x1de   :  { %13308 = vmatprep.subr.bf16.mxu0 %v19391_v48  ;;  %19403 = vst [vmem:[#allocation114_spill] sm:$0xff] %v19402_v27  ;;  %v19414_v27 = vld [vmem:[#allocation123_spill] sm:$0xff] }
 0x1e1   :  { %13434 = vmatpush1.bf16.xpose.msra.mxu1 %v19390_v56  ;;  %v17060_v56 = vsel %vm19404_vm6, %v3090_v13, %v3092_v36  ;;  %vm19409_vm6 = vmmov %vm19407_vm13  ;;  %v19410_v36 = vld [vmem:[#allocation115_spill] sm:$0xff] }
 0x1e2   :  { %13436 = vmatprep.subr.bf16.mxu1 %v19391_v48  ;;  %19405 = vst [vmem:[#allocation218_spill] sm:$0xff] %v17060_v56  ;;  %v4438_v13 = vsel %vm19409_vm6, %v4377_v8, %v4379_v46  ;;  %vm19411_vm14 = vnez %v19410_v36  ;;  %v3102_v48 = vpop.permute.xlu1 %3101  ;;  %v19417_v8 = vand.u32 63, %v19416_v57  ;;  %v19418_v46 = vmov 0  ;;  %v4387_v57 = vpop.permute.xlu0 %4386 }
 0x1e3   :  { %vm19421_vm6 = vcmp.lt.s32.totalorder %v15049_v34, 63  ;;  %v19425_v36 = vmov 0 }
 0x1e4   :  { %12825 = vmatmul.mubr.msk.f32.vlgmr.msra.gmra.mrb[2].mxu0 %vm17043_vm11, %v17060_v56  ;;  %v19412_v56 = vld [vmem:[#allocation118_spill] sm:$0xff]  ;;  %vm17085_vm13 = vcmp.le.s32.totalorder %v19417_v8, 62 }
 0x1e5   :  { %13310 = vmatpush1.bf16.xpose.msra.mxu0 %v19406_v38  ;;  %12826 = vmatprep.mubr.msk.f32.mxu0 %vm17054_vm1, %v17049_v41  ;;  %vm19413_vm11 = vnez %v19412_v56  ;;  %v19415_v41 = vld [vmem:[#allocation125_spill] sm:$0xff]  ;;  %v19419_v46 = vsel %vm17085_vm13, 4294967295, %v19418_v46 }
 0x1e6   :  { %13312 = vmatprep.subr.bf16.mxu0 %v19408_v45  ;;  %19420 = vst [vmem:[#allocation124_spill] sm:$0xff] %v19419_v46  ;;  %v4389_v8 = vpop.permute.xlu1 %4388  ;;  %v3104_v46 = vpop.permute.xlu0 %3103 }
 0x1e8   :  { %12857 = vmatmul.mubr.msk.f32.vlgmr.msra.gmra.mrb[2].mxu1 %vm19411_vm14, %v4438_v13  ;;  %v17091_v13 = vsel %vm19421_vm6, %v3100_v19, %v3102_v48  ;;  %vm19428_vm14 = vmmov %vm19421_vm6  ;;  %vm19431_vm6 = vcmp.lt.s32.totalorder %v15049_v34, 1 }
 0x1e9   :  { %13438 = vmatpush1.bf16.xpose.msra.mxu1 %v19406_v38  ;;  %12858 = vmatprep.mubr.msk.f32.mxu1 %vm19413_vm11, %v4435_v62  ;;  %19422 = vst [vmem:[#allocation219_spill] sm:$0xff] %v17091_v13  ;;  %v19423_v62 = vld [vmem:[#allocation126_spill] sm:$0xff]  ;;  %v19440_v38 = vld [vmem:[#allocation136_spill] sm:$0xff] }
 0x1ea   :  { %13440 = vmatprep.subr.bf16.mxu1 %v19408_v45  ;;  %v19424_v56 = vand.u32 63, %v19423_v62  ;;  %v19430_v45 = vld [vmem:[#allocation128_spill] sm:$0xff]  ;;  %v19432_v62 = vld [vmem:[#allocation129_spill] sm:$0xff] }
 0x1ec   :  { %vm17096_vm11 = vcmp.le.s32.totalorder %v19424_v56, 62  ;;  %v4433_v56 = vsel %vm19431_vm6, %v4387_v57, %v4389_v8 }
 0x1ed   :  { %13314 = vmatpush1.bf16.xpose.msra.mxu0 %v19414_v27  ;;  %v19426_v36 = vsel %vm17096_vm11, 4294967295, %v19425_v36 }
 0x1ee   :  { %13316 = vmatprep.subr.bf16.mxu0 %v19415_v41  ;;  %19427 = vst [vmem:[#allocation126_spill] sm:$0xff] %v19426_v36  ;;  %v19438_v36 = vld [vmem:[#allocation135_spill] sm:$0xff] }
 0x1f1   :  { %13442 = vmatpush1.bf16.xpose.msra.mxu1 %v19414_v27  ;;  %v17102_v27 = vsel %vm19428_vm14, %v3094_v23, %v3096_v43  ;;  %vm19433_vm14 = vmmov %vm19431_vm6  ;;  %v19434_v43 = vld [vmem:[#allocation127_spill] sm:$0xff] }
 0x1f2   :  { %13444 = vmatprep.subr.bf16.mxu1 %v19415_v41  ;;  %19429 = vst [vmem:[#allocation220_spill] sm:$0xff] %v17102_v27  ;;  %v4436_v23 = vsel %vm19433_vm14, %v4381_v49, %v4383_v12  ;;  %vm19435_vm1 = vnez %v19434_v43  ;;  %v3106_v41 = vpop.permute.xlu1 %3105  ;;  %v19441_v49 = vand.u32 63, %v19440_v38  ;;  %v19442_v12 = vmov 0  ;;  %v4391_v38 = vpop.permute.xlu0 %4390 }
 0x1f3   :  { %vm19445_vm14 = vcmp.lt.s32.totalorder %v15049_v34, 63  ;;  %v19449_v43 = vmov 0 }
 0x1f4   :  { %12827 = vmatmul.mubr.msk.f32.vlgmr.msra.gmra.mrb[2].mxu0 %vm17085_vm13, %v17102_v27  ;;  %v19436_v27 = vld [vmem:[#allocation130_spill] sm:$0xff]  ;;  %vm17127_vm6 = vcmp.le.s32.totalorder %v19441_v49, 62 }
 0x1f5   :  { %13318 = vmatpush1.bf16.xpose.msra.mxu0 %v19430_v45  ;;  %12828 = vmatprep.mubr.msk.f32.mxu0 %vm17096_vm11, %v17091_v13  ;;  %vm19437_vm13 = vnez %v19436_v27  ;;  %v19439_v13 = vld [vmem:[#allocation137_spill] sm:$0xff]  ;;  %v19443_v12 = vsel %vm17127_vm6, 4294967295, %v19442_v12 }
 0x1f6   :  { %13320 = vmatprep.subr.bf16.mxu0 %v19432_v62  ;;  %19444 = vst [vmem:[#allocation136_spill] sm:$0xff] %v19443_v12  ;;  %v4393_v49 = vpop.permute.xlu1 %4392  ;;  %v3108_v12 = vpop.permute.xlu0 %3107 }
 0x1f8   :  { %12859 = vmatmul.mubr.msk.f32.vlgmr.msra.gmra.mrb[2].mxu1 %vm19435_vm1, %v4436_v23  ;;  %v17133_v23 = vsel %vm19445_vm14, %v3104_v46, %v3106_v41  ;;  %vm19452_vm1 = vmmov %vm19445_vm14  ;;  %vm19455_vm14 = vcmp.lt.s32.totalorder %v15049_v34, 1 }
 0x1f9   :  { %13446 = vmatpush1.bf16.xpose.msra.mxu1 %v19430_v45  ;;  %12860 = vmatprep.mubr.msk.f32.mxu1 %vm19437_vm13, %v4433_v56  ;;  %19446 = vst [vmem:[#allocation221_spill] sm:$0xff] %v17133_v23  ;;  %v19447_v56 = vld [vmem:[#allocation138_spill] sm:$0xff]  ;;  %v19464_v45 = vld [vmem:[#allocation148_spill] sm:$0xff] }
 0x1fa   :  { %13448 = vmatprep.subr.bf16.mxu1 %v19432_v62  ;;  %v19448_v27 = vand.u32 63, %v19447_v56  ;;  %v19454_v62 = vld [vmem:[#allocation140_spill] sm:$0xff]  ;;  %v19456_v56 = vld [vmem:[#allocation141_spill] sm:$0xff] }
 0x1fc   :  { %vm17138_vm13 = vcmp.le.s32.totalorder %v19448_v27, 62  ;;  %v4431_v27 = vsel %vm19455_vm14, %v4391_v38, %v4393_v49 }
 0x1fd   :  { %13322 = vmatpush1.bf16.xpose.msra.mxu0 %v19438_v36  ;;  %v19450_v43 = vsel %vm17138_vm13, 4294967295, %v19449_v43 }
 0x1fe   :  { %13324 = vmatprep.subr.bf16.mxu0 %v19439_v13  ;;  %19451 = vst [vmem:[#allocation138_spill] sm:$0xff] %v19450_v43  ;;  %v19462_v43 = vld [vmem:[#allocation147_spill] sm:$0xff] }
 0x201   :  { %13450 = vmatpush1.bf16.xpose.msra.mxu1 %v19438_v36  ;;  %v17144_v36 = vsel %vm19452_vm1, %v3098_v54, %v3100_v19  ;;  %vm19457_vm1 = vmmov %vm19455_vm14  ;;  %v19458_v19 = vld [vmem:[#allocation139_spill] sm:$0xff] }
 0x202   :  { %13452 = vmatprep.subr.bf16.mxu1 %v19439_v13  ;;  %19453 = vst [vmem:[#allocation222_spill] sm:$0xff] %v17144_v36  ;;  %v4434_v54 = vsel %vm19457_vm1, %v4385_v59, %v4387_v57  ;;  %vm19459_vm11 = vnez %v19458_v19  ;;  %v3110_v13 = vpop.permute.xlu1 %3109  ;;  %v19465_v59 = vand.u32 63, %v19464_v45  ;;  %v19466_v57 = vmov 0  ;;  %v4395_v45 = vpop.permute.xlu0 %4394 }
 0x203   :  { %vm19469_vm1 = vcmp.lt.s32.totalorder %v15049_v34, 63  ;;  %v19473_v19 = vmov 0 }
 0x204   :  { %12829 = vmatmul.mubr.msk.f32.vlgmr.msra.gmra.mrb[2].mxu0 %vm17127_vm6, %v17144_v36  ;;  %v19460_v36 = vld [vmem:[#allocation142_spill] sm:$0xff]  ;;  %vm17169_vm14 = vcmp.le.s32.totalorder %v19465_v59, 62 }
 0x205   :  { %13326 = vmatpush1.bf16.xpose.msra.mxu0 %v19454_v62  ;;  %12830 = vmatprep.mubr.msk.f32.mxu0 %vm17138_vm13, %v17133_v23  ;;  %vm19461_vm6 = vnez %v19460_v36  ;;  %v19463_v23 = vld [vmem:[#allocation149_spill] sm:$0xff]  ;;  %v19467_v57 = vsel %vm17169_vm14, 4294967295, %v19466_v57 }
 0x206   :  { %13328 = vmatprep.subr.bf16.mxu0 %v19456_v56  ;;  %19468 = vst [vmem:[#allocation148_spill] sm:$0xff] %v19467_v57  ;;  %v4397_v59 = vpop.permute.xlu1 %4396  ;;  %v3112_v57 = vpop.permute.xlu0 %3111 }
 0x208   :  { %12861 = vmatmul.mubr.msk.f32.vlgmr.msra.gmra.mrb[2].mxu1 %vm19459_vm11, %v4434_v54  ;;  %v17175_v54 = vsel %vm19469_vm1, %v3108_v12, %v3110_v13  ;;  %vm19476_vm11 = vmmov %vm19469_vm1  ;;  %vm19479_vm1 = vcmp.lt.s32.totalorder %v15049_v34, 1 }
 0x209   :  { %13454 = vmatpush1.bf16.xpose.msra.mxu1 %v19454_v62  ;;  %12862 = vmatprep.mubr.msk.f32.mxu1 %vm19461_vm6, %v4431_v27  ;;  %19470 = vst [vmem:[#allocation223_spill] sm:$0xff] %v17175_v54  ;;  %v19471_v27 = vld [vmem:[#allocation150_spill] sm:$0xff]  ;;  %v19488_v62 = vld [vmem:[#allocation160_spill] sm:$0xff] }
 0x20a   :  { %13456 = vmatprep.subr.bf16.mxu1 %v19456_v56  ;;  %v19472_v36 = vand.u32 63, %v19471_v27  ;;  %v19478_v56 = vld [vmem:[#allocation152_spill] sm:$0xff]  ;;  %v19480_v27 = vld [vmem:[#allocation153_spill] sm:$0xff] }
 0x20c   :  { %vm17180_vm6 = vcmp.le.s32.totalorder %v19472_v36, 62  ;;  %v4429_v36 = vsel %vm19479_vm1, %v4395_v45, %v4397_v59 }
 0x20d   :  { %13330 = vmatpush1.bf16.xpose.msra.mxu0 %v19462_v43  ;;  %v19474_v19 = vsel %vm17180_vm6, 4294967295, %v19473_v19 }
 0x20e   :  { %13332 = vmatprep.subr.bf16.mxu0 %v19463_v23  ;;  %19475 = vst [vmem:[#allocation150_spill] sm:$0xff] %v19474_v19  ;;  %v19486_v19 = vld [vmem:[#allocation159_spill] sm:$0xff] }
 0x211   :  { %13458 = vmatpush1.bf16.xpose.msra.mxu1 %v19462_v43  ;;  %v17186_v43 = vsel %vm19476_vm11, %v3102_v48, %v3104_v46  ;;  %vm19481_vm11 = vmmov %vm19479_vm1  ;;  %v19482_v46 = vld [vmem:[#allocation151_spill] sm:$0xff] }
 0x212   :  { %13460 = vmatprep.subr.bf16.mxu1 %v19463_v23  ;;  %19477 = vst [vmem:[#allocation224_spill] sm:$0xff] %v17186_v43  ;;  %v4432_v48 = vsel %vm19481_vm11, %v4389_v8, %v4391_v38  ;;  %vm19483_vm13 = vnez %v19482_v46  ;;  %v3114_v23 = vpop.permute.xlu1 %3113  ;;  %v19489_v8 = vand.u32 63, %v19488_v62  ;;  %v19490_v38 = vmov 0  ;;  %v4399_v62 = vpop.permute.xlu0 %4398 }
 0x213   :  { %vm19493_vm11 = vcmp.lt.s32.totalorder %v15049_v34, 63  ;;  %v19497_v46 = vmov 0 }
 0x214   :  { %12831 = vmatmul.mubr.msk.f32.vlgmr.msra.gmra.mrb[2].mxu0 %vm17169_vm14, %v17186_v43  ;;  %v19484_v43 = vld [vmem:[#allocation154_spill] sm:$0xff]  ;;  %vm17211_vm1 = vcmp.le.s32.totalorder %v19489_v8, 62 }
 0x215   :  { %13334 = vmatpush1.bf16.xpose.msra.mxu0 %v19478_v56  ;;  %12832 = vmatprep.mubr.msk.f32.mxu0 %vm17180_vm6, %v17175_v54  ;;  %vm19485_vm14 = vnez %v19484_v43  ;;  %v19487_v54 = vld [vmem:[#allocation161_spill] sm:$0xff]  ;;  %v19491_v38 = vsel %vm17211_vm1, 4294967295, %v19490_v38 }
 0x216   :  { %13336 = vmatprep.subr.bf16.mxu0 %v19480_v27  ;;  %19492 = vst [vmem:[#allocation160_spill] sm:$0xff] %v19491_v38  ;;  %v4401_v8 = vpop.permute.xlu1 %4400  ;;  %v3116_v38 = vpop.permute.xlu0 %3115 }
 0x218   :  { %12863 = vmatmul.mubr.msk.f32.vlgmr.msra.gmra.mrb[2].mxu1 %vm19483_vm13, %v4432_v48  ;;  %v17217_v48 = vsel %vm19493_vm11, %v3112_v57, %v3114_v23  ;;  %vm19500_vm13 = vmmov %vm19493_vm11  ;;  %vm19503_vm11 = vcmp.lt.s32.totalorder %v15049_v34, 1 }
 0x219   :  { %13462 = vmatpush1.bf16.xpose.msra.mxu1 %v19478_v56  ;;  %12864 = vmatprep.mubr.msk.f32.mxu1 %vm19485_vm14, %v4429_v36  ;;  %19494 = vst [vmem:[#allocation225_spill] sm:$0xff] %v17217_v48  ;;  %v19495_v36 = vld [vmem:[#allocation162_spill] sm:$0xff]  ;;  %v19536_v56 = vld [vmem:[#allocation184_spill] sm:$0xff] }
 0x21a   :  { %13464 = vmatprep.subr.bf16.mxu1 %v19480_v27  ;;  %v19496_v43 = vand.u32 63, %v19495_v36  ;;  %v19502_v27 = vld [vmem:[#allocation164_spill] sm:$0xff]  ;;  %v19504_v36 = vld [vmem:[#allocation165_spill] sm:$0xff] }
 0x21c   :  { %vm17222_vm14 = vcmp.le.s32.totalorder %v19496_v43, 62  ;;  %v4427_v43 = vsel %vm19503_vm11, %v4399_v62, %v4401_v8 }
 0x21d   :  { %13338 = vmatpush1.bf16.xpose.msra.mxu0 %v19486_v19  ;;  %v19498_v46 = vsel %vm17222_vm14, 4294967295, %v19497_v46 }
 0x21e   :  { %13340 = vmatprep.subr.bf16.mxu0 %v19487_v54  ;;  %19499 = vst [vmem:[#allocation162_spill] sm:$0xff] %v19498_v46  ;;  %v19510_v46 = vld [vmem:[#allocation171_spill] sm:$0xff] }
 0x221   :  { %13466 = vmatpush1.bf16.xpose.msra.mxu1 %v19486_v19  ;;  %v17228_v19 = vsel %vm19500_vm13, %v3106_v41, %v3108_v12  ;;  %vm19505_vm13 = vmmov %vm19503_vm11  ;;  %v19506_v12 = vld [vmem:[#allocation163_spill] sm:$0xff] }
 0x222   :  { %13468 = vmatprep.subr.bf16.mxu1 %v19487_v54  ;;  %19501 = vst [vmem:[#allocation226_spill] sm:$0xff] %v17228_v19  ;;  %v4430_v41 = vsel %vm19505_vm13, %v4393_v49, %v4395_v45  ;;  %vm19507_vm6 = vnez %v19506_v12  ;;  %v17250_v54 = vpop.permute.xlu1 %3117  ;;  %v19512_v49 = vld [vmem:[#allocation172_spill] sm:$0xff]  ;;  %vm19517_vm13 = vcmp.lt.s32.totalorder %v15049_v34, 63 }
 0x223   :  { %v19513_v45 = vand.u32 63, %v19512_v49 }
 0x224   :  { %12833 = vmatmul.mubr.msk.f32.vlgmr.msra.gmra.mrb[2].mxu0 %vm17211_vm1, %v17228_v19  ;;  %v19508_v19 = vld [vmem:[#allocation166_spill] sm:$0xff] }
 0x225   :  { %13342 = vmatpush1.bf16.xpose.msra.mxu0 %v19502_v27  ;;  %12834 = vmatprep.mubr.msk.f32.mxu0 %vm17222_vm14, %v17217_v48  ;;  %vm19509_vm1 = vnez %v19508_v19  ;;  %v19511_v48 = vld [vmem:[#allocation173_spill] sm:$0xff]  ;;  %vm17255_vm11 = vcmp.le.s32.totalorder %v19513_v45, 62  ;;  %v19519_v19 = vld [vmem:[#allocation174_spill] sm:$0xff]  ;;  %v4403_v45 = vpop.permute.xlu0 %4402 }
 0x226   :  { %13344 = vmatprep.subr.bf16.mxu0 %v19504_v36  ;;  %v19520_v12 = vand.u32 63, %v19519_v19 }
 0x228   :  { %12865 = vmatmul.mubr.msk.f32.vlgmr.msra.gmra.mrb[2].mxu1 %vm19507_vm6, %v4430_v41  ;;  %v19514_v41 = vmov 0  ;;  %vm19524_vm6 = vmmov %vm19517_vm13 }
 0x229   :  { %13470 = vmatpush1.bf16.xpose.msra.mxu1 %v19502_v27  ;;  %12866 = vmatprep.mubr.msk.f32.mxu1 %vm19509_vm1, %v4427_v43  ;;  %v19515_v41 = vsel %vm17255_vm11, 4294967295, %v19514_v41  ;;  %v17262_v43 = vsel %vm19517_vm13, %v3116_v38, %v17250_v54  ;;  %vm17267_vm1 = vcmp.le.s32.totalorder %v19520_v12, 62  ;;  %v17273_v49 = vsel %vm19524_vm6, %v3110_v13, %v3112_v57  ;;  %v19526_v27 = vld [vmem:[#allocation176_spill] sm:$0xff]  ;;  %v19528_v12 = vld [vmem:[#allocation177_spill] sm:$0xff]  ;;  %v19530_v57 = vld [vmem:[#allocation175_spill] sm:$0xff] }
 0x22a   :  { %13472 = vmatprep.subr.bf16.mxu1 %v19504_v36  ;;  %19516 = vst [vmem:[#allocation172_spill] sm:$0xff] %v19515_v41  ;;  %19518 = vst [vmem:[#allocation227_spill] sm:$0xff] %v17262_v43  ;;  %v19521_v36 = vmov 0  ;;  %vm19527_vm13 = vcmp.lt.s32.totalorder %v15049_v34, 1  ;;  %vm19531_vm14 = vnez %v19530_v57  ;;  %v3120_v41 = vpop.permute.xlu0 %3119  ;;  %v19545_v57 = vmov 0 }
 0x22b   :  { %v19522_v36 = vsel %vm17267_vm1, 4294967295, %v19521_v36  ;;  %19525 = vst [vmem:[#allocation228_spill] sm:$0xff] %v17273_v49  ;;  %vm19529_vm6 = vmmov %vm19527_vm13 }
 0x22c   :  { %19523 = vst [vmem:[#allocation174_spill] sm:$0xff] %v19522_v36  ;;  %v4428_v13 = vsel %vm19529_vm6, %v4397_v59, %v4399_v62  ;;  %v19534_v36 = vld [vmem:[#allocation183_spill] sm:$0xff]  ;;  %v19537_v59 = vand.u32 63, %v19536_v56  ;;  %v19538_v62 = vmov 0  ;;  %vm19541_vm6 = vcmp.lt.s32.totalorder %v15049_v34, 63  ;;  %v19550_v56 = vld [vmem:[#allocation5_spill] sm:$0xff] }
 0x22d   :  { %13346 = vmatpush1.bf16.xpose.msra.mxu0 %v19510_v46 }
 0x22e   :  { %13348 = vmatprep.subr.bf16.mxu0 %v19511_v48 }
 0x231   :  { %13474 = vmatpush1.bf16.xpose.msra.mxu1 %v19510_v46  ;;  %v4405_v46 = vpop.permute.xlu1 %4404 }
 0x232   :  { %13476 = vmatprep.subr.bf16.mxu1 %v19511_v48  ;;  %v4425_v19 = vsel %vm19527_vm13, %v4403_v45, %v4405_v46  ;;  %vm17298_vm13 = vcmp.le.s32.totalorder %v19537_v59, 62  ;;  %v18820_v59 = vsub.s32 0, %v19550_v56 }
 0x233   :  { %v19539_v62 = vsel %vm17298_vm13, 4294967295, %v19538_v62 }
 0x234   :  { %12835 = vmatmul.mubr.msk.f32.vlgmr.msra.gmra.mrb[2].mxu0 %vm17255_vm11, %v17273_v49  ;;  %v19532_v49 = vld [vmem:[#allocation178_spill] sm:$0xff]  ;;  %19540 = vst [vmem:[#allocation184_spill] sm:$0xff] %v19539_v62 }
 0x235   :  { %13350 = vmatpush1.bf16.xpose.msra.mxu0 %v19526_v27  ;;  %12836 = vmatprep.mubr.msk.f32.mxu0 %vm17267_vm1, %v17262_v43  ;;  %vm19533_vm11 = vnez %v19532_v49  ;;  %v19535_v43 = vld [vmem:[#allocation185_spill] sm:$0xff]  ;;  %v3122_v48 = vpop.permute.xlu1 %3121  ;;  %vm19574_vm1 = vnez %v19211_v20  ;;  %v19643_v20 = vld [vmem:[#allocation112_spill] sm:$0xff] }
 0x236   :  { %13352 = vmatprep.subr.bf16.mxu0 %v19528_v12 }
 0x238   :  { %12867 = vmatmul.mubr.msk.f32.vlgmr.msra.gmra.mrb[2].mxu1 %vm19531_vm14, %v4428_v13  ;;  %v17304_v13 = vsel %vm19541_vm6, %v3120_v41, %v3122_v48  ;;  %vm19548_vm14 = vmmov %vm19541_vm6 }
 0x239   :  { %13478 = vmatpush1.bf16.xpose.msra.mxu1 %v19526_v27  ;;  %12868 = vmatprep.mubr.msk.f32.mxu1 %vm19533_vm11, %v4425_v19  ;;  %19542 = vst [vmem:[#allocation229_spill] sm:$0xff] %v17304_v13  ;;  %v19543_v19 = vld [vmem:[#allocation186_spill] sm:$0xff]  ;;  %v4407_v27 = vpop.permute.xlu0 %4406 }
 0x23a   :  { %13480 = vmatprep.subr.bf16.mxu1 %v19528_v12  ;;  %v19544_v49 = vand.u32 63, %v19543_v19 }
 0x23c   :  { %vm17309_vm11 = vcmp.le.s32.totalorder %v19544_v49, 62  ;;  %v17326_v49 = vld [vmem:[%s18323_s2] sm:$0xff] }
 0x23d   :  { %13354 = vmatpush1.bf16.xpose.msra.mxu0 %v19534_v36  ;;  %v19546_v57 = vsel %vm17309_vm11, 4294967295, %v19545_v57 }
 0x23e   :  { %13356 = vmatprep.subr.bf16.mxu0 %v19535_v43  ;;  %19547 = vst [vmem:[#allocation186_spill] sm:$0xff] %v19546_v57  ;;  %v19557_v57 = vsub.s32 1, %v19550_v56 }
 0x241   :  { %13482 = vmatpush1.bf16.xpose.msra.mxu1 %v19534_v36  ;;  %v17315_v36 = vsel %vm19548_vm14, %v3114_v23, %v3116_v38  ;;  %vm19552_vm14 = vcmp.lt.s32.totalorder %v15049_v34, 1  ;;  %v19553_v38 = vld [vmem:[#allocation189_spill] sm:$0xff] }
 0x242   :  { %13484 = vmatprep.subr.bf16.mxu1 %v19535_v43  ;;  %19549 = vst [vmem:[#allocation230_spill] sm:$0xff] %v17315_v36  ;;  %v4409_v43 = vpop.permute.xlu1 %4408  ;;  %vm19554_vm6 = vmmov %vm19552_vm14 }
 0x243   :  { %v4423_v23 = vsel %vm19552_vm14, %v4407_v27, %v4409_v43  ;;  %v4426_v19 = vsel %vm19554_vm6, %v4401_v8, %v4403_v45  ;;  %vm19559_vm14 = vnez %v19558_v40  ;;  %v19645_v40 = vld [vmem:[#allocation114_spill] sm:$0xff] }
 0x244   :  { %12837 = vmatmul.mubr.msk.f32.vlgmr.msra.gmra.mrb[2].mxu0 %vm17298_vm13, %v17315_v36  ;;  %v1809_v36 = vrot.slane %v17326_v49, %v18820_v59  ;;  %vm19556_vm13 = vnez %v19555_v15 }
 0x245   :  { %13358 = vmatpush1.bf16.xpose.msra.mxu0 %v19551_v30  ;;  %12838 = vmatprep.mubr.msk.f32.mxu0 %vm17309_vm11, %v17304_v13  ;;  %v3064_v13 = vrot.slane %v17326_v49, %v19557_v57  ;;  %v19560_v57 = vand.u32 63, %v16470_v5 }
 0x246   :  { %13360 = vmatprep.subr.bf16.mxu0 %v19553_v38  ;;  %v3126_v59 = vpop.permute.xlu1 %3125 }
 0x247   :  { %v1802_v12 = vpop.f32.mrb[0].mxu0  ;;  %vm17355_vm6 = vcmp.le.s32.totalorder %v19560_v57, 62  ;;  %v19582_v57 = vmov 0 }
 0x248   :  { %v1804_v62 = vpop.f32.mrb[1].mxu0  ;;  %12869 = vmatmul.mubr.msk.f32.vlgmr.msra.gmra.mrb[2].mxu1 %vm19556_vm13, %v4426_v19  ;;  %v1810_v45 = vmul.f32 %v1809_v36, %v1802_v12  ;;  %v3124_v19 = vpop.permute.xlu0 %3123 }
 0x249   :  { %13486 = vmatpush1.bf16.xpose.msra.mxu1 %v19551_v30  ;;  %12870 = vmatprep.mubr.msk.f32.mxu1 %vm19559_vm14, %v4423_v23  ;;  %v19561_v23 = vmov 0  ;;  %vm19564_vm14 = vcmp.lt.s32.totalorder %v15049_v34, 63 }
 0x24a   :  { %13488 = vmatprep.subr.bf16.mxu1 %v19553_v38  ;;  %v19562_v23 = vsel %vm17355_vm6, 4294967295, %v19561_v23  ;;  %v17361_v36 = vsel %vm19564_vm14, %v3124_v19, %v3126_v59  ;;  %vm19570_vm11 = vmmov %vm19564_vm14  ;;  %vm19572_vm14 = vcmp.lt.s32.totalorder %v15049_v34, 1 }
 0x24b   :  { %v3057_v8 = vpop.f32.mrb[0].mxu1  ;;  %19563 = vst [vmem:[#allocation188_spill] sm:$0xff] %v19562_v23  ;;  %19565 = vst [vmem:[#allocation189_spill] sm:$0xff] %v17361_v36  ;;  %v17373_v5 = vsel %vm19570_vm11, %v17250_v54, %v3120_v41  ;;  %v19575_v41 = vld [vmem:[#allocation196_spill] sm:$0xff] }
 0x24c   :  { %v3065_v51 = vmul.f32 %v3064_v13, %v3057_v8  ;;  %v3059_v32 = vpop.f32.mrb[1].mxu1  ;;  %19571 = vst [vmem:[#allocation232_spill] sm:$0xff] %v17373_v5  ;;  %v4411_v12 = vpop.permute.xlu0 %4410  ;;  %vm19573_vm11 = vmmov %vm19572_vm14 }
 0x24d   :  { %13362 = vmatpush1.bf16.xpose.msra.mxu0 %v16467_v7  ;;  %v19566_v32 = vand.u32 63, %v16477_v63  ;;  %v4413_v13 = vpop.permute.xlu1 %4412  ;;  %v4424_v54 = vsel %vm19573_vm11, %v4405_v46, %v4407_v27  ;;  %v19578_v27 = vmov 0  ;;  %v19581_v46 = vand.u32 63, %v16573_v52 }
 0x24e   :  { %v17349_v62 = vadd.f32 %v3065_v51, %v1810_v45  ;;  %13364 = vmatprep.subr.bf16.mxu0 %v16474_v21  ;;  %v19567_v51 = vmov 0  ;;  %v4421_v63 = vsel %vm19572_vm14, %v4411_v12, %v4413_v13  ;;  %v19577_v45 = vand.u32 63, %v16566_v60 }
 0x24f   :  { %vm17366_vm13 = vcmp.le.s32.totalorder %v19566_v32, 62  ;;  %vm17404_vm11 = vcmp.le.s32.totalorder %v19581_v46, 62  ;;  %v19603_v46 = vld [vmem:[#allocation6_spill] sm:$0xff] }
 0x250   :  { %v19568_v51 = vsel %vm17366_vm13, 4294967295, %v19567_v51  ;;  %v3128_v8 = vpop.permute.xlu0 %3127  ;;  %vm17398_vm14 = vcmp.le.s32.totalorder %v19577_v45, 62  ;;  %v19583_v57 = vsel %vm17404_vm11, 4294967295, %v19582_v57 }
 0x251   :  { %13490 = vmatpush1.bf16.xpose.msra.mxu1 %v16467_v7  ;;  %19569 = vst [vmem:[#allocation231_spill] sm:$0xff] %v19568_v51  ;;  %v19579_v27 = vsel %vm17398_vm14, 4294967295, %v19578_v27  ;;  %19584 = vst [vmem:[#allocation234_spill] sm:$0xff] %v19583_v57  ;;  %v19811_v57 = vld [vmem:[#allocation154_spill] sm:$0xff] }
 0x252   :  { %13492 = vmatprep.subr.bf16.mxu1 %v16474_v21  ;;  %19580 = vst [vmem:[#allocation233_spill] sm:$0xff] %v19579_v27 }
 0x254   :  { %12839 = vmatmul.mubr.msk.f32.vlgmr.msra.gmra.mrb[2].mxu0 %vm17355_vm6, %v17373_v5  ;;  %vm19576_vm6 = vnez %v19575_v41 }
 0x255   :  { %13366 = vmatpush1.bf16.xpose.msra.mxu0 %v16506_v37  ;;  %12840 = vmatprep.mubr.msk.f32.mxu0 %vm17366_vm13, %v17361_v36  ;;  %vm19591_vm13 = vnez %v19229_v3  ;;  %v19641_v3 = vld [vmem:[#allocation24_spill] sm:$0xff] }
 0x256   :  { %13368 = vmatprep.subr.bf16.mxu0 %v16510_v39 }
 0x258   :  { %12871 = vmatmul.mubr.msk.f32.vlgmr.msra.gmra.mrb[2].mxu1 %vm19574_vm1, %v4424_v54  ;;  %v19599_v54 = vld [vmem:[#allocation9_spill] sm:$0xff] }
 0x259   :  { %13494 = vmatpush1.bf16.xpose.msra.mxu1 %v16506_v37  ;;  %12872 = vmatprep.mubr.msk.f32.mxu1 %vm19576_vm6, %v4421_v63  ;;  %vm19585_vm6 = vcmp.lt.s32.totalorder %v15049_v34, 63  ;;  %v4415_v63 = vpop.permute.xlu1 %4414 }
 0x25a   :  { %13496 = vmatprep.subr.bf16.mxu1 %v16510_v39  ;;  %v17411_v32 = vsel %vm19585_vm6, %v3122_v48, %v3124_v19  ;;  %vm19587_vm1 = vmmov %vm19585_vm6  ;;  %vm19589_vm6 = vcmp.lt.s32.totalorder %v15049_v34, 1 }
 0x25b   :  { %19586 = vst [vmem:[#allocation235_spill] sm:$0xff] %v17411_v32  ;;  %v17416_v60 = vsel %vm19587_vm1, %v3128_v8, %v16681_v47  ;;  %v4422_v48 = vsel %vm19589_vm6, %v4409_v43, %v4411_v12  ;;  %vm19590_vm1 = vmmov %vm19589_vm6  ;;  %v19593_v43 = vand.u32 63, %v16666_v61  ;;  %v6738_v61 = vpop.permute.xlu0 %6737 }
 0x25c   :  { %19588 = vst [vmem:[#allocation236_spill] sm:$0xff] %v17416_v60  ;;  %v4419_v47 = vsel %vm19590_vm1, %v4415_v63, %v16738_v55  ;;  %v19594_v55 = vmov 0  ;;  %vm19597_vm1 = vcmp.lt.s32.totalorder %v15049_v34, 63 }
 0x25d   :  { %13370 = vmatpush1.bf16.xpose.msra.mxu0 %v16563_v0  ;;  %vm17442_vm6 = vcmp.le.s32.totalorder %v19593_v43, 62  ;;  %v17449_v19 = vsel %vm19597_vm1, %v3126_v59, %v3128_v8  ;;  %v6740_v12 = vpop.permute.xlu1 %6739  ;;  %vm19600_vm1 = vcmp.lt.s32.totalorder %v15049_v34, 1 }
 0x25e   :  { %13372 = vmatprep.subr.bf16.mxu0 %v16570_v22  ;;  %v19595_v55 = vsel %vm17442_vm6, 4294967295, %v19594_v55  ;;  %19598 = vst [vmem:[#allocation238_spill] sm:$0xff] %v17449_v19  ;;  %v4420_v59 = vsel %vm19600_vm1, %v4413_v13, %v4415_v63 }
 0x25f   :  { %19596 = vst [vmem:[#allocation237_spill] sm:$0xff] %v19595_v55  ;;  %v17470_v8 = vpop.permute.xlu0 %6735 }
 0x261   :  { %13498 = vmatpush1.bf16.xpose.msra.mxu1 %v16563_v0  ;;  %v6742_v63 = vpop.permute.xlu1 %6741 }
 0x262   :  { %13500 = vmatprep.subr.bf16.mxu1 %v16570_v22 }
 0x263   :  { %v6744_v13 = vpop.permute.xlu0 %6743 }
 0x264   :  { %12841 = vmatmul.mubr.msk.f32.vlgmr.msra.gmra.mrb[2].mxu0 %vm17398_vm14, %v17411_v32  ;;  %vm19592_vm14 = vnez %v19233_v44  ;;  %v19617_v32 = vld [vmem:[#allocation81_spill] sm:$0xff]  ;;  %v19635_v44 = vld [vmem:[#allocation102_spill] sm:$0xff] }
 0x265   :  { %13374 = vmatpush1.bf16.xpose.msra.mxu0 %v16606_v31  ;;  %12842 = vmatprep.mubr.msk.f32.mxu0 %vm17404_vm11, %v17416_v60  ;;  %v19624_v60 = vld [vmem:[#allocation20_spill] sm:$0xff]  ;;  %vm19636_vm1 = vnez %v19635_v44  ;;  %v19642_v44 = vld [vmem:[#allocation117_spill] sm:$0xff] }
 0x266   :  { %13376 = vmatprep.subr.bf16.mxu0 %v16615_v18 }
 0x268   :  { %12873 = vmatmul.mubr.msk.f32.vlgmr.msra.gmra.mrb[2].mxu1 %vm19591_vm13, %v4422_v48  ;;  %vm18878_vm13 = vcmp.lt.s32.totalorder %v15049_v34, 127  ;;  %v19604_v48 = vld [vmem:[#allocation12_spill] sm:$0xff] }
 0x269   :  { %13502 = vmatpush1.bf16.xpose.msra.mxu1 %v16606_v31  ;;  %12874 = vmatprep.mubr.msk.f32.mxu1 %vm19592_vm14, %v4419_v47  ;;  %v6829_v45 = vsel %vm18878_vm13, %v6738_v61, %v6740_v12  ;;  %vm19601_vm14 = vnez %v19245_v58  ;;  %v6827_v47 = vsel %vm18878_vm13, %v6742_v63, %v6744_v13  ;;  %v6830_v43 = vsel %vm18878_vm13, %v17470_v8, %v6738_v61  ;;  %v19605_v61 = vld [vmem:[#allocation10_spill] sm:$0xff] }
 0x26a   :  { %13504 = vmatprep.subr.bf16.mxu1 %v16615_v18 }
 0x26d   :  { %13378 = vmatpush1.bf16.xpose.msra.mxu0 %v16663_v50 }
 0x26e   :  { %13508 = vmatprep.subr.bf16.mxu0 %v14752_v11 }
 0x271   :  { %13506 = vmatpush1.bf16.xpose.msra.mxu1 %v16663_v50 }
 0x272   :  { %13636 = vmatprep.subr.bf16.mxu1 %v14752_v11 }
 0x274   :  { %12843 = vmatmul.mubr.msk.f32.vlgmr.msra.gmra.mrb[2].mxu0 %vm17442_vm6, %v17449_v19  ;;  %vm19602_vm6 = vnez %v19250_v33  ;;  %v19616_v19 = vld [vmem:[#allocation18_spill] sm:$0xff] }
 0x275   :  { %13510 = vmatpush1.bf16.xpose.msra.mxu0 %v14766_v16  ;;  %5673 = vmatprep.mubr.f32.mxu0 %v19599_v54  ;;  %v6748_v54 = vpop.permute.xlu0 %6747 }
 0x276   :  { %13512 = vmatprep.subr.bf16.mxu0 %v14770_v17 }
 0x278   :  { %12875 = vmatmul.mubr.msk.f32.vlgmr.msra.gmra.mrb[2].mxu1 %vm19601_vm14, %v4420_v59 }
 0x279   :  { %13638 = vmatpush1.bf16.xpose.msra.mxu1 %v14766_v16  ;;  %12876 = vmatprep.mubr.msk.f32.mxu1 %vm19602_vm6, %v6829_v45  ;;  %v6746_v45 = vpop.permute.xlu1 %6745 }
 0x27a   :  { %13640 = vmatprep.subr.bf16.mxu1 %v14770_v17  ;;  %v6825_v59 = vsel %vm18878_vm13, %v6746_v45, %v6748_v54 }
 0x27d   :  { %13514 = vmatpush1.bf16.xpose.msra.mxu0 %v14799_v25 }
 0x27e   :  { %13516 = vmatprep.subr.bf16.mxu0 %v19261_v28 }
 0x281   :  { %13642 = vmatpush1.bf16.xpose.msra.mxu1 %v14799_v25 }
 0x282   :  { %13644 = vmatprep.subr.bf16.mxu1 %v19261_v28 }
 0x284   :  { %5674 = vmatmul.mubr.f32.vlgmr.msra.gmra.mrb[4].mxu0 %v19603_v46  ;;  %v6828_v46 = vsel %vm18878_vm13, %v6740_v12, %v6742_v63  ;;  %v19606_v12 = vld [vmem:[#allocation13_spill] sm:$0xff]  ;;  %v6750_v63 = vpop.permute.xlu1 %6749 }
 0x285   :  { %13518 = vmatpush1.bf16.xpose.msra.mxu0 %v19272_v42  ;;  %5743 = vmatprep.mubr.f32.mxu0 %v19604_v48  ;;  %v19607_v48 = vld [vmem:[#allocation68_spill] sm:$0xff]  ;;  %v6824_v5 = vsel %vm18878_vm13, %v6748_v54, %v6750_v63  ;;  %v19622_v54 = vld [vmem:[#allocation17_spill] sm:$0xff] }
 0x286   :  { %13520 = vmatprep.subr.bf16.mxu0 %v19274_v4 }
 0x288   :  { %12877 = vmatmul.mubr.msk.f32.vlgmr.msra.gmra.mrb[4].mxu1 %vm16751_vm0, %v6830_v43  ;;  %v19609_v43 = vld [vmem:[#allocation69_spill] sm:$0xff] }
 0x289   :  { %13646 = vmatpush1.bf16.xpose.msra.mxu1 %v19272_v42  ;;  %12878 = vmatprep.mubr.msk.f32.mxu1 %vm16775_vm4, %v6827_v47  ;;  %v19608_v47 = vld [vmem:[#allocation16_spill] sm:$0xff] }
 0x28a   :  { %13648 = vmatprep.subr.bf16.mxu1 %v19274_v4 }
 0x28d   :  { %13522 = vmatpush1.bf16.xpose.msra.mxu0 %v19278_v26 }
 0x28e   :  { %13524 = vmatprep.subr.bf16.mxu0 %v19279_v10 }
 0x291   :  { %13650 = vmatpush1.bf16.xpose.msra.mxu1 %v19278_v26 }
 0x292   :  { %13652 = vmatprep.subr.bf16.mxu1 %v19279_v10 }
 0x294   :  { %5744 = vmatmul.mubr.f32.vlgmr.msra.gmra.mrb[4].mxu0 %v19605_v61 }
 0x295   :  { %13526 = vmatpush1.bf16.xpose.msra.mxu0 %v19293_v53  ;;  %5813 = vmatprep.mubr.f32.mxu0 %v14846_v35  ;;  %v6752_v35 = vpop.permute.xlu0 %6751 }
 0x296   :  { %13528 = vmatprep.subr.bf16.mxu0 %v19295_v9  ;;  %v6823_v61 = vsel %vm18878_vm13, %v6750_v63, %v6752_v35 }
 0x298   :  { %12879 = vmatmul.mubr.msk.f32.vlgmr.msra.gmra.mrb[4].mxu1 %vm16822_vm2, %v6828_v46  ;;  %v19625_v46 = vld [vmem:[#allocation93_spill] sm:$0xff] }
 0x299   :  { %13654 = vmatpush1.bf16.xpose.msra.mxu1 %v19293_v53  ;;  %12880 = vmatprep.mubr.msk.f32.mxu1 %vm16833_vm3, %v6825_v59  ;;  %v6826_v59 = vsel %vm18878_vm13, %v6744_v13, %v6746_v45  ;;  %v6756_v36 = vpop.permute.xlu0 %6755  ;;  %v19614_v13 = vld [vmem:[#allocation15_spill] sm:$0xff]  ;;  %v6754_v45 = vpop.permute.xlu1 %6753 }
 0x29a   :  { %13656 = vmatprep.subr.bf16.mxu1 %v19295_v9  ;;  %v6822_v14 = vsel %vm18878_vm13, %v6752_v35, %v6754_v45  ;;  %v19630_v35 = vld [vmem:[#allocation19_spill] sm:$0xff] }
 0x29d   :  { %13530 = vmatpush1.bf16.xpose.msra.mxu0 %v19300_v24  ;;  %v6760_v2 = vpop.permute.xlu0 %6759  ;;  %v6758_v63 = vpop.permute.xlu1 %6757 }
 0x29e   :  { %13532 = vmatprep.subr.bf16.mxu0 %v19301_v6  ;;  %v6820_v58 = vsel %vm18878_vm13, %v6756_v36, %v6758_v63 }
 0x2a1   :  { %13658 = vmatpush1.bf16.xpose.msra.mxu1 %v19300_v24  ;;  %v6764_v33 = vpop.permute.xlu0 %6763 }
 0x2a2   :  { %13660 = vmatprep.subr.bf16.mxu1 %v19301_v6 }
 0x2a4   :  { %5814 = vmatmul.mubr.f32.vlgmr.msra.gmra.mrb[4].mxu0 %v19606_v12  ;;  %v19612_v12 = vld [vmem:[#allocation75_spill] sm:$0xff] }
 0x2a5   :  { %13534 = vmatpush1.bf16.xpose.msra.mxu0 %v19607_v48  ;;  %5883 = vmatprep.mubr.f32.mxu0 %v19608_v47  ;;  %v19613_v47 = vld [vmem:[#allocation77_spill] sm:$0xff]  ;;  %v6768_v52 = vpop.permute.xlu0 %6767 }
 0x2a6   :  { %13536 = vmatprep.subr.bf16.mxu0 %v19609_v43 }
 0x2a8   :  { %12881 = vmatmul.mubr.msk.f32.vlgmr.msra.gmra.mrb[4].mxu1 %vm16874_vm5, %v6826_v59  ;;  %v19615_v59 = vld [vmem:[#allocation80_spill] sm:$0xff] }
 0x2a9   :  { %13662 = vmatpush1.bf16.xpose.msra.mxu1 %v19607_v48  ;;  %12882 = vmatprep.mubr.msk.f32.mxu1 %vm16885_vm8, %v6823_v61  ;;  %v6821_v61 = vsel %vm18878_vm13, %v6754_v45, %v6756_v36  ;;  %v6762_v45 = vpop.permute.xlu1 %6761  ;;  %v19639_v36 = vld [vmem:[#allocation21_spill] sm:$0xff]  ;;  %v6772_v15 = vpop.permute.xlu0 %6771 }
 0x2aa   :  { %13664 = vmatprep.subr.bf16.mxu1 %v19609_v43  ;;  %v6818_v41 = vsel %vm18878_vm13, %v6760_v2, %v6762_v45 }
 0x2ad   :  { %13538 = vmatpush1.bf16.xpose.msra.mxu0 %v19612_v12 }
 0x2ae   :  { %13540 = vmatprep.subr.bf16.mxu0 %v19613_v47 }
 0x2b1   :  { %13666 = vmatpush1.bf16.xpose.msra.mxu1 %v19612_v12 }
 0x2b2   :  { %13668 = vmatprep.subr.bf16.mxu1 %v19613_v47 }
 0x2b4   :  { %5884 = vmatmul.mubr.f32.vlgmr.msra.gmra.mrb[4].mxu0 %v19614_v13  ;;  %v19620_v13 = vld [vmem:[#allocation87_spill] sm:$0xff] }
 0x2b5   :  { %13542 = vmatpush1.bf16.xpose.msra.mxu0 %v19615_v59  ;;  %5953 = vmatprep.mubr.f32.mxu0 %v19616_v19  ;;  %v19621_v19 = vld [vmem:[#allocation89_spill] sm:$0xff] }
 0x2b6   :  { %13544 = vmatprep.subr.bf16.mxu0 %v19617_v32 }
 0x2b8   :  { %12883 = vmatmul.mubr.msk.f32.vlgmr.msra.gmra.mrb[4].mxu1 %vm16917_vm15, %v6824_v5  ;;  %v19623_v5 = vld [vmem:[#allocation92_spill] sm:$0xff] }
 0x2b9   :  { %13670 = vmatpush1.bf16.xpose.msra.mxu1 %v19615_v59  ;;  %12884 = vmatprep.mubr.msk.f32.mxu1 %vm16928_vm10, %v6821_v61  ;;  %v6819_v61 = vsel %vm18878_vm13, %v6758_v63, %v6760_v2  ;;  %v6766_v63 = vpop.permute.xlu1 %6765  ;;  %v19649_v2 = vld [vmem:[#allocation23_spill] sm:$0xff] }
 0x2ba   :  { %13672 = vmatprep.subr.bf16.mxu1 %v19617_v32 }
 0x2bd   :  { %13546 = vmatpush1.bf16.xpose.msra.mxu0 %v19620_v13 }
 0x2be   :  { %13548 = vmatprep.subr.bf16.mxu0 %v19621_v19 }
 0x2c1   :  { %13674 = vmatpush1.bf16.xpose.msra.mxu1 %v19620_v13 }
 0x2c2   :  { %13676 = vmatprep.subr.bf16.mxu1 %v19621_v19 }
 0x2c4   :  { %5954 = vmatmul.mubr.f32.vlgmr.msra.gmra.mrb[4].mxu0 %v19622_v54  ;;  %v19628_v54 = vld [vmem:[#allocation99_spill] sm:$0xff] }
 0x2c5   :  { %13550 = vmatpush1.bf16.xpose.msra.mxu0 %v19623_v5  ;;  %6023 = vmatprep.mubr.f32.mxu0 %v19624_v60  ;;  %v19629_v60 = vld [vmem:[#allocation101_spill] sm:$0xff] }
 0x2c6   :  { %13552 = vmatprep.subr.bf16.mxu0 %v19625_v46 }
 0x2c8   :  { %12885 = vmatmul.mubr.msk.f32.vlgmr.msra.gmra.mrb[4].mxu1 %vm16959_vm7, %v6822_v14  ;;  %v19631_v14 = vld [vmem:[#allocation104_spill] sm:$0xff] }
 0x2c9   :  { %13678 = vmatpush1.bf16.xpose.msra.mxu1 %v19623_v5  ;;  %12886 = vmatprep.mubr.msk.f32.mxu1 %vm16970_vm12, %v6819_v61  ;;  %v6817_v61 = vsel %vm18878_vm13, %v6762_v45, %v6764_v33  ;;  %v6770_v45 = vpop.permute.xlu1 %6769 }
 0x2ca   :  { %13680 = vmatprep.subr.bf16.mxu1 %v19625_v46 }
 0x2cd   :  { %13554 = vmatpush1.bf16.xpose.msra.mxu0 %v19628_v54 }
 0x2ce   :  { %13556 = vmatprep.subr.bf16.mxu0 %v19629_v60 }
 0x2d1   :  { %13682 = vmatpush1.bf16.xpose.msra.mxu1 %v19628_v54 }
 0x2d2   :  { %13684 = vmatprep.subr.bf16.mxu1 %v19629_v60 }
 0x2d4   :  { %6024 = vmatmul.mubr.f32.vlgmr.msra.gmra.mrb[4].mxu0 %v19630_v35  ;;  %v19637_v35 = vld [vmem:[#allocation111_spill] sm:$0xff] }
 0x2d5   :  { %13558 = vmatpush1.bf16.xpose.msra.mxu0 %v19631_v14  ;;  %6093 = vmatprep.mubr.f32.mxu0 %v19632_v1  ;;  %v19638_v1 = vld [vmem:[#allocation113_spill] sm:$0xff] }
 0x2d6   :  { %13560 = vmatprep.subr.bf16.mxu0 %v19633_v29 }
 0x2d8   :  { %12887 = vmatmul.mubr.msk.f32.vlgmr.msra.gmra.mrb[4].mxu1 %vm17001_vm9, %v6820_v58  ;;  %v19640_v58 = vld [vmem:[#allocation116_spill] sm:$0xff]  ;;  %vm19646_vm9 = vnez %v19645_v40  ;;  %v19652_v40 = vld [vmem:[#allocation129_spill] sm:$0xff] }
 0x2d9   :  { %13686 = vmatpush1.bf16.xpose.msra.mxu1 %v19631_v14  ;;  %12888 = vmatprep.mubr.msk.f32.mxu1 %vm19636_vm1, %v6817_v61  ;;  %v6815_v61 = vsel %vm18878_vm13, %v6766_v63, %v6768_v52  ;;  %vm19644_vm1 = vnez %v19643_v20  ;;  %v19651_v20 = vld [vmem:[#allocation26_spill] sm:$0xff] }
 0x2da   :  { %13688 = vmatprep.subr.bf16.mxu1 %v19633_v29 }
 0x2dd   :  { %13562 = vmatpush1.bf16.xpose.msra.mxu0 %v19637_v35 }
 0x2de   :  { %13564 = vmatprep.subr.bf16.mxu0 %v19638_v1 }
 0x2e1   :  { %13690 = vmatpush1.bf16.xpose.msra.mxu1 %v19637_v35 }
 0x2e2   :  { %13692 = vmatprep.subr.bf16.mxu1 %v19638_v1  ;;  %v19701_v1 = vld [vmem:[#allocation184_spill] sm:$0xff] }
 0x2e4   :  { %6094 = vmatmul.mubr.f32.vlgmr.msra.gmra.mrb[4].mxu0 %v19639_v36  ;;  %v19647_v36 = vld [vmem:[#allocation123_spill] sm:$0xff] }
 0x2e5   :  { %13566 = vmatpush1.bf16.xpose.msra.mxu0 %v19640_v58  ;;  %6163 = vmatprep.mubr.f32.mxu0 %v19641_v3  ;;  %v19648_v3 = vld [vmem:[#allocation125_spill] sm:$0xff] }
 0x2e6   :  { %13568 = vmatprep.subr.bf16.mxu0 %v19642_v44 }
 0x2e8   :  { %12889 = vmatmul.mubr.msk.f32.vlgmr.msra.gmra.mrb[4].mxu1 %vm19644_vm1, %v6818_v41  ;;  %v19650_v41 = vld [vmem:[#allocation128_spill] sm:$0xff] }
 0x2e9   :  { %13694 = vmatpush1.bf16.xpose.msra.mxu1 %v19640_v58  ;;  %12890 = vmatprep.mubr.msk.f32.mxu1 %vm19646_vm9, %v6815_v61  ;;  %v6813_v61 = vsel %vm18878_vm13, %v6770_v45, %v6772_v15  ;;  %v19653_v58 = vld [vmem:[#allocation124_spill] sm:$0xff] }
 0x2ea   :  { %13696 = vmatprep.subr.bf16.mxu1 %v19642_v44  ;;  %v6816_v44 = vsel %vm18878_vm13, %v6764_v33, %v6766_v63  ;;  %vm19654_vm9 = vnez %v19653_v58  ;;  %v19659_v33 = vld [vmem:[#allocation25_spill] sm:$0xff]  ;;  %v6774_v63 = vpop.permute.xlu1 %6773  ;;  %v19661_v58 = vld [vmem:[#allocation28_spill] sm:$0xff] }
 0x2ed   :  { %13570 = vmatpush1.bf16.xpose.msra.mxu0 %v19647_v36 }
 0x2ee   :  { %13572 = vmatprep.subr.bf16.mxu0 %v19648_v3 }
 0x2f1   :  { %13698 = vmatpush1.bf16.xpose.msra.mxu1 %v19647_v36  ;;  %v6776_v36 = vpop.permute.xlu0 %6775 }
 0x2f2   :  { %13700 = vmatprep.subr.bf16.mxu1 %v19648_v3  ;;  %v19655_v3 = vld [vmem:[#allocation126_spill] sm:$0xff] }
 0x2f3   :  { %vm19656_vm1 = vnez %v19655_v3  ;;  %v19662_v3 = vld [vmem:[#allocation141_spill] sm:$0xff] }
 0x2f4   :  { %6164 = vmatmul.mubr.f32.vlgmr.msra.gmra.mrb[4].mxu0 %v19649_v2  ;;  %v19657_v2 = vld [vmem:[#allocation135_spill] sm:$0xff] }
 0x2f5   :  { %13574 = vmatpush1.bf16.xpose.msra.mxu0 %v19650_v41  ;;  %6233 = vmatprep.mubr.f32.mxu0 %v19651_v20  ;;  %v19658_v20 = vld [vmem:[#allocation137_spill] sm:$0xff] }
 0x2f6   :  { %13576 = vmatprep.subr.bf16.mxu0 %v19652_v40 }
 0x2f8   :  { %12891 = vmatmul.mubr.msk.f32.vlgmr.msra.gmra.mrb[4].mxu1 %vm19654_vm9, %v6816_v44  ;;  %v19660_v44 = vld [vmem:[#allocation140_spill] sm:$0xff] }
 0x2f9   :  { %13702 = vmatpush1.bf16.xpose.msra.mxu1 %v19650_v41  ;;  %12892 = vmatprep.mubr.msk.f32.mxu1 %vm19656_vm1, %v6813_v61  ;;  %v6811_v61 = vsel %vm18878_vm13, %v6774_v63, %v6776_v36  ;;  %v19663_v41 = vld [vmem:[#allocation136_spill] sm:$0xff] }
 0x2fa   :  { %13704 = vmatprep.subr.bf16.mxu1 %v19652_v40  ;;  %v6814_v40 = vsel %vm18878_vm13, %v6768_v52, %v6770_v45  ;;  %vm19664_vm1 = vnez %v19663_v41  ;;  %v19669_v52 = vld [vmem:[#allocation27_spill] sm:$0xff]  ;;  %v6778_v45 = vpop.permute.xlu1 %6777  ;;  %v19671_v41 = vld [vmem:[#allocation30_spill] sm:$0xff] }
 0x2fd   :  { %13578 = vmatpush1.bf16.xpose.msra.mxu0 %v19657_v2 }
 0x2fe   :  { %13580 = vmatprep.subr.bf16.mxu0 %v19658_v20 }
 0x301   :  { %13706 = vmatpush1.bf16.xpose.msra.mxu1 %v19657_v2  ;;  %v6780_v2 = vpop.permute.xlu0 %6779 }
 0x302   :  { %13708 = vmatprep.subr.bf16.mxu1 %v19658_v20  ;;  %v19665_v20 = vld [vmem:[#allocation138_spill] sm:$0xff] }
 0x303   :  { %vm19666_vm9 = vnez %v19665_v20  ;;  %v19672_v20 = vld [vmem:[#allocation153_spill] sm:$0xff] }
 0x304   :  { %6234 = vmatmul.mubr.f32.vlgmr.msra.gmra.mrb[4].mxu0 %v19659_v33  ;;  %v19667_v33 = vld [vmem:[#allocation147_spill] sm:$0xff] }
 0x305   :  { %13582 = vmatpush1.bf16.xpose.msra.mxu0 %v19660_v44  ;;  %6303 = vmatprep.mubr.f32.mxu0 %v19661_v58  ;;  %v19668_v58 = vld [vmem:[#allocation149_spill] sm:$0xff] }
 0x306   :  { %13584 = vmatprep.subr.bf16.mxu0 %v19662_v3 }
 0x308   :  { %12893 = vmatmul.mubr.msk.f32.vlgmr.msra.gmra.mrb[4].mxu1 %vm19664_vm1, %v6814_v40  ;;  %v19670_v40 = vld [vmem:[#allocation152_spill] sm:$0xff] }
 0x309   :  { %13710 = vmatpush1.bf16.xpose.msra.mxu1 %v19660_v44  ;;  %12894 = vmatprep.mubr.msk.f32.mxu1 %vm19666_vm9, %v6811_v61  ;;  %v6809_v61 = vsel %vm18878_vm13, %v6778_v45, %v6780_v2  ;;  %v19673_v44 = vld [vmem:[#allocation148_spill] sm:$0xff] }
 0x30a   :  { %13712 = vmatprep.subr.bf16.mxu1 %v19662_v3  ;;  %v6812_v3 = vsel %vm18878_vm13, %v6772_v15, %v6774_v63  ;;  %vm19674_vm9 = vnez %v19673_v44  ;;  %v19679_v15 = vld [vmem:[#allocation29_spill] sm:$0xff]  ;;  %v6782_v63 = vpop.permute.xlu1 %6781  ;;  %v19681_v44 = vld [vmem:[#allocation32_spill] sm:$0xff] }
 0x30d   :  { %13586 = vmatpush1.bf16.xpose.msra.mxu0 %v19667_v33 }
 0x30e   :  { %13588 = vmatprep.subr.bf16.mxu0 %v19668_v58 }
 0x311   :  { %13714 = vmatpush1.bf16.xpose.msra.mxu1 %v19667_v33  ;;  %v6784_v33 = vpop.permute.xlu0 %6783 }
 0x312   :  { %13716 = vmatprep.subr.bf16.mxu1 %v19668_v58  ;;  %v19675_v58 = vld [vmem:[#allocation150_spill] sm:$0xff] }
 0x313   :  { %vm19676_vm1 = vnez %v19675_v58  ;;  %v19682_v58 = vld [vmem:[#allocation165_spill] sm:$0xff] }
 0x314   :  { %6304 = vmatmul.mubr.f32.vlgmr.msra.gmra.mrb[4].mxu0 %v19669_v52  ;;  %v19677_v52 = vld [vmem:[#allocation159_spill] sm:$0xff] }
 0x315   :  { %13590 = vmatpush1.bf16.xpose.msra.mxu0 %v19670_v40  ;;  %6373 = vmatprep.mubr.f32.mxu0 %v19671_v41  ;;  %v19678_v41 = vld [vmem:[#allocation161_spill] sm:$0xff] }
 0x316   :  { %13592 = vmatprep.subr.bf16.mxu0 %v19672_v20 }
 0x318   :  { %12895 = vmatmul.mubr.msk.f32.vlgmr.msra.gmra.mrb[4].mxu1 %vm19674_vm9, %v6812_v3  ;;  %v19680_v3 = vld [vmem:[#allocation164_spill] sm:$0xff] }
 0x319   :  { %13718 = vmatpush1.bf16.xpose.msra.mxu1 %v19670_v40  ;;  %12896 = vmatprep.mubr.msk.f32.mxu1 %vm19676_vm1, %v6809_v61  ;;  %v6807_v61 = vsel %vm18878_vm13, %v6782_v63, %v6784_v33  ;;  %v19683_v40 = vld [vmem:[#allocation160_spill] sm:$0xff] }
 0x31a   :  { %13720 = vmatprep.subr.bf16.mxu1 %v19672_v20  ;;  %v6810_v20 = vsel %vm18878_vm13, %v6776_v36, %v6778_v45  ;;  %vm19684_vm1 = vnez %v19683_v40  ;;  %v19689_v36 = vld [vmem:[#allocation31_spill] sm:$0xff]  ;;  %v6786_v45 = vpop.permute.xlu1 %6785  ;;  %v19691_v40 = vld [vmem:[#allocation34_spill] sm:$0xff] }
 0x31d   :  { %13594 = vmatpush1.bf16.xpose.msra.mxu0 %v19677_v52 }
 0x31e   :  { %13596 = vmatprep.subr.bf16.mxu0 %v19678_v41 }
 0x321   :  { %13722 = vmatpush1.bf16.xpose.msra.mxu1 %v19677_v52  ;;  %v6788_v52 = vpop.permute.xlu0 %6787 }
 0x322   :  { %13724 = vmatprep.subr.bf16.mxu1 %v19678_v41  ;;  %v19685_v41 = vld [vmem:[#allocation162_spill] sm:$0xff] }
 0x323   :  { %vm19686_vm9 = vnez %v19685_v41  ;;  %v19692_v41 = vld [vmem:[#allocation177_spill] sm:$0xff] }
 0x324   :  { %6374 = vmatmul.mubr.f32.vlgmr.msra.gmra.mrb[4].mxu0 %v19679_v15  ;;  %v19687_v15 = vld [vmem:[#allocation171_spill] sm:$0xff] }
 0x325   :  { %13598 = vmatpush1.bf16.xpose.msra.mxu0 %v19680_v3  ;;  %6443 = vmatprep.mubr.f32.mxu0 %v19681_v44  ;;  %v19688_v44 = vld [vmem:[#allocation173_spill] sm:$0xff] }
 0x326   :  { %13600 = vmatprep.subr.bf16.mxu0 %v19682_v58 }
 0x328   :  { %12897 = vmatmul.mubr.msk.f32.vlgmr.msra.gmra.mrb[4].mxu1 %vm19684_vm1, %v6810_v20  ;;  %v19690_v20 = vld [vmem:[#allocation176_spill] sm:$0xff] }
 0x329   :  { %13726 = vmatpush1.bf16.xpose.msra.mxu1 %v19680_v3  ;;  %12898 = vmatprep.mubr.msk.f32.mxu1 %vm19686_vm9, %v6807_v61  ;;  %v6805_v61 = vsel %vm18878_vm13, %v6786_v45, %v6788_v52  ;;  %v19693_v3 = vld [vmem:[#allocation172_spill] sm:$0xff] }
 0x32a   :  { %13728 = vmatprep.subr.bf16.mxu1 %v19682_v58  ;;  %v6808_v58 = vsel %vm18878_vm13, %v6780_v2, %v6782_v63  ;;  %vm19694_vm9 = vnez %v19693_v3  ;;  %v6792_v2 = vpop.permute.xlu0 %6791  ;;  %v19699_v63 = vld [vmem:[#allocation33_spill] sm:$0xff]  ;;  %v19700_v3 = vld [vmem:[#allocation36_spill] sm:$0xff] }
 0x32d   :  { %13602 = vmatpush1.bf16.xpose.msra.mxu0 %v19687_v15 }
 0x32e   :  { %13604 = vmatprep.subr.bf16.mxu0 %v19688_v44 }
 0x331   :  { %13730 = vmatpush1.bf16.xpose.msra.mxu1 %v19687_v15  ;;  %v4350_v15 = vsub.s32 2, %v19550_v56 }
 0x332   :  { %13732 = vmatprep.subr.bf16.mxu1 %v19688_v44  ;;  %v19695_v44 = vld [vmem:[#allocation174_spill] sm:$0xff] }
 0x333   :  { %vm19696_vm1 = vnez %v19695_v44  ;;  %v5605_v44 = vsub.s32 3, %v19550_v56  ;;  %v19703_v56 = vld [vmem:[#allocation186_spill] sm:$0xff] }
 0x334   :  { %6444 = vmatmul.mubr.f32.vlgmr.msra.gmra.mrb[4].mxu0 %v19689_v36  ;;  %v19697_v36 = vld [vmem:[#allocation183_spill] sm:$0xff] }
 0x335   :  { %13606 = vmatpush1.bf16.xpose.msra.mxu0 %v19690_v20  ;;  %6513 = vmatprep.mubr.f32.mxu0 %v19691_v40  ;;  %v19698_v40 = vld [vmem:[#allocation185_spill] sm:$0xff] }
 0x336   :  { %13608 = vmatprep.subr.bf16.mxu0 %v19692_v41 }
 0x338   :  { %12899 = vmatmul.mubr.msk.f32.vlgmr.msra.gmra.mrb[4].mxu1 %vm19694_vm9, %v6808_v58  ;;  %v4351_v58 = vrot.slane %v17326_v49, %v4350_v15  ;;  %v5606_v15 = vrot.slane %v17326_v49, %v5605_v44  ;;  %vm19704_vm9 = vnez %v19703_v56  ;;  %v6796_v44 = vpop.permute.xlu0 %6795  ;;  %v19816_v56 = vld [vmem:[#allocation159_spill] sm:$0xff] }
 0x339   :  { %13734 = vmatpush1.bf16.xpose.msra.mxu1 %v19690_v20  ;;  %12900 = vmatprep.mubr.msk.f32.mxu1 %vm19696_vm1, %v6805_v61  ;;  %v6790_v61 = vpop.permute.xlu1 %6789  ;;  %vm19702_vm1 = vnez %v19701_v1  ;;  %v19823_v1 = vld [vmem:[#allocation166_spill] sm:$0xff] }
 0x33a   :  { %13736 = vmatprep.subr.bf16.mxu1 %v19692_v41  ;;  %v6803_v41 = vsel %vm18878_vm13, %v6790_v61, %v6792_v2 }
 0x33d   :  { %13610 = vmatpush1.bf16.xpose.msra.mxu0 %v19697_v36 }
 0x33e   :  { %13612 = vmatprep.subr.bf16.mxu0 %v19698_v40 }
 0x341   :  { %13738 = vmatpush1.bf16.xpose.msra.mxu1 %v19697_v36 }
 0x342   :  { %13740 = vmatprep.subr.bf16.mxu1 %v19698_v40  ;;  %v6806_v40 = vsel %vm18878_vm13, %v6784_v33, %v6786_v45 }
 0x344   :  { %6514 = vmatmul.mubr.f32.vlgmr.msra.gmra.mrb[4].mxu0 %v19699_v63 }
 0x345   :  { %13614 = vmatpush1.bf16.xpose.msra.mxu0 %v19551_v30  ;;  %6583 = vmatprep.mubr.f32.mxu0 %v19700_v3 }
 0x346   :  { %13616 = vmatprep.subr.bf16.mxu0 %v19553_v38 }
 0x347   :  { %v4344_v36 = vpop.f32.mrb[2].mxu0 }
 0x348   :  { %v4352_v20 = vmul.f32 %v4351_v58, %v4344_v36  ;;  %v4346_v63 = vpop.f32.mrb[3].mxu0  ;;  %12901 = vmatmul.mubr.msk.f32.vlgmr.msra.gmra.mrb[4].mxu1 %vm19702_vm1, %v6806_v40  ;;  %v19705_v36 = vld [vmem:[#allocation35_spill] sm:$0xff]  ;;  %vm19708_vm1 = vnez %v19568_v51  ;;  %v19710_v40 = vld [vmem:[#allocation8_spill] sm:$0xff]  ;;  %v19814_v51 = vld [vmem:[#allocation145_spill] sm:$0xff] }
 0x349   :  { %13742 = vmatpush1.bf16.xpose.msra.mxu1 %v19551_v30  ;;  %12902 = vmatprep.mubr.msk.f32.mxu1 %vm19704_vm9, %v6803_v41  ;;  %v6794_v41 = vpop.permute.xlu1 %6793  ;;  %vm19707_vm9 = vnez %v19562_v23  ;;  %v19714_v63 = vld [vmem:[#allocation40_spill] sm:$0xff]  ;;  %v19815_v23 = vld [vmem:[#allocation182_spill] sm:$0xff] }
 0x34a   :  { %v4353_v3 = vadd.f32 %v4352_v20, %v17349_v62  ;;  %13744 = vmatprep.subr.bf16.mxu1 %v19553_v38  ;;  %v19706_v62 = vld [vmem:[#allocation37_spill] sm:$0xff]  ;;  %v19709_v20 = vld [vmem:[#allocation11_spill] sm:$0xff]  ;;  %v6802_v58 = vsel %vm18878_vm13, %v6792_v2, %v6794_v41 }
 0x34b   :  { %v5599_v35 = vpop.f32.mrb[2].mxu1  ;;  %v19712_v2 = vld [vmem:[#allocation7_spill] sm:$0xff] }
 0x34c   :  { %v5607_v29 = vmul.f32 %v5606_v15, %v5599_v35  ;;  %v5601_v33 = vpop.f32.mrb[3].mxu1  ;;  %v6804_v35 = vsel %vm18878_vm13, %v6788_v52, %v6790_v61 }
 0x34d   :  { %13618 = vmatpush1.bf16.xpose.msra.mxu0 %v16467_v7  ;;  %v6798_v52 = vpop.permute.xlu1 %6797  ;;  %v19719_v33 = vld [vmem:[#allocation43_spill] sm:$0xff] }
 0x34e   :  { %v17711_v45 = vadd.f32 %v5607_v29, %v4353_v3  ;;  %13620 = vmatprep.subr.bf16.mxu0 %v16474_v21  ;;  %v6801_v29 = vsel %vm18878_vm13, %v6794_v41, %v6796_v44  ;;  %v6831_v61 = vsel %vm18878_vm13, %v6798_v52, %v17470_v8  ;;  %v19713_v8 = vld [vmem:[#allocation60_spill] sm:$0xff]  ;;  %vm19715_vm13 = vnez %v19714_v63  ;;  %v19718_v3 = vld [vmem:[#allocation62_spill] sm:$0xff] }
 0x34f   :  { %v19723_v41 = vld [vmem:[#allocation48_spill] sm:$0xff] }
 0x350   :  { %v19738_v63 = vld [vmem:[#allocation96_spill] sm:$0xff] }
 0x351   :  { %13746 = vmatpush1.bf16.xpose.msra.mxu1 %v16467_v7 }
 0x352   :  { %13748 = vmatprep.subr.bf16.mxu1 %v16474_v21 }
 0x354   :  { %6584 = vmatmul.mubr.f32.vlgmr.msra.gmra.mrb[4].mxu0 %v19705_v36  ;;  %v19720_v36 = vld [vmem:[#allocation39_spill] sm:$0xff] }
 0x355   :  { %13622 = vmatpush1.bf16.xpose.msra.mxu0 %v16506_v37  ;;  %6653 = vmatprep.mubr.f32.mxu0 %v19706_v62  ;;  %v19725_v62 = vld [vmem:[#allocation46_spill] sm:$0xff] }
 0x356   :  { %13624 = vmatprep.subr.bf16.mxu0 %v16510_v39 }
 0x358   :  { %12903 = vmatmul.mubr.msk.f32.vlgmr.msra.gmra.mrb[4].mxu1 %vm19707_vm9, %v6804_v35  ;;  %v19727_v35 = vld [vmem:[#allocation51_spill] sm:$0xff] }
 0x359   :  { %13750 = vmatpush1.bf16.xpose.msra.mxu1 %v16506_v37  ;;  %12904 = vmatprep.mubr.msk.f32.mxu1 %vm19708_vm1, %v6801_v29  ;;  %vm19711_vm1 = vnez %v19579_v27  ;;  %v19726_v29 = vld [vmem:[#allocation74_spill] sm:$0xff]  ;;  %v19804_v27 = vld [vmem:[#allocation147_spill] sm:$0xff] }
 0x35a   :  { %13752 = vmatprep.subr.bf16.mxu1 %v16510_v39 }
 0x35d   :  { %13626 = vmatpush1.bf16.xpose.msra.mxu0 %v16563_v0 }
 0x35e   :  { %13628 = vmatprep.subr.bf16.mxu0 %v16570_v22 }
 0x361   :  { %13754 = vmatpush1.bf16.xpose.msra.mxu1 %v16563_v0 }
 0x362   :  { %13756 = vmatprep.subr.bf16.mxu1 %v16570_v22 }
 0x364   :  { %6654 = vmatmul.mubr.f32.vlgmr.msra.gmra.mrb[4].mxu0 %v19709_v20  ;;  %v19728_v20 = vld [vmem:[#allocation55_spill] sm:$0xff] }
 0x365   :  { %13630 = vmatpush1.bf16.xpose.msra.mxu0 %v16606_v31  ;;  %6723 = vmatprep.mubr.f32.mxu0 %v19710_v40  ;;  %v19731_v40 = vld [vmem:[#allocation58_spill] sm:$0xff] }
 0x366   :  { %13632 = vmatprep.subr.bf16.mxu0 %v16615_v18 }
 0x368   :  { %12905 = vmatmul.mubr.msk.f32.vlgmr.msra.gmra.mrb[4].mxu1 %vm19711_vm1, %v6802_v58  ;;  %vm19716_vm1 = vcmp.lt.s32.totalorder %v15049_v34, 127  ;;  %v19733_v58 = vld [vmem:[#allocation54_spill] sm:$0xff]  ;;  %v19802_v34 = vld [vmem:[#allocation133_spill] sm:$0xff] }
 0x369   :  { %13758 = vmatpush1.bf16.xpose.msra.mxu1 %v16606_v31  ;;  %12906 = vmatprep.mubr.msk.f32.mxu1 %vm17404_vm11, %v6831_v61  ;;  %v6800_v15 = vsel %vm19716_vm1, %v6796_v44, %v6798_v52  ;;  %vm19717_vm11 = vnez %v19595_v55  ;;  %v19722_v44 = vld [vmem:[#allocation72_spill] sm:$0xff]  ;;  %vm19724_vm1 = vnez %v19723_v41  ;;  %v19734_v61 = vld [vmem:[#allocation86_spill] sm:$0xff] }
 0x36a   :  { %13760 = vmatprep.subr.bf16.mxu1 %v16615_v18  ;;  %v19730_v52 = vld [vmem:[#allocation84_spill] sm:$0xff]  ;;  %v19803_v55 = vld [vmem:[#allocation170_spill] sm:$0xff] }
 0x36b   :  { %v19746_v41 = vld [vmem:[#allocation108_spill] sm:$0xff] }
 0x36d   :  { %13634 = vmatpush1.bf16.xpose.msra.mxu0 %v16663_v50 }
 0x36e   :  { %13764 = vmatprep.subr.bf16.mxu0 %v14752_v11 }
 0x371   :  { %13762 = vmatpush1.bf16.xpose.msra.mxu1 %v16663_v50 }
 0x372   :  { %13892 = vmatprep.subr.bf16.mxu1 %v14752_v11 }
 0x374   :  { %6724 = vmatmul.mubr.f32.vlgmr.msra.gmra.mrb[4].mxu0 %v19712_v2  ;;  %v19735_v2 = vld [vmem:[#allocation59_spill] sm:$0xff] }
 0x375   :  { %13766 = vmatpush1.bf16.xpose.msra.mxu0 %v14766_v16  ;;  %12908 = vmatprep.mubr.msk.f32.mxu0 %vm19715_vm13, %v19713_v8  ;;  %vm19721_vm13 = vnez %v19720_v36  ;;  %v19736_v8 = vld [vmem:[#allocation67_spill] sm:$0xff] }
 0x376   :  { %13768 = vmatprep.subr.bf16.mxu0 %v14770_v17  ;;  %v19743_v36 = vld [vmem:[#allocation71_spill] sm:$0xff] }
 0x378   :  { %12907 = vmatmul.mubr.msk.f32.vlgmr.msra.gmra.mrb[4].mxu1 %vm19717_vm11, %v6800_v15  ;;  %v19739_v15 = vld [vmem:[#allocation70_spill] sm:$0xff] }
 0x379   :  { %13894 = vmatpush1.bf16.xpose.msra.mxu1 %v14766_v16  ;;  %9276 = vmatprep.mubr.f32.mxu1 %v19718_v3  ;;  %v19741_v3 = vld [vmem:[#allocation61_spill] sm:$0xff] }
 0x37a   :  { %13896 = vmatprep.subr.bf16.mxu1 %v14770_v17 }
 0x37d   :  { %13770 = vmatpush1.bf16.xpose.msra.mxu0 %v14799_v25 }
 0x37e   :  { %13772 = vmatprep.subr.bf16.mxu0 %v19261_v28 }
 0x381   :  { %13898 = vmatpush1.bf16.xpose.msra.mxu1 %v14799_v25 }
 0x382   :  { %13900 = vmatprep.subr.bf16.mxu1 %v19261_v28 }
 0x384   :  { %12909 = vmatmul.mubr.msk.f32.vlgmr.msra.gmra.mrb[6].mxu0 %vm19721_vm13, %v19719_v33  ;;  %vm19729_vm13 = vnez %v19728_v20  ;;  %v19742_v33 = vld [vmem:[#allocation98_spill] sm:$0xff]  ;;  %v19751_v20 = vld [vmem:[#allocation83_spill] sm:$0xff] }
 0x385   :  { %13774 = vmatpush1.bf16.xpose.msra.mxu0 %v19272_v42  ;;  %12910 = vmatprep.mubr.msk.f32.mxu0 %vm19724_vm1, %v19722_v44  ;;  %vm19732_vm1 = vnez %v19731_v40  ;;  %v19744_v44 = vld [vmem:[#allocation79_spill] sm:$0xff]  ;;  %v19754_v40 = vld [vmem:[#allocation120_spill] sm:$0xff] }
 0x386   :  { %13776 = vmatprep.subr.bf16.mxu0 %v19274_v4 }
 0x388   :  { %9277 = vmatmul.mubr.f32.vlgmr.msra.gmra.mrb[6].mxu1 %v19725_v62  ;;  %v19747_v62 = vld [vmem:[#allocation82_spill] sm:$0xff] }
 0x389   :  { %13902 = vmatpush1.bf16.xpose.msra.mxu1 %v19272_v42  ;;  %9346 = vmatprep.mubr.f32.mxu1 %v19726_v29  ;;  %v19749_v29 = vld [vmem:[#allocation73_spill] sm:$0xff] }
 0x38a   :  { %13904 = vmatprep.subr.bf16.mxu1 %v19274_v4 }
 0x38d   :  { %13778 = vmatpush1.bf16.xpose.msra.mxu0 %v19278_v26 }
 0x38e   :  { %13780 = vmatprep.subr.bf16.mxu0 %v19279_v10 }
 0x391   :  { %13906 = vmatpush1.bf16.xpose.msra.mxu1 %v19278_v26 }
 0x392   :  { %13908 = vmatprep.subr.bf16.mxu1 %v19279_v10 }
 0x394   :  { %12911 = vmatmul.mubr.msk.f32.vlgmr.msra.gmra.mrb[6].mxu0 %vm19729_vm13, %v19727_v35  ;;  %vm19737_vm13 = vnez %v19736_v8  ;;  %v19750_v35 = vld [vmem:[#allocation110_spill] sm:$0xff]  ;;  %v19759_v8 = vld [vmem:[#allocation95_spill] sm:$0xff] }
 0x395   :  { %13782 = vmatpush1.bf16.xpose.msra.mxu0 %v19293_v53  ;;  %12912 = vmatprep.mubr.msk.f32.mxu0 %vm19732_vm1, %v19730_v52  ;;  %vm19740_vm1 = vnez %v19739_v15  ;;  %v19752_v52 = vld [vmem:[#allocation91_spill] sm:$0xff]  ;;  %v19762_v15 = vld [vmem:[#allocation132_spill] sm:$0xff] }
 0x396   :  { %13784 = vmatprep.subr.bf16.mxu0 %v19295_v9 }
 0x398   :  { %9347 = vmatmul.mubr.f32.vlgmr.msra.gmra.mrb[6].mxu1 %v19733_v58  ;;  %v19755_v58 = vld [vmem:[#allocation94_spill] sm:$0xff] }
 0x399   :  { %13910 = vmatpush1.bf16.xpose.msra.mxu1 %v19293_v53  ;;  %9416 = vmatprep.mubr.f32.mxu1 %v19734_v61  ;;  %v19757_v61 = vld [vmem:[#allocation85_spill] sm:$0xff] }
 0x39a   :  { %13912 = vmatprep.subr.bf16.mxu1 %v19295_v9 }
 0x39d   :  { %13786 = vmatpush1.bf16.xpose.msra.mxu0 %v19300_v24 }
 0x39e   :  { %13788 = vmatprep.subr.bf16.mxu0 %v19301_v6 }
 0x3a1   :  { %13914 = vmatpush1.bf16.xpose.msra.mxu1 %v19300_v24 }
 0x3a2   :  { %13916 = vmatprep.subr.bf16.mxu1 %v19301_v6 }
 0x3a4   :  { %12913 = vmatmul.mubr.msk.f32.vlgmr.msra.gmra.mrb[6].mxu0 %vm19737_vm13, %v19735_v2  ;;  %vm19745_vm13 = vnez %v19744_v44  ;;  %v19758_v2 = vld [vmem:[#allocation122_spill] sm:$0xff] }
 0x3a5   :  { %13790 = vmatpush1.bf16.xpose.msra.mxu0 %v19607_v48  ;;  %12914 = vmatprep.mubr.msk.f32.mxu0 %vm19740_vm1, %v19738_v63  ;;  %vm19748_vm1 = vnez %v19747_v62  ;;  %v19760_v63 = vld [vmem:[#allocation103_spill] sm:$0xff]  ;;  %v19767_v44 = vld [vmem:[#allocation134_spill] sm:$0xff]  ;;  %v19769_v62 = vld [vmem:[#allocation113_spill] sm:$0xff] }
 0x3a6   :  { %13792 = vmatprep.subr.bf16.mxu0 %v19609_v43 }
 0x3a8   :  { %9417 = vmatmul.mubr.f32.vlgmr.msra.gmra.mrb[6].mxu1 %v19741_v3  ;;  %v19763_v3 = vld [vmem:[#allocation106_spill] sm:$0xff] }
 0x3a9   :  { %13918 = vmatpush1.bf16.xpose.msra.mxu1 %v19607_v48  ;;  %9486 = vmatprep.mubr.f32.mxu1 %v19742_v33  ;;  %v19765_v33 = vld [vmem:[#allocation105_spill] sm:$0xff] }
 0x3aa   :  { %13920 = vmatprep.subr.bf16.mxu1 %v19609_v43 }
 0x3ad   :  { %13794 = vmatpush1.bf16.xpose.msra.mxu0 %v19612_v12 }
 0x3ae   :  { %13796 = vmatprep.subr.bf16.mxu0 %v19613_v47 }
 0x3b1   :  { %13922 = vmatpush1.bf16.xpose.msra.mxu1 %v19612_v12 }
 0x3b2   :  { %13924 = vmatprep.subr.bf16.mxu1 %v19613_v47 }
 0x3b4   :  { %12915 = vmatmul.mubr.msk.f32.vlgmr.msra.gmra.mrb[6].mxu0 %vm19745_vm13, %v19743_v36  ;;  %vm19753_vm13 = vnez %v19752_v52  ;;  %v19766_v36 = vld [vmem:[#allocation97_spill] sm:$0xff]  ;;  %v19774_v52 = vld [vmem:[#allocation144_spill] sm:$0xff] }
 0x3b5   :  { %13798 = vmatpush1.bf16.xpose.msra.mxu0 %v19615_v59  ;;  %12916 = vmatprep.mubr.msk.f32.mxu0 %vm19748_vm1, %v19746_v41  ;;  %vm19756_vm1 = vnez %v19755_v58  ;;  %v19768_v41 = vld [vmem:[#allocation111_spill] sm:$0xff]  ;;  %v19777_v58 = vld [vmem:[#allocation117_spill] sm:$0xff] }
 0x3b6   :  { %13800 = vmatprep.subr.bf16.mxu0 %v19617_v32 }
 0x3b8   :  { %9487 = vmatmul.mubr.f32.vlgmr.msra.gmra.mrb[6].mxu1 %v19749_v29  ;;  %v19770_v29 = vld [vmem:[#allocation107_spill] sm:$0xff] }
 0x3b9   :  { %13926 = vmatpush1.bf16.xpose.msra.mxu1 %v19615_v59  ;;  %9556 = vmatprep.mubr.f32.mxu1 %v19750_v35  ;;  %v19771_v35 = vld [vmem:[#allocation115_spill] sm:$0xff] }
 0x3ba   :  { %13928 = vmatprep.subr.bf16.mxu1 %v19617_v32 }
 0x3bd   :  { %13802 = vmatpush1.bf16.xpose.msra.mxu0 %v19620_v13 }
 0x3be   :  { %13804 = vmatprep.subr.bf16.mxu0 %v19621_v19 }
 0x3c1   :  { %13930 = vmatpush1.bf16.xpose.msra.mxu1 %v19620_v13 }
 0x3c2   :  { %13932 = vmatprep.subr.bf16.mxu1 %v19621_v19 }
 0x3c4   :  { %12917 = vmatmul.mubr.msk.f32.vlgmr.msra.gmra.mrb[6].mxu0 %vm19753_vm13, %v19751_v20  ;;  %vm19761_vm13 = vnez %v19760_v63  ;;  %v19773_v20 = vld [vmem:[#allocation116_spill] sm:$0xff]  ;;  %v19781_v63 = vld [vmem:[#allocation125_spill] sm:$0xff] }
 0x3c5   :  { %13806 = vmatpush1.bf16.xpose.msra.mxu0 %v19623_v5  ;;  %12918 = vmatprep.mubr.msk.f32.mxu0 %vm19756_vm1, %v19754_v40  ;;  %vm19764_vm1 = vnez %v19763_v3  ;;  %v19775_v40 = vld [vmem:[#allocation118_spill] sm:$0xff]  ;;  %v19783_v3 = vld [vmem:[#allocation127_spill] sm:$0xff] }
 0x3c6   :  { %13808 = vmatprep.subr.bf16.mxu0 %v19625_v46 }
 0x3c8   :  { %9557 = vmatmul.mubr.f32.vlgmr.msra.gmra.mrb[6].mxu1 %v19757_v61  ;;  %v19778_v61 = vld [vmem:[#allocation109_spill] sm:$0xff] }
 0x3c9   :  { %13934 = vmatpush1.bf16.xpose.msra.mxu1 %v19623_v5  ;;  %9626 = vmatprep.mubr.f32.mxu1 %v19758_v2  ;;  %v19779_v2 = vld [vmem:[#allocation146_spill] sm:$0xff] }
 0x3ca   :  { %13936 = vmatprep.subr.bf16.mxu1 %v19625_v46 }
 0x3cd   :  { %13810 = vmatpush1.bf16.xpose.msra.mxu0 %v19628_v54 }
 0x3ce   :  { %13812 = vmatprep.subr.bf16.mxu0 %v19629_v60 }
 0x3d1   :  { %13938 = vmatpush1.bf16.xpose.msra.mxu1 %v19628_v54 }
 0x3d2   :  { %13940 = vmatprep.subr.bf16.mxu1 %v19629_v60 }
 0x3d4   :  { %12919 = vmatmul.mubr.msk.f32.vlgmr.msra.gmra.mrb[6].mxu0 %vm19761_vm13, %v19759_v8  ;;  %vm19772_vm13 = vnez %v19771_v35  ;;  %v19780_v8 = vld [vmem:[#allocation123_spill] sm:$0xff]  ;;  %v19789_v35 = vld [vmem:[#allocation129_spill] sm:$0xff] }
 0x3d5   :  { %13814 = vmatpush1.bf16.xpose.msra.mxu0 %v19631_v14  ;;  %12920 = vmatprep.mubr.msk.f32.mxu0 %vm19764_vm1, %v19762_v15  ;;  %vm19776_vm1 = vnez %v19775_v40  ;;  %v19782_v15 = vld [vmem:[#allocation119_spill] sm:$0xff]  ;;  %v19791_v40 = vld [vmem:[#allocation158_spill] sm:$0xff] }
 0x3d6   :  { %13816 = vmatprep.subr.bf16.mxu0 %v19765_v33 }
 0x3d8   :  { %9627 = vmatmul.mubr.f32.vlgmr.msra.gmra.mrb[6].mxu1 %v19766_v36  ;;  %v19785_v36 = vld [vmem:[#allocation128_spill] sm:$0xff] }
 0x3d9   :  { %13942 = vmatpush1.bf16.xpose.msra.mxu1 %v19631_v14  ;;  %9696 = vmatprep.mubr.f32.mxu1 %v19767_v44  ;;  %v19786_v44 = vld [vmem:[#allocation156_spill] sm:$0xff] }
 0x3da   :  { %13944 = vmatprep.subr.bf16.mxu1 %v19765_v33 }
 0x3dd   :  { %13818 = vmatpush1.bf16.xpose.msra.mxu0 %v19768_v41 }
 0x3de   :  { %13820 = vmatprep.subr.bf16.mxu0 %v19769_v62 }
 0x3e1   :  { %13946 = vmatpush1.bf16.xpose.msra.mxu1 %v19768_v41 }
 0x3e2   :  { %13948 = vmatprep.subr.bf16.mxu1 %v19769_v62 }
 0x3e4   :  { %12921 = vmatmul.mubr.msk.f32.vlgmr.msra.gmra.mrb[6].mxu0 %vm19772_vm13, %v19770_v29  ;;  %vm19784_vm13 = vnez %v19783_v3  ;;  %v19787_v29 = vld [vmem:[#allocation130_spill] sm:$0xff]  ;;  %v19795_v3 = vld [vmem:[#allocation139_spill] sm:$0xff] }
 0x3e5   :  { %13822 = vmatpush1.bf16.xpose.msra.mxu0 %v19773_v20  ;;  %12922 = vmatprep.mubr.msk.f32.mxu0 %vm19776_vm1, %v19774_v52  ;;  %vm19788_vm1 = vnez %v19787_v29  ;;  %v19790_v52 = vld [vmem:[#allocation121_spill] sm:$0xff]  ;;  %v19798_v29 = vld [vmem:[#allocation168_spill] sm:$0xff] }
 0x3e6   :  { %13824 = vmatprep.subr.bf16.mxu0 %v19777_v58 }
 0x3e8   :  { %9697 = vmatmul.mubr.f32.vlgmr.msra.gmra.mrb[6].mxu1 %v19778_v61  ;;  %v19792_v61 = vld [vmem:[#allocation135_spill] sm:$0xff] }
 0x3e9   :  { %13950 = vmatpush1.bf16.xpose.msra.mxu1 %v19773_v20  ;;  %9766 = vmatprep.mubr.f32.mxu1 %v19779_v2  ;;  %v19793_v2 = vld [vmem:[#allocation137_spill] sm:$0xff] }
 0x3ea   :  { %13952 = vmatprep.subr.bf16.mxu1 %v19777_v58 }
 0x3ed   :  { %13826 = vmatpush1.bf16.xpose.msra.mxu0 %v19780_v8 }
 0x3ee   :  { %13828 = vmatprep.subr.bf16.mxu0 %v19781_v63 }
 0x3f1   :  { %13954 = vmatpush1.bf16.xpose.msra.mxu1 %v19780_v8 }
 0x3f2   :  { %13956 = vmatprep.subr.bf16.mxu1 %v19781_v63 }
 0x3f4   :  { %12923 = vmatmul.mubr.msk.f32.vlgmr.msra.gmra.mrb[6].mxu0 %vm19784_vm13, %v19782_v15  ;;  %v19794_v15 = vld [vmem:[#allocation131_spill] sm:$0xff]  ;;  %vm19796_vm13 = vnez %v19795_v3  ;;  %v19805_v3 = vld [vmem:[#allocation149_spill] sm:$0xff] }
 0x3f5   :  { %13830 = vmatpush1.bf16.xpose.msra.mxu0 %v19785_v36  ;;  %12924 = vmatprep.mubr.msk.f32.mxu0 %vm19788_vm1, %v19786_v44  ;;  %v19797_v44 = vld [vmem:[#allocation140_spill] sm:$0xff] }
 0x3f6   :  { %13832 = vmatprep.subr.bf16.mxu0 %v19789_v35 }
 0x3f8   :  { %9767 = vmatmul.mubr.f32.vlgmr.msra.gmra.mrb[6].mxu1 %v19790_v52  ;;  %v19799_v52 = vld [vmem:[#allocation142_spill] sm:$0xff] }
 0x3f9   :  { %13958 = vmatpush1.bf16.xpose.msra.mxu1 %v19785_v36  ;;  %9836 = vmatprep.mubr.f32.mxu1 %v19791_v40  ;;  %vm19800_vm1 = vnez %v19799_v52  ;;  %v19801_v40 = vld [vmem:[#allocation141_spill] sm:$0xff]  ;;  %v19809_v52 = vld [vmem:[#allocation152_spill] sm:$0xff] }
 0x3fa   :  { %13960 = vmatprep.subr.bf16.mxu1 %v19789_v35 }
 0x3fd   :  { %13834 = vmatpush1.bf16.xpose.msra.mxu0 %v19792_v61 }
 0x3fe   :  { %13836 = vmatprep.subr.bf16.mxu0 %v19793_v2 }
 0x401   :  { %13962 = vmatpush1.bf16.xpose.msra.mxu1 %v19792_v61 }
 0x402   :  { %13964 = vmatprep.subr.bf16.mxu1 %v19793_v2 }
 0x404   :  { %12925 = vmatmul.mubr.msk.f32.vlgmr.msra.gmra.mrb[6].mxu0 %vm19796_vm13, %v19794_v15  ;;  %v19806_v15 = vld [vmem:[#allocation143_spill] sm:$0xff] }
 0x405   :  { %13838 = vmatpush1.bf16.xpose.msra.mxu0 %v19797_v44  ;;  %12926 = vmatprep.mubr.msk.f32.mxu0 %vm19800_vm1, %v19798_v29  ;;  %v19807_v29 = vld [vmem:[#allocation151_spill] sm:$0xff]  ;;  %vm19812_vm1 = vnez %v19811_v57 }
 0x406   :  { %13840 = vmatprep.subr.bf16.mxu0 %v19801_v40  ;;  %vm19808_vm13 = vnez %v19807_v29  ;;  %v19817_v29 = vld [vmem:[#allocation161_spill] sm:$0xff]  ;;  %v19818_v57 = vld [vmem:[#allocation155_spill] sm:$0xff] }
 0x408   :  { %9837 = vmatmul.mubr.f32.vlgmr.msra.gmra.mrb[6].mxu1 %v19802_v34  ;;  %v19810_v34 = vld [vmem:[#allocation180_spill] sm:$0xff] }
 0x409   :  { %13966 = vmatpush1.bf16.xpose.msra.mxu1 %v19797_v44  ;;  %9906 = vmatprep.mubr.f32.mxu1 %v19803_v55  ;;  %v19813_v55 = vld [vmem:[#allocation153_spill] sm:$0xff] }
 0x40a   :  { %13968 = vmatprep.subr.bf16.mxu1 %v19801_v40 }
 0x40d   :  { %13842 = vmatpush1.bf16.xpose.msra.mxu0 %v19804_v27 }
 0x40e   :  { %13844 = vmatprep.subr.bf16.mxu0 %v19805_v3 }
 0x411   :  { %13970 = vmatpush1.bf16.xpose.msra.mxu1 %v19804_v27 }
 0x412   :  { %13972 = vmatprep.subr.bf16.mxu1 %v19805_v3 }
 0x414   :  { %12927 = vmatmul.mubr.msk.f32.vlgmr.msra.gmra.mrb[6].mxu0 %vm19808_vm13, %v19806_v15  ;;  %v19819_v15 = vld [vmem:[#allocation163_spill] sm:$0xff] }
 0x415   :  { %13846 = vmatpush1.bf16.xpose.msra.mxu0 %v19809_v52  ;;  %12928 = vmatprep.mubr.msk.f32.mxu0 %vm19812_vm1, %v19810_v34  ;;  %vm19820_vm13 = vnez %v19819_v15  ;;  %v19821_v34 = vld [vmem:[#allocation164_spill] sm:$0xff]  ;;  %vm19824_vm1 = vnez %v19823_v1  ;;  %v19829_v15 = vld [vmem:[#allocation173_spill] sm:$0xff]  ;;  %v19830_v1 = vld [vmem:[#allocation167_spill] sm:$0xff] }
 0x416   :  { %13848 = vmatprep.subr.bf16.mxu0 %v19813_v55 }
 0x418   :  { %9907 = vmatmul.mubr.f32.vlgmr.msra.gmra.mrb[6].mxu1 %v19814_v51  ;;  %v19822_v51 = vld [vmem:[#allocation192_spill] sm:$0xff] }
 0x419   :  { %13974 = vmatpush1.bf16.xpose.msra.mxu1 %v19809_v52  ;;  %9976 = vmatprep.mubr.f32.mxu1 %v19815_v23  ;;  %v19825_v23 = vld [vmem:[#allocation165_spill] sm:$0xff]  ;;  %v19827_v52 = vld [vmem:[#allocation194_spill] sm:$0xff] }
 0x41a   :  { %13976 = vmatprep.subr.bf16.mxu1 %v19813_v55  ;;  %v19826_v55 = vld [vmem:[#allocation157_spill] sm:$0xff] }
 0x41d   :  { %13850 = vmatpush1.bf16.xpose.msra.mxu0 %v19816_v56 }
 0x41e   :  { %13852 = vmatprep.subr.bf16.mxu0 %v19817_v29 }
 0x421   :  { %13978 = vmatpush1.bf16.xpose.msra.mxu1 %v19816_v56  ;;  %v19839_v56 = vld [vmem:[#allocation200_spill] sm:$0xff] }
 0x422   :  { %13980 = vmatprep.subr.bf16.mxu1 %v19817_v29  ;;  %v19828_v29 = vld [vmem:[#allocation171_spill] sm:$0xff] }
 0x424   :  { %12929 = vmatmul.mubr.msk.f32.vlgmr.msra.gmra.mrb[6].mxu0 %vm19820_vm13, %v19818_v57  ;;  %v19831_v57 = vld [vmem:[#allocation175_spill] sm:$0xff] }
 0x425   :  { %13854 = vmatpush1.bf16.xpose.msra.mxu0 %v19821_v34  ;;  %12930 = vmatprep.mubr.msk.f32.mxu0 %vm19824_vm1, %v19822_v51  ;;  %vm19832_vm13 = vnez %v19831_v57  ;;  %v19833_v51 = vld [vmem:[#allocation176_spill] sm:$0xff]  ;;  %v19841_v57 = vld [vmem:[#allocation185_spill] sm:$0xff] }
 0x426   :  { %13856 = vmatprep.subr.bf16.mxu0 %v19825_v23 }
 0x428   :  { %9977 = vmatmul.mubr.f32.vlgmr.msra.gmra.mrb[6].mxu1 %v19826_v55  ;;  %v19834_v55 = vld [vmem:[#allocation198_spill] sm:$0xff] }
 0x429   :  { %13982 = vmatpush1.bf16.xpose.msra.mxu1 %v19821_v34  ;;  %10046 = vmatprep.mubr.f32.mxu1 %v19827_v52  ;;  %v19835_v34 = vld [vmem:[#allocation178_spill] sm:$0xff]  ;;  %v19837_v52 = vld [vmem:[#allocation177_spill] sm:$0xff] }
 0x42a   :  { %13984 = vmatprep.subr.bf16.mxu1 %v19825_v23  ;;  %vm19836_vm1 = vnez %v19835_v34  ;;  %v19838_v23 = vld [vmem:[#allocation169_spill] sm:$0xff]  ;;  %v19843_v34 = vld [vmem:[#allocation179_spill] sm:$0xff] }
 0x42d   :  { %13858 = vmatpush1.bf16.xpose.msra.mxu0 %v19828_v29 }
 0x42e   :  { %13860 = vmatprep.subr.bf16.mxu0 %v19829_v15 }
 0x431   :  { %13986 = vmatpush1.bf16.xpose.msra.mxu1 %v19828_v29 }
 0x432   :  { %13988 = vmatprep.subr.bf16.mxu1 %v19829_v15  ;;  %v19840_v15 = vld [vmem:[#allocation183_spill] sm:$0xff] }
 0x434   :  { %12931 = vmatmul.mubr.msk.f32.vlgmr.msra.gmra.mrb[6].mxu0 %vm19832_vm13, %v19830_v1  ;;  %v19842_v1 = vld [vmem:[#allocation5_spill] sm:$0xff] }
 0x435   :  { %13862 = vmatpush1.bf16.xpose.msra.mxu0 %v19833_v51  ;;  %12932 = vmatprep.mubr.msk.f32.mxu0 %vm19836_vm1, %v19834_v55  ;;  %v6731_v29 = vsub.s32 4, %v19842_v1  ;;  %v19844_v55 = vld [vmem:[#allocation187_spill] sm:$0xff] }
 0x436   :  { %13864 = vmatprep.subr.bf16.mxu0 %v19837_v52  ;;  %vm19845_vm13 = vnez %v19844_v55 }
 0x438   :  { %10047 = vmatmul.mubr.f32.vlgmr.msra.gmra.mrb[6].mxu1 %v19838_v23  ;;  %v6732_v23 = vrot.slane %v17326_v49, %v6731_v29  ;;  %v19850_v29 = vld [vmem:[#allocation206_spill] sm:$0xff] }
 0x439   :  { %13990 = vmatpush1.bf16.xpose.msra.mxu1 %v19833_v51  ;;  %10116 = vmatprep.mubr.f32.mxu1 %v19839_v56  ;;  %v7986_v56 = vsub.s32 5, %v19842_v1  ;;  %v19847_v51 = vld [vmem:[#allocation190_spill] sm:$0xff] }
 0x43a   :  { %13992 = vmatprep.subr.bf16.mxu1 %v19837_v52  ;;  %v19846_v52 = vld [vmem:[#allocation204_spill] sm:$0xff]  ;;  %vm19848_vm1 = vnez %v19847_v51 }
 0x43b   :  { %v7987_v55 = vrot.slane %v17326_v49, %v7986_v56  ;;  %v19851_v49 = vld [vmem:[#allocation191_spill] sm:$0xff]  ;;  %v19862_v56 = vld [vmem:[#allocation197_spill] sm:$0xff] }
 0x43d   :  { %13866 = vmatpush1.bf16.xpose.msra.mxu0 %v19840_v15 }
 0x43e   :  { %13868 = vmatprep.subr.bf16.mxu0 %v19841_v57 }
 0x441   :  { %13994 = vmatpush1.bf16.xpose.msra.mxu1 %v19840_v15 }
 0x442   :  { %13996 = vmatprep.subr.bf16.mxu1 %v19841_v57  ;;  %v19849_v57 = vld [vmem:[#allocation181_spill] sm:$0xff] }
 0x444   :  { %12933 = vmatmul.mubr.msk.f32.vlgmr.msra.gmra.mrb[6].mxu0 %vm19845_vm13, %v19843_v34 }
 0x445   :  { %13870 = vmatpush1.bf16.xpose.msra.mxu0 %v19551_v30  ;;  %12934 = vmatprep.mubr.msk.f32.mxu0 %vm19848_vm1, %v19846_v52 }
 0x446   :  { %13872 = vmatprep.subr.bf16.mxu0 %v19553_v38 }
 0x447   :  { %v6725_v3 = vpop.f32.mrb[4].mxu0 }
 0x448   :  { %v6733_v15 = vmul.f32 %v6732_v23, %v6725_v3  ;;  %v6727_v27 = vpop.f32.mrb[5].mxu0  ;;  %10117 = vmatmul.mubr.f32.vlgmr.msra.gmra.mrb[6].mxu1 %v19849_v57  ;;  %v19855_v3 = vld [vmem:[#allocation196_spill] sm:$0xff]  ;;  %v19860_v23 = vld [vmem:[#allocation203_spill] sm:$0xff] }
 0x449   :  { %13998 = vmatpush1.bf16.xpose.msra.mxu1 %v19551_v30  ;;  %10186 = vmatprep.mubr.f32.mxu1 %v19850_v29  ;;  %v19852_v27 = vld [vmem:[#allocation195_spill] sm:$0xff]  ;;  %vm19856_vm1 = vnez %v19855_v3  ;;  %v19858_v57 = vld [vmem:[#allocation212_spill] sm:$0xff] }
 0x44a   :  { %v6734_v34 = vadd.f32 %v6733_v15, %v17711_v45  ;;  %14000 = vmatprep.subr.bf16.mxu1 %v19553_v38  ;;  %vm19853_vm13 = vnez %v19852_v27  ;;  %v19854_v45 = vld [vmem:[#allocation211_spill] sm:$0xff]  ;;  %v19857_v15 = vld [vmem:[#allocation193_spill] sm:$0xff]  ;;  %v19865_v29 = vld [vmem:[#allocation44_spill] sm:$0xff] }
 0x44b   :  { %v7980_v1 = vpop.f32.mrb[4].mxu1  ;;  %v19870_v27 = vld [vmem:[#allocation52_spill] sm:$0xff]  ;;  %v19872_v3 = vld [vmem:[#allocation207_spill] sm:$0xff] }
 0x44c   :  { %v7988_v51 = vmul.f32 %v7987_v55, %v7980_v1  ;;  %v7982_v52 = vpop.f32.mrb[5].mxu1  ;;  %v19859_v1 = vld [vmem:[#allocation201_spill] sm:$0xff]  ;;  %v19863_v55 = vld [vmem:[#allocation202_spill] sm:$0xff] }
 0x44d   :  { %13874 = vmatpush1.bf16.xpose.msra.mxu0 %v16467_v7  ;;  %vm19864_vm9 = vnez %v19863_v55  ;;  %v19868_v52 = vld [vmem:[#allocation205_spill] sm:$0xff]  ;;  %v19921_v55 = vld [vmem:[#allocation148_spill] sm:$0xff] }
 0x44e   :  { %v17980_v40 = vadd.f32 %v7988_v51, %v6734_v34  ;;  %13876 = vmatprep.subr.bf16.mxu0 %v16474_v21  ;;  %v19866_v34 = vld [vmem:[#allocation199_spill] sm:$0xff] }
 0x44f   :  { %v19867_v51 = vld [vmem:[#allocation47_spill] sm:$0xff] }
 0x451   :  { %14002 = vmatpush1.bf16.xpose.msra.mxu1 %v16467_v7 }
 0x452   :  { %14004 = vmatprep.subr.bf16.mxu1 %v16474_v21 }
 0x454   :  { %12935 = vmatmul.mubr.msk.f32.vlgmr.msra.gmra.mrb[6].mxu0 %vm19853_vm13, %v19851_v49  ;;  %vm284_vm13 = vcmp.lt.s32.totalorder %v19859_v1, 4032  ;;  %v19929_v49 = vld [vmem:[#allocation161_spill] sm:$0xff] }
 0x455   :  { %13878 = vmatpush1.bf16.xpose.msra.mxu0 %v16506_v37  ;;  %12936 = vmatprep.mubr.msk.f32.mxu0 %vm19856_vm1, %v19854_v45  ;;  %vm19861_vm1 = vnez %v19860_v23  ;;  %v19931_v45 = vld [vmem:[#allocation160_spill] sm:$0xff]  ;;  %v19938_v23 = vld [vmem:[#allocation171_spill] sm:$0xff] }
 0x456   :  { %13880 = vmatprep.subr.bf16.mxu0 %v16510_v39  ;;  %vm8021_vm11 = vmand %vm284_vm13, %vm19861_vm1 }
 0x458   :  { %10187 = vmatmul.mubr.f32.vlgmr.msra.gmra.mrb[6].mxu1 %v19857_v15  ;;  %v14703_v15 = vmov 1.0  }
 0x459   :  { %14006 = vmatpush1.bf16.xpose.msra.mxu1 %v16506_v37  ;;  %10256 = vmatprep.mubr.f32.mxu1 %v19858_v57  ;;  %v19935_v57 = vld [vmem:[#allocation162_spill] sm:$0xff] }
 0x45a   :  { %14008 = vmatprep.subr.bf16.mxu1 %v16510_v39 }
 0x45d   :  { %13882 = vmatpush1.bf16.xpose.msra.mxu0 %v16563_v0 }
 0x45e   :  { %13884 = vmatprep.subr.bf16.mxu0 %v16570_v22 }
 0x461   :  { %14010 = vmatpush1.bf16.xpose.msra.mxu1 %v16563_v0 }
 0x462   :  { %14012 = vmatprep.subr.bf16.mxu1 %v16570_v22 }
 0x464   :  { %12937 = vmatmul.mubr.msk.f32.vlgmr.msra.gmra.mrb[6].mxu0 %vm19864_vm9, %v19862_v56  ;;  %v19917_v56 = vld [vmem:[#allocation141_spill] sm:$0xff]  ;;  %vm19932_vm9 = vnez %v19931_v45 }
 0x465   :  { %13886 = vmatpush1.bf16.xpose.msra.mxu0 %v16606_v31  ;;  %12938 = vmatprep.mubr.msk.f32.mxu0 %vm8021_vm11, %v19865_v29  ;;  %v19923_v29 = vld [vmem:[#allocation152_spill] sm:$0xff] }
 0x466   :  { %13888 = vmatprep.subr.bf16.mxu0 %v16615_v18 }
 0x468   :  { %10257 = vmatmul.mubr.f32.vlgmr.msra.gmra.mrb[6].mxu1 %v19866_v34  ;;  %v19924_v34 = vld [vmem:[#allocation228_spill] sm:$0xff] }
 0x469   :  { %14014 = vmatpush1.bf16.xpose.msra.mxu1 %v16606_v31  ;;  %12940 = vmatprep.mubr.msk.f32.mxu1 %vm284_vm13, %v19867_v51  ;;  %v19927_v51 = vld [vmem:[#allocation153_spill] sm:$0xff] }
 0x46a   :  { %14016 = vmatprep.subr.bf16.mxu1 %v16615_v18 }
 0x46d   :  { %13890 = vmatpush1.bf16.xpose.msra.mxu0 %v16663_v50 }
 0x46e   :  { %14020 = vmatprep.subr.bf16.mxu0 %v14752_v11 }
 0x471   :  { %14018 = vmatpush1.bf16.xpose.msra.mxu1 %v16663_v50 }
 0x472   :  { %14148 = vmatprep.subr.bf16.mxu1 %v14752_v11  ;;  %v19873_v11 = vld [vmem:[#allocation209_spill] sm:$0xff] }
 0x474   :  { %12939 = vmatmul.mubr.msk.f32.vlgmr.msra.gmra.mrb[6].mxu0 %vm19601_vm14, %v19868_v52  ;;  %v19928_v52 = vld [vmem:[#allocation159_spill] sm:$0xff]  ;;  %vm19936_vm14 = vnez %v19935_v57 }
 0x475   :  { %14022 = vmatpush1.bf16.xpose.msra.mxu0 %v14766_v16  ;;  %12941 = vmatprep.mubr.msk.f32.mxu0 %vm19602_vm6, %v19870_v27  ;;  %v19930_v27 = vld [vmem:[#allocation223_spill] sm:$0xff] }
 0x476   :  { %14024 = vmatprep.subr.bf16.mxu0 %v14770_v17 }
 0x478   :  { %10327 = vmatmul.mubr.f32.vlgmr.msra.gmra.mrb[6].mxu1 %v19872_v3  ;;  %v19933_v3 = vld [vmem:[#allocation164_spill] sm:$0xff] }
 0x479   :  { %14150 = vmatpush1.bf16.xpose.msra.mxu1 %v14766_v16  ;;  %11592 = vmatprep.mubr.f32.mxu1 %v14703_v15  ;;  %v19875_v16 = vld [vmem:[#allocation57_spill] sm:$0xff] }
 0x47a   :  { %14152 = vmatprep.subr.bf16.mxu1 %v14770_v17  ;;  %v19877_v17 = vld [vmem:[#allocation14_spill] sm:$0xff] }
 0x47d   :  { %14026 = vmatpush1.bf16.xpose.msra.mxu0 %v14799_v25 }
 0x47e   :  { %14028 = vmatprep.subr.bf16.mxu0 %v19261_v28 }
 0x481   :  { %14154 = vmatpush1.bf16.xpose.msra.mxu1 %v14799_v25  ;;  %v19940_v25 = vld [vmem:[#allocation225_spill] sm:$0xff] }
 0x482   :  { %14156 = vmatprep.subr.bf16.mxu1 %v19261_v28  ;;  %v19879_v28 = vld [vmem:[#allocation66_spill] sm:$0xff] }
 0x484   :  { %12942 = vmatmul.mubr.msk.f32.vlgmr.msra.gmra.mrb[8].mxu0 %vm16751_vm0, %v19873_v11  ;;  %v19934_v11 = vld [vmem:[#allocation230_spill] sm:$0xff] }
 0x485   :  { %14030 = vmatpush1.bf16.xpose.msra.mxu0 %v19272_v42  ;;  %12943 = vmatprep.mubr.msk.f32.mxu0 %vm16775_vm4, %v19875_v16  ;;  %v19937_v16 = vld [vmem:[#allocation165_spill] sm:$0xff] }
 0x486   :  { %14032 = vmatprep.subr.bf16.mxu0 %v19274_v4 }
 0x488   :  { %11593 = vmatmul.mubr.f32.vlgmr.msra.gmra.mrb[8].mxu1 %v14703_v15 }
 0x489   :  { %14158 = vmatpush1.bf16.xpose.msra.mxu1 %v19272_v42  ;;  %11662 = vmatprep.mubr.f32.mxu1 %v14703_v15  ;;  %v19943_v42 = vld [vmem:[#allocation176_spill] sm:$0xff] }
 0x48a   :  { %14160 = vmatprep.subr.bf16.mxu1 %v19274_v4  ;;  %v19881_v4 = vld [vmem:[#allocation45_spill] sm:$0xff] }
 0x48d   :  { %14034 = vmatpush1.bf16.xpose.msra.mxu0 %v19278_v26 }
 0x48e   :  { %14036 = vmatprep.subr.bf16.mxu0 %v19279_v10 }
 0x491   :  { %14162 = vmatpush1.bf16.xpose.msra.mxu1 %v19278_v26  ;;  %v19883_v26 = vld [vmem:[#allocation90_spill] sm:$0xff] }
 0x492   :  { %14164 = vmatprep.subr.bf16.mxu1 %v19279_v10  ;;  %v19945_v10 = vld [vmem:[#allocation174_spill] sm:$0xff] }
 0x493   :  { %vm19946_vm6 = vnez %v19945_v10 }
 0x494   :  { %12944 = vmatmul.mubr.msk.f32.vlgmr.msra.gmra.mrb[8].mxu0 %vm16822_vm2, %v19877_v17  ;;  %v19939_v17 = vld [vmem:[#allocation173_spill] sm:$0xff] }
 0x495   :  { %14038 = vmatpush1.bf16.xpose.msra.mxu0 %v19293_v53  ;;  %12945 = vmatprep.mubr.msk.f32.mxu0 %vm16833_vm3, %v19879_v28  ;;  %v19941_v28 = vld [vmem:[#allocation172_spill] sm:$0xff] }
 0x496   :  { %14040 = vmatprep.subr.bf16.mxu0 %v19295_v9  ;;  %vm19942_vm11 = vnez %v19941_v28 }
 0x498   :  { %11663 = vmatmul.mubr.f32.vlgmr.msra.gmra.mrb[8].mxu1 %v14703_v15 }
 0x499   :  { %14166 = vmatpush1.bf16.xpose.msra.mxu1 %v19293_v53  ;;  %11732 = vmatprep.mubr.f32.mxu1 %v14703_v15  ;;  %v19948_v53 = vld [vmem:[#allocation183_spill] sm:$0xff] }
 0x49a   :  { %14168 = vmatprep.subr.bf16.mxu1 %v19295_v9  ;;  %v19950_v9 = vld [vmem:[#allocation5_spill] sm:$0xff] }
 0x49d   :  { %14042 = vmatpush1.bf16.xpose.msra.mxu0 %v19300_v24 }
 0x49e   :  { %14044 = vmatprep.subr.bf16.mxu0 %v19301_v6 }
 0x4a1   :  { %14170 = vmatpush1.bf16.xpose.msra.mxu1 %v19300_v24  ;;  %v19885_v24 = vld [vmem:[#allocation53_spill] sm:$0xff] }
 0x4a2   :  { %14172 = vmatprep.subr.bf16.mxu1 %v19301_v6  ;;  %v19887_v6 = vld [vmem:[#allocation216_spill] sm:$0xff] }
 0x4a4   :  { %12946 = vmatmul.mubr.msk.f32.vlgmr.msra.gmra.mrb[8].mxu0 %vm16874_vm5, %v19881_v4  ;;  %v19944_v4 = vld [vmem:[#allocation232_spill] sm:$0xff] }
 0x4a5   :  { %14046 = vmatpush1.bf16.xpose.msra.mxu0 %v19607_v48  ;;  %12947 = vmatprep.mubr.msk.f32.mxu0 %vm16885_vm8, %v19883_v26  ;;  %v19947_v26 = vld [vmem:[#allocation177_spill] sm:$0xff] }
 0x4a6   :  { %14048 = vmatprep.subr.bf16.mxu0 %v19609_v43 }
 0x4a8   :  { %11733 = vmatmul.mubr.f32.vlgmr.msra.gmra.mrb[8].mxu1 %v14703_v15 }
 0x4a9   :  { %14174 = vmatpush1.bf16.xpose.msra.mxu1 %v19607_v48  ;;  %11802 = vmatprep.mubr.f32.mxu1 %v14703_v15  ;;  %v19951_v48 = vld [vmem:[#allocation227_spill] sm:$0xff] }
 0x4aa   :  { %14176 = vmatprep.subr.bf16.mxu1 %v19609_v43  ;;  %v19889_v43 = vld [vmem:[#allocation65_spill] sm:$0xff] }
 0x4ad   :  { %14050 = vmatpush1.bf16.xpose.msra.mxu0 %v19612_v12 }
 0x4ae   :  { %14052 = vmatprep.subr.bf16.mxu0 %v19613_v47 }
 0x4b1   :  { %14178 = vmatpush1.bf16.xpose.msra.mxu1 %v19612_v12  ;;  %v14672_v12 = vld [vmem:[%s18323_s2] sm:$0xff] }
 0x4b2   :  { %14180 = vmatprep.subr.bf16.mxu1 %v19613_v47  ;;  %v19891_v47 = vld [vmem:[#allocation218_spill] sm:$0xff] }
 0x4b4   :  { %12948 = vmatmul.mubr.msk.f32.vlgmr.msra.gmra.mrb[8].mxu0 %vm16917_vm15, %v19885_v24  ;;  %vm19922_vm15 = vnez %v19921_v55  ;;  %v19949_v24 = vld [vmem:[#allocation185_spill] sm:$0xff] }
 0x4b5   :  { %14054 = vmatpush1.bf16.xpose.msra.mxu0 %v19615_v59  ;;  %12949 = vmatprep.mubr.msk.f32.mxu0 %vm16928_vm10, %v19887_v6  ;;  %v9176_v6 = vsub.s32 6, %v19950_v9  ;;  %v155_v55 = vld [vmem:[%s18323_s2 + $0x8] sm:$0x3]  ;;  %s14708_s2 = smov [#allocation2]  }
 0x4b6   :  { %14056 = vmatprep.subr.bf16.mxu0 %v19617_v32  ;;  %s12771_s11 = sshll.u32 %s14708_s2, 4  ;;  %s12772_s11 = int_to_ptr.vmem [resolvable:$true] %s12771_s11 }
 0x4b7   :  { %s14673_s12 = scalar_lea.vmem %s12772_s11, 32  ;;  %p14678_p1 = scmp.lt.s32.totalorder %s12772_s11, %s12772_s11 }
 0x4b8   :  { %11803 = vmatmul.mubr.f32.vlgmr.msra.gmra.mrb[8].mxu1 %v14703_v15  ;;  %p14674_p0 = scmp.ne.s32.totalorder %s12772_s11, %s14673_s12  ;;  %p14679_p2 = scmp.lt.s32.totalorder %s14673_s12, %s14673_s12 }
 0x4b9   :  { %14182 = vmatpush1.bf16.xpose.msra.mxu1 %v19615_v59  ;;  %11872 = vmatprep.mubr.f32.mxu1 %v14703_v15  ;;  %v10334_v59 = vsub.s32 7, %v19950_v9 }
 0x4ba   :  { %14184 = vmatprep.subr.bf16.mxu1 %v19617_v32  ;;  %v19893_v32 = vld [vmem:[#allocation78_spill] sm:$0xff]  ;;  %p14680_p3 = por %p14679_p2, %p14678_p1 }
 0x4bc   :  { %p14681_p4 = pnand %p14680_p3, %p14674_p0 }
 0x4bd   :  { %14058 = vmatpush1.bf16.xpose.msra.mxu0 %v19620_v13 }
 0x4be   :  { %14060 = vmatprep.subr.bf16.mxu0 %v19621_v19 }
 0x4c1   :  { %14186 = vmatpush1.bf16.xpose.msra.mxu1 %v19620_v13  ;;  %v19894_v13 = vld [vmem:[#allocation100_spill] sm:$0xff] }
 0x4c2   :  { %14188 = vmatprep.subr.bf16.mxu1 %v19621_v19  ;;  %vm19895_vm8 = vnez %v19894_v13  ;;  %v19896_v19 = vld [vmem:[#allocation220_spill] sm:$0xff]  ;;  %v19955_v13 = vld [vmem:[#allocation186_spill] sm:$0xff] }
 0x4c4   :  { %12950 = vmatmul.mubr.msk.f32.vlgmr.msra.gmra.mrb[8].mxu0 %vm16959_vm7, %v19889_v43  ;;  %v19952_v43 = vld [vmem:[#allocation184_spill] sm:$0xff] }
 0x4c5   :  { %14062 = vmatpush1.bf16.xpose.msra.mxu0 %v19623_v5  ;;  %12951 = vmatprep.mubr.msk.f32.mxu0 %vm16970_vm12, %v19891_v47  ;;  %vm19953_vm1 = vnez %v19952_v43  ;;  %v9177_v47 = vrot.slane %v14672_v12, %v9176_v6 }
 0x4c6   :  { %14064 = vmatprep.subr.bf16.mxu0 %v19625_v46 }
 0x4c8   :  { %11873 = vmatmul.mubr.f32.vlgmr.msra.gmra.mrb[8].mxu1 %v14703_v15 }
 0x4c9   :  { %14190 = vmatpush1.bf16.xpose.msra.mxu1 %v19623_v5  ;;  %11942 = vmatprep.mubr.f32.mxu1 %v14703_v15  ;;  %v19897_v5 = vld [vmem:[#allocation102_spill] sm:$0xff] }
 0x4ca   :  { %14192 = vmatprep.subr.bf16.mxu1 %v19625_v46  ;;  %vm19898_vm10 = vnez %v19897_v5  ;;  %v19899_v46 = vld [vmem:[#allocation215_spill] sm:$0xff] }
 0x4cd   :  { %14066 = vmatpush1.bf16.xpose.msra.mxu0 %v19628_v54 }
 0x4ce   :  { %14068 = vmatprep.subr.bf16.mxu0 %v19629_v60 }
 0x4d1   :  { %14194 = vmatpush1.bf16.xpose.msra.mxu1 %v19628_v54  ;;  %v19900_v54 = vld [vmem:[#allocation112_spill] sm:$0xff] }
 0x4d2   :  { %14196 = vmatprep.subr.bf16.mxu1 %v19629_v60  ;;  %vm19901_vm12 = vnez %v19900_v54  ;;  %v19902_v60 = vld [vmem:[#allocation222_spill] sm:$0xff]  ;;  %v10335_v54 = vrot.slane %v14672_v12, %v10334_v59 }
 0x4d4   :  { %12952 = vmatmul.mubr.msk.f32.vlgmr.msra.gmra.mrb[8].mxu0 %vm19895_vm8, %v19893_v32  ;;  %v19954_v32 = vld [vmem:[#allocation235_spill] sm:$0xff]  ;;  %vm19956_vm8 = vnez %v19955_v13 }
 0x4d5   :  { %14070 = vmatpush1.bf16.xpose.msra.mxu0 %v19631_v14  ;;  %12953 = vmatprep.mubr.msk.f32.mxu0 %vm19898_vm10, %v19896_v19 }
 0x4d6   :  { %14072 = vmatprep.subr.bf16.mxu0 %v19765_v33 }
 0x4d8   :  { %11943 = vmatmul.mubr.f32.vlgmr.msra.gmra.mrb[8].mxu1 %v14703_v15 }
 0x4d9   :  { %14198 = vmatpush1.bf16.xpose.msra.mxu1 %v19631_v14  ;;  %12012 = vmatprep.mubr.f32.mxu1 %v14703_v15  ;;  %v19903_v14 = vld [vmem:[#allocation114_spill] sm:$0xff] }
 0x4da   :  { %14200 = vmatprep.subr.bf16.mxu1 %v19765_v33  ;;  %vm19904_vm4 = vnez %v19903_v14  ;;  %v19905_v33 = vld [vmem:[#allocation217_spill] sm:$0xff] }
 0x4dd   :  { %14074 = vmatpush1.bf16.xpose.msra.mxu0 %v19768_v41 }
 0x4de   :  { %14076 = vmatprep.subr.bf16.mxu0 %v19769_v62 }
 0x4e1   :  { %14202 = vmatpush1.bf16.xpose.msra.mxu1 %v19768_v41  ;;  %v19906_v41 = vld [vmem:[#allocation124_spill] sm:$0xff] }
 0x4e2   :  { %14204 = vmatprep.subr.bf16.mxu1 %v19769_v62  ;;  %vm19907_vm0 = vnez %v19906_v41  ;;  %v19908_v62 = vld [vmem:[#allocation224_spill] sm:$0xff] }
 0x4e4   :  { %12954 = vmatmul.mubr.msk.f32.vlgmr.msra.gmra.mrb[8].mxu0 %vm19901_vm12, %v19899_v46 }
 0x4e5   :  { %14078 = vmatpush1.bf16.xpose.msra.mxu0 %v19773_v20  ;;  %12955 = vmatprep.mubr.msk.f32.mxu0 %vm19904_vm4, %v19902_v60 }
 0x4e6   :  { %14080 = vmatprep.subr.bf16.mxu0 %v19777_v58 }
 0x4e8   :  { %12013 = vmatmul.mubr.f32.vlgmr.msra.gmra.mrb[8].mxu1 %v14703_v15 }
 0x4e9   :  { %14206 = vmatpush1.bf16.xpose.msra.mxu1 %v19773_v20  ;;  %12082 = vmatprep.mubr.f32.mxu1 %v14703_v15  ;;  %v19909_v20 = vld [vmem:[#allocation126_spill] sm:$0xff] }
 0x4ea   :  { %14208 = vmatprep.subr.bf16.mxu1 %v19777_v58  ;;  %vm19910_vm2 = vnez %v19909_v20  ;;  %v19911_v58 = vld [vmem:[#allocation219_spill] sm:$0xff]  ;;  %v19958_v20 = vld [vmem:[#allocation188_spill] sm:$0xff] }
 0x4eb   :  { %vm19959_vm10 = vnez %v19958_v20 }
 0x4ed   :  { %14082 = vmatpush1.bf16.xpose.msra.mxu0 %v19780_v8 }
 0x4ee   :  { %14084 = vmatprep.subr.bf16.mxu0 %v19781_v63 }
 0x4f1   :  { %14210 = vmatpush1.bf16.xpose.msra.mxu1 %v19780_v8  ;;  %v19912_v8 = vld [vmem:[#allocation136_spill] sm:$0xff] }
 0x4f2   :  { %14212 = vmatprep.subr.bf16.mxu1 %v19781_v63  ;;  %vm19913_vm3 = vnez %v19912_v8  ;;  %v19914_v63 = vld [vmem:[#allocation226_spill] sm:$0xff]  ;;  %v12656_v8 = vadd.s32 8, %v19950_v9 }
 0x4f4   :  { %12956 = vmatmul.mubr.msk.f32.vlgmr.msra.gmra.mrb[8].mxu0 %vm19907_vm0, %v19905_v33 }
 0x4f5   :  { %14086 = vmatpush1.bf16.xpose.msra.mxu0 %v19785_v36  ;;  %12957 = vmatprep.mubr.msk.f32.mxu0 %vm19910_vm2, %v19908_v62 }
 0x4f6   :  { %14088 = vmatprep.subr.bf16.mxu0 %v19789_v35 }
 0x4f8   :  { %12083 = vmatmul.mubr.f32.vlgmr.msra.gmra.mrb[8].mxu1 %v14703_v15 }
 0x4f9   :  { %14214 = vmatpush1.bf16.xpose.msra.mxu1 %v19785_v36  ;;  %12152 = vmatprep.mubr.f32.mxu1 %v14703_v15  ;;  %v19915_v36 = vld [vmem:[#allocation138_spill] sm:$0xff] }
 0x4fa   :  { %14216 = vmatprep.subr.bf16.mxu1 %v19789_v35  ;;  %vm19916_vm5 = vnez %v19915_v36  ;;  %v19918_v35 = vld [vmem:[#allocation147_spill] sm:$0xff]  ;;  %v12657_v36 = vadd.s32 16, %v19950_v9 }
 0x4fd   :  { %14090 = vmatpush1.bf16.xpose.msra.mxu0 %v19792_v61 }
 0x4fe   :  { %14092 = vmatprep.subr.bf16.mxu0 %v19793_v2 }
 0x501   :  { %14218 = vmatpush1.bf16.xpose.msra.mxu1 %v19792_v61  ;;  %v19919_v61 = vld [vmem:[#allocation149_spill] sm:$0xff] }
 0x502   :  { %14220 = vmatprep.subr.bf16.mxu1 %v19793_v2  ;;  %v19920_v2 = vld [vmem:[#allocation221_spill] sm:$0xff] }
 0x504   :  { %12958 = vmatmul.mubr.msk.f32.vlgmr.msra.gmra.mrb[8].mxu0 %vm19913_vm3, %v19911_v58  ;;  %v19966_v58 = vld [vmem:[#allocation233_spill] sm:$0xff] }
 0x505   :  { %14094 = vmatpush1.bf16.xpose.msra.mxu0 %v19797_v44  ;;  %12959 = vmatprep.mubr.msk.f32.mxu0 %vm19916_vm5, %v19914_v63  ;;  %vm19967_vm2 = vnez %v19966_v58 }
 0x506   :  { %14096 = vmatprep.subr.bf16.mxu0 %v19917_v56 }
 0x508   :  { %12153 = vmatmul.mubr.f32.vlgmr.msra.gmra.mrb[8].mxu1 %v14703_v15 }
 0x509   :  { %14222 = vmatpush1.bf16.xpose.msra.mxu1 %v19797_v44  ;;  %12222 = vmatprep.mubr.f32.mxu1 %v14703_v15  ;;  %v19925_v44 = vld [vmem:[#allocation150_spill] sm:$0xff] }
 0x50a   :  { %14224 = vmatprep.subr.bf16.mxu1 %v19917_v56  ;;  %vm19926_vm7 = vnez %v19925_v44  ;;  %v14705_v56 = vmov 1.0|1.0  }
 0x50d   :  { %14098 = vmatpush1.bf16.xpose.msra.mxu0 %v19918_v35 }
 0x50e   :  { %14100 = vmatprep.subr.bf16.mxu0 %v19919_v61 }
 0x511   :  { %14226 = vmatpush1.bf16.xpose.msra.mxu1 %v19918_v35  ;;  %v14706_v35 = vmov 0.0  }
 0x512   :  { %14228 = vmatprep.subr.bf16.mxu1 %v19919_v61 }
 0x514   :  { %12960 = vmatmul.mubr.msk.f32.vlgmr.msra.gmra.mrb[8].mxu0 %vm19922_vm15, %v19920_v2 }
 0x515   :  { %14102 = vmatpush1.bf16.xpose.msra.mxu0 %v19923_v29  ;;  %12961 = vmatprep.mubr.msk.f32.mxu0 %vm19926_vm7, %v19924_v34 }
 0x516   :  { %14104 = vmatprep.subr.bf16.mxu0 %v19927_v51 }
 0x518   :  { %12223 = vmatmul.mubr.f32.vlgmr.msra.gmra.mrb[8].mxu1 %v14703_v15 }
 0x519   :  { %14230 = vmatpush1.bf16.xpose.msra.mxu1 %v19923_v29  ;;  %12292 = vmatprep.mubr.f32.mxu1 %v14703_v15  ;;  %v19973_v29 = vsub.s32 0, %v19950_v9 }
 0x51a   :  { %14232 = vmatprep.subr.bf16.mxu1 %v19927_v51 }
 0x51b   :  { %v11525_v34 = vrot.slane %v155_v55, %v19973_v29 }
 0x51d   :  { %14106 = vmatpush1.bf16.xpose.msra.mxu0 %v19928_v52 }
 0x51e   :  { %14108 = vmatprep.subr.bf16.mxu0 %v19929_v49 }
 0x521   :  { %14234 = vmatpush1.bf16.xpose.msra.mxu1 %v19928_v52 }
 0x522   :  { %14236 = vmatprep.subr.bf16.mxu1 %v19929_v49  ;;  %v19974_v49 = vsub.s32 1, %v19950_v9 }
 0x524   :  { %12962 = vmatmul.mubr.msk.f32.vlgmr.msra.gmra.mrb[8].mxu0 %vm19932_vm9, %v19930_v27  ;;  %v12651_v27 = vrot.slane %v155_v55, %v19974_v49 }
 0x525   :  { %14110 = vmatpush1.bf16.xpose.msra.mxu0 %v19933_v3  ;;  %12963 = vmatprep.mubr.msk.f32.mxu0 %vm19936_vm14, %v19934_v11 }
 0x526   :  { %14112 = vmatprep.subr.bf16.mxu0 %v19937_v16 }
 0x528   :  { %12293 = vmatmul.mubr.f32.vlgmr.msra.gmra.mrb[8].mxu1 %v14703_v15 }
 0x529   :  { %14238 = vmatpush1.bf16.xpose.msra.mxu1 %v19933_v3  ;;  %12362 = vmatprep.mubr.f32.mxu1 %v14703_v15 }
 0x52a   :  { %14240 = vmatprep.subr.bf16.mxu1 %v19937_v16  ;;  %v12973_v16 = vld [vmem:[%s18324_s3] ss:$0 sm:$0xff] }
 0x52d   :  { %14114 = vmatpush1.bf16.xpose.msra.mxu0 %v19938_v23 }
 0x52e   :  { %14116 = vmatprep.subr.bf16.mxu0 %v19939_v17 }
 0x531   :  { %14242 = vmatpush1.bf16.xpose.msra.mxu1 %v19938_v23 }
 0x532   :  { %14244 = vmatprep.subr.bf16.mxu1 %v19939_v17 }
 0x534   :  { %12964 = vmatmul.mubr.msk.f32.vlgmr.msra.gmra.mrb[8].mxu0 %vm19942_vm11, %v19940_v25 }
 0x535   :  { %14118 = vmatpush1.bf16.xpose.msra.mxu0 %v19943_v42  ;;  %12965 = vmatprep.mubr.msk.f32.mxu0 %vm19946_vm6, %v19944_v4 }
 0x536   :  { %14120 = vmatprep.subr.bf16.mxu0 %v19947_v26 }
 0x538   :  { %12363 = vmatmul.mubr.f32.vlgmr.msra.gmra.mrb[8].mxu1 %v14703_v15 }
 0x539   :  { %14246 = vmatpush1.bf16.xpose.msra.mxu1 %v19943_v42  ;;  %12432 = vmatprep.mubr.f32.mxu1 %v14703_v15 }
 0x53a   :  { %14248 = vmatprep.subr.bf16.mxu1 %v19947_v26 }
 0x53d   :  { %14122 = vmatpush1.bf16.xpose.msra.mxu0 %v19948_v53 }
 0x53e   :  { %14124 = vmatprep.subr.bf16.mxu0 %v19949_v24 }
 0x541   :  { %14250 = vmatpush1.bf16.xpose.msra.mxu1 %v19948_v53 }
 0x542   :  { %14252 = vmatprep.subr.bf16.mxu1 %v19949_v24 }
 0x544   :  { %12966 = vmatmul.mubr.msk.f32.vlgmr.msra.gmra.mrb[8].mxu0 %vm19953_vm1, %v19951_v48 }
 0x545   :  { %14126 = vmatpush1.bf16.xpose.msra.mxu0 %v19551_v30  ;;  %12967 = vmatprep.mubr.msk.f32.mxu0 %vm19956_vm8, %v19954_v32 }
 0x546   :  { %14128 = vmatprep.subr.bf16.mxu0 %v19553_v38 }
 0x547   :  { %v9170_v19 = vpop.f32.mrb[6].mxu0 }
 0x548   :  { %v9178_v5 = vmul.f32 %v9177_v47, %v9170_v19  ;;  %v9172_v46 = vpop.f32.mrb[7].mxu0  ;;  %12433 = vmatmul.mubr.f32.vlgmr.msra.gmra.mrb[8].mxu1 %v14703_v15 }
 0x549   :  { %14254 = vmatpush1.bf16.xpose.msra.mxu1 %v19551_v30  ;;  %12502 = vmatprep.mubr.f32.mxu1 %v14703_v15  ;;  %v19957_v30 = vld [vmem:[#allocation229_spill] sm:$0xff] }
 0x54a   :  { %v9179_v60 = vadd.f32 %v9178_v5, %v17980_v40  ;;  %14256 = vmatprep.subr.bf16.mxu1 %v19553_v38  ;;  %v19960_v38 = vld [vmem:[#allocation238_spill] sm:$0xff]  ;;  %v19961_v40 = vld [vmem:[#allocation231_spill] sm:$0xff] }
 0x54b   :  { %v10328_v14 = vpop.f32.mrb[6].mxu1  ;;  %vm19962_vm12 = vnez %v19961_v40 }
 0x54c   :  { %v10336_v33 = vmul.f32 %v10335_v54, %v10328_v14  ;;  %v10330_v41 = vpop.f32.mrb[7].mxu1 }
 0x54d   :  { %14130 = vmatpush1.bf16.xpose.msra.mxu0 %v16467_v7 }
 0x54e   :  { %v18249_v62 = vadd.f32 %v10336_v33, %v9179_v60  ;;  %14132 = vmatprep.subr.bf16.mxu0 %v16474_v21 }
 0x551   :  { %14258 = vmatpush1.bf16.xpose.msra.mxu1 %v16467_v7  ;;  %v19963_v7 = vld [vmem:[#allocation234_spill] sm:$0xff] }
 0x552   :  { %14260 = vmatprep.subr.bf16.mxu1 %v16474_v21  ;;  %vm19964_vm4 = vnez %v19963_v7  ;;  %v19965_v21 = vld [vmem:[#allocation189_spill] sm:$0xff] }
 0x553   :  { %vm10369_vm0 = vmand %vm284_vm13, %vm19964_vm4 }
 0x554   :  { %12968 = vmatmul.mubr.msk.f32.vlgmr.msra.gmra.mrb[8].mxu0 %vm19959_vm10, %v19957_v30 }
 0x555   :  { %14134 = vmatpush1.bf16.xpose.msra.mxu0 %v16506_v37  ;;  %12969 = vmatprep.mubr.msk.f32.mxu0 %vm19962_vm12, %v19960_v38 }
 0x556   :  { %14136 = vmatprep.subr.bf16.mxu0 %v16510_v39 }
 0x558   :  { %12503 = vmatmul.mubr.f32.vlgmr.msra.gmra.mrb[8].mxu1 %v14703_v15 }
 0x559   :  { %14262 = vmatpush1.bf16.xpose.msra.mxu1 %v16506_v37  ;;  %12572 = vmatprep.mubr.f32.mxu1 %v14703_v15  ;;  %v19970_v37 = vld [vmem:[#allocation237_spill] sm:$0xff] }
 0x55a   :  { %14264 = vmatprep.subr.bf16.mxu1 %v16510_v39  ;;  %v19968_v39 = vld [vmem:[#allocation214_spill] sm:$0xff]  ;;  %vm19971_vm13 = vnez %v19970_v37 }
 0x55d   :  { %14138 = vmatpush1.bf16.xpose.msra.mxu0 %v16563_v0 }
 0x55e   :  { %14140 = vmatprep.subr.bf16.mxu0 %v16570_v22 }
 0x561   :  { %14266 = vmatpush1.bf16.xpose.msra.mxu1 %v16563_v0  ;;  %v19969_v0 = vld [vmem:[#allocation236_spill] sm:$0xff] }
 0x562   :  { %14268 = vmatprep.subr.bf16.mxu1 %v16570_v22  ;;  %v19972_v22 = vld [vmem:[#allocation38_spill] sm:$0xff] }
 0x563   :  { %v12664_v1 = vadd.s32 1, %v19972_v22 }
 0x564   :  { %12970 = vmatmul.mubr.msk.f32.vlgmr.msra.gmra.mrb[8].mxu0 %vm19967_vm2, %v19965_v21 }
 0x565   :  { %14142 = vmatpush1.bf16.xpose.msra.mxu0 %v16606_v31  ;;  %12971 = vmatprep.mubr.msk.f32.mxu0 %vm10369_vm0, %v19968_v39  ;;  %v12665_v63 = vmul.u32 10, %v12664_v1  ;;  %vm12689_vm0 = vcmask 1045504  }
 0x566   :  { %14144 = vmatprep.subr.bf16.mxu0 %v16615_v18 }
 0x567   :  { %vm12666_vm15 = vcmp.lt.s32.totalorder %v19950_v9, %v12665_v63  ;;  %vm12667_vm7 = vcmp.lt.s32.totalorder %v12656_v8, %v12665_v63  ;;  %vm12668_vm10 = vcmp.lt.s32.totalorder %v12657_v36, %v12665_v63 }
 0x568   :  { %12573 = vmatmul.mubr.f32.vlgmr.msra.gmra.mrb[8].mxu1 %v14703_v15 }
 0x569   :  { %14270 = vmatpush1.bf16.xpose.msra.mxu1 %v16606_v31  ;;  %12642 = vmatprep.mubr.f32.mxu1 %v14703_v15  ;;  %v12659_v31 = vmul.u32 10, %v19972_v22 }
 0x56a   :  { %14272 = vmatprep.subr.bf16.mxu1 %v16615_v18  ;;  %v12658_v18 = vadd.s32 24, %v19950_v9 }
 0x56b   :  { %vm12660_vm3 = vcmp.ge.s32.totalorder %v19950_v9, %v12659_v31  ;;  %vm12661_vm5 = vcmp.ge.s32.totalorder %v12656_v8, %v12659_v31  ;;  %vm12662_vm8 = vcmp.ge.s32.totalorder %v12657_v36, %v12659_v31 }
 0x56c   :  { %vm12670_vm9 = vmand %vm12660_vm3, %vm12666_vm15  ;;  %vm12663_vm6 = vcmp.ge.s32.totalorder %v12658_v18, %v12659_v31  ;;  %vm12669_vm1 = vcmp.lt.s32.totalorder %v12658_v18, %v12665_v63  ;;  %vm12685_vm3 = vcmask 244736  }
 0x56d   :  { %14146 = vmatpush1.bf16.xpose.msra.mxu0 %v16663_v50  ;;  %vm12671_vm14 = vmand %vm12661_vm5, %vm12667_vm7  ;;  %vm12763_vm5 = vcmask 17408  }
 0x56e   :  { %vm14276_vm11 = vmpackc.low %vm12671_vm14, %vm12670_vm9 }
 0x56f   :  { %vm12673_vm12 = vmand %vm12663_vm6, %vm12669_vm1 }
 0x570   :  { %vm12672_vm4 = vmand %vm12662_vm8, %vm12668_vm10  ;;  %v12677_v61 = vsel %vm12673_vm12, 1.0, %v14706_v35 }
 0x571   :  { %14274 = vmatpush1.bf16.xpose.msra.mxu1 %v16663_v50  ;;  %v14704_v50 = vmov 0.0|0.0   ;;  %v14279_v2 = vpack.c.bf16 %v12677_v61, %v14703_v15  ;;  %vm14280_vm2 = vmpackc.low %vm12689_vm0, %vm12672_vm4 }
 0x572   :  { %14275 = vmatprep.subr.bf16.mxu0 %v14704_v50 }
 0x574   :  { %12972 = vmatmul.mubr.msk.f32.vlgmr.msra.gmra.mrb[8].mxu0 %vm19971_vm13, %v19969_v0  ;;  %vm14707_vm13 = vmmov 0  }
 0x575   :  { %14277 = vmatpush3.bf16.msk.msra.mxu0 %vm14276_vm11, %v14705_v56  ;;  %12992 = vmatprep.mubr.msk.f32.mxu0 %vm14707_vm13, %v14706_v35 }
 0x576   :  { %14278 = vmatprep.subr.bf16.mxu0 %v14704_v50 }
 0x578   :  { %12643 = vmatmul.mubr.f32.vlgmr.msra.gmra.mrb[8].mxu1 %v14703_v15 }
 0x579   :  { %14281 = vmatpush3.bf16.msk.msra.mxu0 %vm14280_vm2, %v14279_v2 }
 0x647   :  { %v11518_v44 = vpop.f32.mrb[8].mxu0 }
 0x648   :  { %v11526_v51 = vmul.f32 %v11525_v34, %v11518_v44  ;;  %v11520_v52 = vpop.f32.mrb[9].mxu0 }
 0x64a   :  { %v11527_v45 = vadd.f32 %v11526_v51, %v18249_v62 }
 0x64b   :  { %v12644_v15 = vpop.f32.mrb[8].mxu1 }
 0x64c   :  { %v12652_v3 = vmul.f32 %v12651_v27, %v12644_v15  ;;  %v12646_v11 = vpop.f32.mrb[9].mxu1 }
 0x64e   :  { %v12653_v57 = vadd.f32 %v12652_v3, %v11527_v45 }
 0x650   :  { %12993 = vmatmul.mubr.msk.f32.vlgmr.msra.gmra.mrb[10].mxu0 %vm12685_vm3, %v12653_v57 }
 0x723   :  { %v12759_v23 = vpop.f32.mrb[10].mxu0 }
 0x724   :  { %v12760_v17 = vadd.f32 %v12973_v16, %v12759_v23  ;;  %v12994_v25 = vpop.f32.mrb[11].mxu0 }
 0x726   :  { %12764 = vst.msk [vmem:[#allocation2] sm:$0x3] %vm12763_vm5, %v12760_v17 }
 0x727   :  { %14684 = shalt.err (!%p14681_p4)
}
 0x728   :  { %s14685_s15 = scalar_lea.hbm %s18325_s4, 32 }
 0x729   :  { %p14686_p5 = scmp.ne.s32.totalorder %s18325_s4, %s14685_s15  ;;  %p14689_p6 = scmp.lt.u32.totalorder %s14685_s15, %s18325_s4 }
 0x72b   :  { %p14691_p7 = pnand %p14689_p6, %p14686_p5 }
 0x72d   :  { %14694 = shalt.err (!%p14691_p7)
}
 0x72e   :  { %12774 = dma.vmem_to_hbm [thread:$0]  %s12772_s11, 32, %s18325_s4, [#allocation3]  }
 0x72f   :  { %14695 = dma.done.wait [#allocation3], 32  }
 0x730   :  { %14696 = vsyncadd [#allocation3], 4294967264 }
 0x731   :  { %12778 = vsyncpa [#allocation3], 1 }

</bundles_post_ra>
